<compile_context>
chip_gen: v5e
topology: v5e:2x2
jax: 0.10.0
libtpu: 0.0.40
codegen_flags: <defaults>
</compile_context>

<pallas_src>
import functools
import math

import jax
import jax.numpy as jnp
from jax.experimental import pallas as pl
from jax.experimental.pallas import tpu as pltpu

_BN_EPS = 1e-5
# Packed SMEM scalar slots (1-D, 5 words): PReLU slopes of lr_jk_ref / JK_GAMLP_RLU /
# lr_output / label_fc, and the lr_att bias.
_S_PRELU_JK, _S_PRELU_M, _S_PRELU_OUT, _S_PRELU_LBL, _S_ATT_B = range(5)


# ------------------------------- fused kernel --------------------------------

def _build_fused_kernel(plan):
    H = plan["num_hops"]
    alpha = plan["alpha"]
    mxu = plan["mxu_dtype"]

    def kernel(*refs):
        it = iter(refs)
        feat_refs = [next(it) for _ in range(H)]             # (tm, S*F) f32 streamed
        label_ref = next(it)                                 # (tm, nclass) f32 streamed
        agg_refs = [next(it) for _ in range(H)]              # (S*F, F) bf16 resident
        jk_first_ws = [next(it) for _ in range(H)]           # (F, hid) bf16 resident
        jk_first_shift = next(it)                            # (1, hid) f32
        jk_mid_ws = [next(it) for _ in range(plan["jk_mid"])]
        jk_last = (next(it), next(it)) if plan["jk_has_last"] else None
        att_wjk = next(it)                                   # (1, hid) f32
        att_wx = next(it)                                    # (1, F) f32
        out_first_w = next(it)
        out_first_shift = next(it)
        out_mid_ws = [next(it) for _ in range(plan["out_mid"])]
        out_last = (next(it), next(it)) if plan["out_has_last"] else None
        lbl_layers = [(next(it), next(it)) for _ in range(plan["n_label"])]
        scal = next(it)                                      # (5,) f32 in SMEM
        o_ref = next(it)                                     # (tm, nclass) f32 out

        a_jk = scal[_S_PRELU_JK]
        a_m = scal[_S_PRELU_M]
        a_out = scal[_S_PRELU_OUT]
        a_lbl = scal[_S_PRELU_LBL]
        att_b = scal[_S_ATT_B]

        def mmb(x, w_ref):
            # Weights are pre-cast bf16 in the wrapper (no per-step VPU weight cast);
            # activations cast only at the MXU boundary; f32 accumulation.
            return jnp.dot(x.astype(mxu), w_ref[...],
                           preferred_element_type=jnp.float32)

        def prelu(x, a):
            return jnp.where(x >= 0.0, x, x * a)

        def ffn2_first(chunks, w_refs, shift_ref, residual):
            # First Dense of FeedForwardNetII with eval-BN folded into W;
            # per-chunk accumulation replaces concat -> matmul (no lane relayout).
            y = mmb(chunks[0], w_refs[0])
            for c, w in zip(chunks[1:], w_refs[1:]):
                y = y + mmb(c, w)
            y = y + shift_ref[...]
            if residual:  # Dense residual (in == out); needs the concat only then.
                y = y + (chunks[0] if len(chunks) == 1
                         else jnp.concatenate(chunks, axis=-1))
            return y

        def ffn2_tail(x, mid_ws, last, last_res, a):
            h0 = x
            for wg in mid_ws:  # GraphConvolution(hidden, hidden, alpha, bns=False)
                xp = prelu(x, a)
                x = mmb((1.0 - alpha) * xp + alpha * h0, wg) + xp
            if last is not None:
                w_ref, shift_ref = last
                xp = prelu(x, a)
                y = mmb(xp, w_ref) + shift_ref[...]
                if last_res:
                    y = y + xp
                x = y
            return x

        # 1) WeightedAggregator: one MXU matmul per hop against the block matrix
        #    A_h[s*F+f, f] = agg_w_h[s, f].
        #    TODO(synk): when feat_dim % 128 == 0 a direct aligned-slice VPU add path
        #    avoids the extra MXU flops of this form.
        xs = [mmb(feat_refs[h][...], agg_refs[h]) for h in range(H)]

        # 2) lr_jk_ref FeedForwardNetII on concat(xs) (without the concat), then the
        #    outer PReLU of JK_GAMLP_RLU.
        y = ffn2_first(xs, jk_first_ws, jk_first_shift, plan["jk_first_res"])
        jk = prelu(ffn2_tail(y, jk_mid_ws, jk_last, plan["jk_last_res"], a_jk), a_m)

        # 3) hop attention: relu(w_att . cat(jk, x_h) + b) -> softmax over hops
        #    (elementwise mul + lane reduce, no N=1 matmuls).
        s_jk = jnp.sum(jk * att_wjk[...], axis=-1, keepdims=True)
        scores = [jnp.maximum(
            s_jk + jnp.sum(xs[h] * att_wx[...], axis=-1, keepdims=True) + att_b, 0.0)
            for h in range(H)]
        m = scores[0]
        for s in scores[1:]:
            m = jnp.maximum(m, s)
        exps = [jnp.exp(s - m) for s in scores]
        denom = exps[0]
        for e in exps[1:]:
            denom = denom + e
        inv = pl.reciprocal(denom, approx=False)  # exact: keeps the strict gate tight
        final = xs[0] * (exps[0] * inv)
        for h in range(1, H):
            final = final + xs[h] * (exps[h] * inv)

        # 4) lr_output FeedForwardNetII
        y = ffn2_first([final], [out_first_w], out_first_shift, plan["out_first_res"])
        yhat = ffn2_tail(y, out_mid_ws, out_last, plan["out_last_res"], a_out)

        # 5) label_fc FeedForwardNet (Linear bias + eval-BN folded into W / shift)
        z = label_ref[...]
        for lid, (w_ref, shift_ref) in enumerate(lbl_layers):
            z = mmb(z, w_ref) + shift_ref[...]
            if lid < plan["n_label"] - 1:
                z = prelu(z, a_lbl)

        o_ref[...] = yhat + z

    return kernel


# ------------------------------ tile-size policy -------------------------------

def _vmem_capacity_bytes():
    # Conservative default = v7x (64 MiB per TensorCore); query the chip when possible.
    try:
        return int(pltpu.get_tpu_info().vmem_capacity_bytes)
    except Exception:
        return 64 * 1024 * 1024


def _pick_tm(n_rows, per_row_stream_bytes, per_row_act_bytes, resident_bytes):
    cap = _vmem_capacity_bytes()
    budget = int(cap * 0.45)                           # headroom for compiler scratch
    per_row = 2 * per_row_stream_bytes + 2 * per_row_act_bytes   # 2x: double-buffered
    tm = (budget - 2 * resident_bytes) // max(per_row, 1)
    tm = max(8, min(int(tm), 4096))                    # per-step overhead amortized
    if n_rows > 8:
        # >= 2 grid steps: overlap DMA of step i+1 with compute of step i, and let
        # dimension_semantics=('parallel',) shard across v7x's two TensorCores.
        tm = min(tm, max(8, ((n_rows + 1) // 2 + 7) // 8 * 8))
    return max(8, (tm // 8) * 8)


# -------------------------------- call wrapper --------------------------------

def nars_jk_gamlp_forward(feats, label_emb, *, prep, alpha,
                          mxu_dtype=jnp.bfloat16, tm=None,
                          single_buffer_weights=True):
    """Fused NARS_JK_GAMLP_RLU inference forward.  feats: list of [N, S, F] f32."""
    H = prep["num_hops"]
    S = prep["subset_dim"]
    F = prep["feat_dim"]
    hidden = prep["hidden"]
    jk, out = prep["jk"], prep["out"]
    nclass = prep["label_shifts"][-1].shape[1]
    n = feats[0].shape[0]

    plan = dict(num_hops=H, alpha=alpha, mxu_dtype=mxu_dtype,
                jk_mid=len(jk["mid_ws"]), jk_has_last=jk["last_w"] is not None,
                jk_first_res=jk["first_res"], jk_last_res=jk["last_res"],
                out_mid=len(out["mid_ws"]), out_has_last=out["last_w"] is not None,
                out_first_res=out["first_res"], out_last_res=out["last_res"],
                n_label=len(prep["label_ws"]))

    label_pairs = [x for pair in zip(prep["label_ws"], prep["label_shifts"]) for x in pair]
    resident = (list(prep["agg_mats"]) + list(jk["first_ws"]) + [jk["first_shift"]]
                + list(jk["mid_ws"])
                + ([jk["last_w"], jk["last_shift"]] if jk["last_w"] is not None else [])
                + [prep["att_wjk"], prep["att_wx"], out["first_ws"][0], out["first_shift"]]
                + list(out["mid_ws"])
                + ([out["last_w"], out["last_shift"]] if out["last_w"] is not None else [])
                + label_pairs)
    resident_bytes = sum(int(x.size) * x.dtype.itemsize for x in resident)

    # TODO(synk): optionally stream feats as bf16 (halves the dominant HBM stream at
    # production N); kept f32 here to stay numerically tight to the module.
    per_row_stream = 4 * (H * S * F + nclass) + 4 * nclass          # f32 rows in + out
    per_row_act = 4 * (3 * H * F + 8 * hidden + 4 * nclass)         # rough live f32 temps
    if tm is None:
        tm = _pick_tm(n, per_row_stream, per_row_act, resident_bytes)

    grid_n = -(-n // tm)
    n_pad = grid_n * tm

    flats = [f.reshape(n, S * F) for f in feats]                    # free, lane-dense
    label = label_emb
    if n_pad != n:                                                  # masked tail via pad
        flats = [jnp.pad(x, ((0, n_pad - n), (0, 0))) for x in flats]
        label = jnp.pad(label, ((0, n_pad - n), (0, 0)))

    inputs, in_specs = [], []
    res_kwargs = {"pipeline_mode": pl.Buffered(1)} if single_buffer_weights else {}

    def add_rows(x):
        inputs.append(x)
        in_specs.append(pl.BlockSpec((tm, x.shape[1]), lambda i: (i, 0)))

    def add_resident(x):
        inputs.append(x)
        in_specs.append(pl.BlockSpec(x.shape, lambda i, _z=(0,) * x.ndim: _z,
                                     **res_kwargs))

    for x in flats:
        add_rows(x)
    add_rows(label)
    for x in resident:
        add_resident(x)
    inputs.append(prep["scalars"])                                  # (5,) packed scalars
    in_specs.append(pl.BlockSpec(memory_space=pltpu.MemorySpace.SMEM))

    weight_copies = 1 if single_buffer_weights else 2
    vmem_limit = (weight_copies * resident_bytes
                  + tm * (2 * per_row_stream + 2 * per_row_act) + (16 << 20))
    vmem_limit = int(min(max(vmem_limit, 16 << 20), _vmem_capacity_bytes() * 9 // 10))

    out_arr = pl.pallas_call(
        _build_fused_kernel(plan),
        out_shape=jax.ShapeDtypeStruct((n_pad, nclass), jnp.float32),
        grid=(grid_n,),
        in_specs=in_specs,
        out_specs=pl.BlockSpec((tm, nclass), lambda i: (i, 0)),
        compiler_params=pltpu.CompilerParams(
            dimension_semantics=("parallel",),
            vmem_limit_bytes=vmem_limit),
    )(*inputs)
    # TODO(synk): if the 8-wide output store ever binds, pack rows into lanes
    # ((tm/16, 16*nclass)) or pad nclass to 128 for an unmasked lane-dense store.
    return out_arr[:n] if n_pad != n else out_arr


# --------------------------------- parameters ---------------------------------

def init_params(key, *, feat_dim, hidden, nclass, num_hops, subset_dim,
                n_layers_1, n_layers_2, n_layers_3):
    """Raw (un-folded) parameters mirroring the PyTorch module, with NON-trivial
    BatchNorm running stats so the eval-BN folding is exercised for real."""
    keys = iter(jax.random.split(key, 256))
    nxt = lambda: next(keys)
    relu_gain = math.sqrt(2.0)

    def xavier(shape, gain=1.0):
        fan_in, fan_out = shape
        bound = gain * math.sqrt(6.0 / (fan_in + fan_out))
        return jax.random.uniform(nxt(), shape, jnp.float32, -bound, bound)

    def bn_stats(dim):
        return {"gamma": 1.0 + 0.1 * jax.random.normal(nxt(), (dim,), jnp.float32),
                "beta": 0.05 * jax.random.normal(nxt(), (dim,), jnp.float32),
                "mean": 0.05 * jax.random.normal(nxt(), (dim,), jnp.float32),
                "var": 1.0 + 0.1 * jax.random.uniform(nxt(), (dim,), jnp.float32)}

    def dense_layer(in_f, out_f):        # Dense: uniform(-1/sqrt(out),..), bias='bn'
        stdv = 1.0 / math.sqrt(out_f)
        return {"type": "dense",
                "w": jax.random.uniform(nxt(), (in_f, out_f), jnp.float32, -stdv, stdv),
                "bn": bn_stats(out_f)}

    def gcn_layer(in_f, out_f):          # GraphConvolution, bns=False
        stdv = 1.0 / math.sqrt(out_f)
        return {"type": "gcn",
                "w": jax.random.uniform(nxt(), (in_f, out_f), jnp.float32, -stdv, stdv)}

    def ffn2(in_f, hid, out_f, n_layers):
        if n_layers == 1:
            return {"layers": [dense_layer(in_f, out_f)]}
        return {"layers": ([dense_layer(in_f, hid)]
                           + [gcn_layer(hid, hid) for _ in range(n_layers - 2)]
                           + [dense_layer(hid, out_f)])}

    def linear_layer(in_f, out_f, with_bn):   # FeedForwardNet layer (xavier relu gain)
        return {"w": xavier((in_f, out_f), relu_gain),
                "b": jnp.zeros((out_f,), jnp.float32),
                "bn": bn_stats(out_f) if with_bn else None}

    def ffn1(in_f, hid, out_f, n_layers):
        if n_layers == 1:
            return {"layers": [linear_layer(in_f, out_f, False)]}
        return {"layers": ([linear_layer(in_f, hid, True)]
                           + [linear_layer(hid, hid, True) for _ in range(n_layers - 2)]
                           + [linear_layer(hid, out_f, False)])}

    return {
        "agg": [xavier((subset_dim, feat_dim)) for _ in range(num_hops)],
        "lr_jk_ref": ffn2(num_hops * feat_dim, hidden, hidden, n_layers_1),
        "lr_output": ffn2(feat_dim, hidden, nclass, n_layers_2),
        "lr_att_w": xavier((hidden + feat_dim, 1), relu_gain),
        "lr_att_b": 0.0,
        "label_fc": ffn1(nclass, hidden, nclass, n_layers_3),
        "prelu_jk": 0.25, "prelu_model": 0.25, "prelu_out": 0.25, "prelu_label": 0.25,
    }
    # TODO(synk): res_fc / pre_process MLPs are inactive under pre_process=False,
    # residual=False and are not instantiated.


def prepare_params(raw, *, mxu_dtype=jnp.bfloat16, bn_eps=_BN_EPS):
    """Offline folding / packing for the fused kernel:
       * eval-BN (any running stats) + Linear bias folded into (W', shift),
       * all MXU weights pre-cast to bf16,
       * WeightedAggregator rewritten as per-hop (S*F, F) block matrices,
       * lr_jk_ref first weight pre-split per hop (kills the concat),
       * all scalars packed into one 1-D SMEM array."""

    def fold(w, bn, bias=None):
        out_f = w.shape[1]
        if bn is None:
            scale = jnp.ones((out_f,), jnp.float32)
            shift = jnp.zeros((out_f,), jnp.float32)
        else:
            scale = bn["gamma"] / jnp.sqrt(bn["var"] + bn_eps)
            shift = bn["beta"] - bn["mean"] * scale
        if bias is not None:
            shift = shift + bias * scale
        return (w * scale[None, :]).astype(mxu_dtype), shift[None, :].astype(jnp.float32)

    def prep_ffn2(p, split_first):
        layers = p["layers"]
        first = layers[0]
        w0, s0 = fold(first["w"], first["bn"])
        in0, out0 = first["w"].shape
        chunk = in0 // split_first
        d = {"first_ws": [w0[c * chunk:(c + 1) * chunk, :] for c in range(split_first)],
             "first_shift": s0,
             "first_res": in0 == out0,                    # explicit residual flag
             "mid_ws": [lyr["w"].astype(mxu_dtype) for lyr in layers[1:-1]],
             "last_w": None, "last_shift": None, "last_res": False}
        if len(layers) > 1:
            last = layers[-1]
            d["last_w"], d["last_shift"] = fold(last["w"], last["bn"])
            d["last_res"] = last["w"].shape[0] == last["w"].shape[1]
        return d

    subset_dim, feat_dim = raw["agg"][0].shape
    num_hops = len(raw["agg"])
    hidden = raw["lr_att_w"].shape[0] - feat_dim

    eye = jnp.eye(feat_dim, dtype=jnp.float32)
    agg_mats = [(a[:, :, None] * eye[None]).reshape(subset_dim * feat_dim, feat_dim)
                .astype(mxu_dtype) for a in raw["agg"]]

    label_ws, label_shifts = [], []
    for lyr in raw["label_fc"]["layers"]:
        w, s = fold(lyr["w"], lyr["bn"], bias=lyr["b"])
        label_ws.append(w)
        label_shifts.append(s)

    scalars = jnp.array([raw["prelu_jk"], raw["prelu_model"], raw["prelu_out"],
                         raw["prelu_label"], raw["lr_att_b"]], jnp.float32)

    return {"num_hops": num_hops, "subset_dim": subset_dim, "feat_dim": feat_dim,
            "hidden": hidden,
            "agg_mats": agg_mats,
            "jk": prep_ffn2(raw["lr_jk_ref"], split_first=num_hops),
            "out": prep_ffn2(raw["lr_output"], split_first=1),
            "att_wjk": raw["lr_att_w"][:hidden, 0][None, :].astype(jnp.float32),
            "att_wx": raw["lr_att_w"][hidden:, 0][None, :].astype(jnp.float32),
            "label_ws": label_ws, "label_shifts": label_shifts,
            "scalars": scalars}


# ------------------------------ pure-JAX references ----------------------------

def ref_forward_prepared(feats, label_emb, prep, *, alpha, mxu_dtype=jnp.bfloat16):
    """Pure-JAX replica of the kernel math (same folded bf16 weights, same structure).
    Used as the strict, precision-matched gate."""
    H, S, F = prep["num_hops"], prep["subset_dim"], prep["feat_dim"]

    def mmb(x, w):
        return jnp.dot(x.astype(mxu_dtype), w, preferred_element_type=jnp.float32)

    def prelu(x, a):
        return jnp.where(x >= 0.0, x, x * a)

    sc = prep["scalars"]
    a_jk, a_m, a_out, a_lbl, att_b = (sc[i] for i in range(5))

    def ffn2_first(chunks, p):
        y = mmb(chunks[0], p["first_ws"][0])
        for c, w in zip(chunks[1:], p["first_ws"][1:]):
            y = y + mmb(c, w)
        y = y + p["first_shift"]
        if p["first_res"]:
            y = y + (chunks[0] if len(chunks) == 1 else jnp.concatenate(chunks, axis=-1))
        return y

    def ffn2_tail(x, p, a):
        h0 = x
        for wg in p["mid_ws"]:
            xp = prelu(x, a)
            x = mmb((1.0 - alpha) * xp + alpha * h0, wg) + xp
        if p["last_w"] is not None:
            xp = prelu(x, a)
            y = mmb(xp, p["last_w"]) + p["last_shift"]
            if p["last_res"]:
                y = y + xp
            x = y
        return x

    n = feats[0].shape[0]
    flats = [f.reshape(n, S * F) for f in feats]
    xs = [mmb(flats[h], prep["agg_mats"][h]) for h in range(H)]
    jk = prelu(ffn2_tail(ffn2_first(xs, prep["jk"]), prep["jk"], a_jk), a_m)
    s_jk = jnp.sum(jk * prep["att_wjk"], axis=-1, keepdims=True)
    scores = [jnp.maximum(
        s_jk + jnp.sum(xs[h] * prep["att_wx"], axis=-1, keepdims=True) + att_b, 0.0)
        for h in range(H)]
    m = scores[0]
    for s in scores[1:]:
        m = jnp.maximum(m, s)
    exps = [jnp.exp(s - m) for s in scores]
    denom = exps[0]
    for e in exps[1:]:
        denom = denom + e
    inv = 1.0 / denom
    final = xs[0] * (exps[0] * inv)
    for h in range(1, H):
        final = final + xs[h] * (exps[h] * inv)
    yhat = ffn2_tail(ffn2_first([final], prep["out"]), prep["out"], a_out)
    z = label_emb
    nl = len(prep["label_ws"])
    for lid, (w, s) in enumerate(zip(prep["label_ws"], prep["label_shifts"])):
        z = mmb(z, w) + s
        if lid < nl - 1:
            z = prelu(z, a_lbl)
    return yhat + z


def ref_forward_f32(feats, label_emb, raw, *, alpha, bn_eps=_BN_EPS):
    """Straight port of the PyTorch module's eval-mode forward in f32 (loose gate)."""
    hi = jax.lax.Precision.HIGHEST

    def mm(x, w):
        return jnp.dot(x, w, precision=hi)

    def prelu(x, a):
        return jnp.where(x >= 0.0, x, x * a)

    def bn_eval(x, bn):
        scale = bn["gamma"] / jnp.sqrt(bn["var"] + bn_eps)
        return (x - bn["mean"]) * scale + bn["beta"]

    def ffn2(x, p, a):
        layers = p["layers"]

        def dense(x_in, layer):
            y = bn_eval(mm(x_in, layer["w"]), layer["bn"])
            if layer["w"].shape[0] == layer["w"].shape[1]:
                y = y + x_in
            return y

        x = dense(x, layers[0])
        h0 = x
        for lid in range(1, len(layers)):
            xp = prelu(x, a)
            layer = layers[lid]
            if layer["type"] == "gcn":
                y = mm((1.0 - alpha) * xp + alpha * h0, layer["w"])
                if layer["w"].shape[0] == layer["w"].shape[1]:
                    y = y + xp
                x = y
            else:
                x = dense(xp, layer)
        return x

    def ffn1(x, p, a):
        layers = p["layers"]
        for lid, layer in enumerate(layers):
            x = mm(x, layer["w"]) + layer["b"]
            if lid < len(layers) - 1:
                x = prelu(bn_eval(x, layer["bn"]), a)
        return x

    xs = [jnp.sum(f * w[None], axis=1) for f, w in zip(feats, raw["agg"])]
    concat = jnp.concatenate(xs, axis=1)
    jk = prelu(ffn2(concat, raw["lr_jk_ref"], raw["prelu_jk"]), raw["prelu_model"])
    hidden = jk.shape[1]
    w_att = raw["lr_att_w"][:, 0]
    scores = [jnp.maximum(mm(jk, w_att[:hidden]) + mm(x, w_att[hidden:])
                          + raw["lr_att_b"], 0.0)[:, None] for x in xs]
    att = jax.nn.softmax(jnp.concatenate(scores, axis=1), axis=1)
    final = xs[0] * att[:, 0:1]
    for h in range(1, len(xs)):
        final = final + xs[h] * att[:, h:h + 1]
    yhat = ffn2(final, raw["lr_output"], raw["prelu_out"])
    return yhat + ffn1(label_emb, raw["label_fc"], raw["prelu_label"])


# ------------------------------------ main -------------------------------------

if __name__ == "__main__":
    N, SUBSET, FEAT, HID, NCLASS = 128, 4, 32, 32, 8
    NUM_HOPS = 3
    ALPHA = 0.5
    N_LAYERS_1 = N_LAYERS_2 = N_LAYERS_3 = 3

    key = jax.random.PRNGKey(0)
    kf, kl, kp = jax.random.split(key, 3)
    feats = [jax.random.normal(jax.random.fold_in(kf, i), (N, SUBSET, FEAT), jnp.float32)
             for i in range(NUM_HOPS)]
    label_emb = jax.random.normal(kl, (N, NCLASS), jnp.float32)

    raw = init_params(kp, feat_dim=FEAT, hidden=HID, nclass=NCLASS, num_hops=NUM_HOPS,
                      subset_dim=SUBSET, n_layers_1=N_LAYERS_1, n_layers_2=N_LAYERS_2,
                      n_layers_3=N_LAYERS_3)
    prep = prepare_params(raw)

    ref_exact = ref_forward_f32(feats, label_emb, raw, alpha=ALPHA)
    ref_match = ref_forward_prepared(feats, label_emb, prep, alpha=ALPHA)

    def run(single_buffer_weights):
        fwd = jax.jit(functools.partial(nars_jk_gamlp_forward, prep=prep, alpha=ALPHA,
                                        single_buffer_weights=single_buffer_weights))
        out = jax.block_until_ready(fwd(feats, label_emb))
        assert out.shape == (N, NCLASS) and out.dtype == jnp.float32
        # Strict gate: pure-JAX replica of the kernel's exact math (same folded bf16
        # weights, same accumulation structure).
        if not jnp.allclose(out, ref_match, rtol=1e-3, atol=1e-3):
            err = float(jnp.max(jnp.abs(out - ref_match)))
            raise AssertionError(
                f"mismatch vs precision-matched reference (max |diff| = {err:.3e})")
        # Loose sanity gate vs exact-f32 module semantics: the only deviation is the
        # deliberate bf16 rounding of MXU operands / folded aggregation weights.
        if not jnp.allclose(out, ref_exact, rtol=1e-1, atol=1e-1):
            err = float(jnp.max(jnp.abs(out - ref_exact)))
            raise AssertionError(
                f"deviates too far from f32 module semantics (max |diff| = {err:.3e})")
        return out

    try:
        out = run(single_buffer_weights=True)
    except Exception:
        # Fall back if this JAX/libtpu build rejects pl.Buffered(1) on resident specs
        # (default double-buffering of the tiny weights is perfectly fine).
        out = run(single_buffer_weights=False)

    print("KERNEL_OK")
</pallas_src>

<mosaic_0001>
module attributes {stable_mosaic.version = 11 : i64} {
  func.func @kernel(%arg0: i32, %arg1: memref<64x128xf32, #tpu.memory_space<vmem>>, %arg2: memref<64x128xf32, #tpu.memory_space<vmem>>, %arg3: memref<64x128xf32, #tpu.memory_space<vmem>>, %arg4: memref<64x8xf32, #tpu.memory_space<vmem>>, %arg5: memref<128x32xbf16, #tpu.memory_space<vmem>>, %arg6: memref<128x32xbf16, #tpu.memory_space<vmem>>, %arg7: memref<128x32xbf16, #tpu.memory_space<vmem>>, %arg8: memref<32x32xbf16, #tpu.memory_space<vmem>>, %arg9: memref<32x32xbf16, #tpu.memory_space<vmem>>, %arg10: memref<32x32xbf16, #tpu.memory_space<vmem>>, %arg11: memref<1x32xf32, #tpu.memory_space<vmem>>, %arg12: memref<32x32xbf16, #tpu.memory_space<vmem>>, %arg13: memref<32x32xbf16, #tpu.memory_space<vmem>>, %arg14: memref<1x32xf32, #tpu.memory_space<vmem>>, %arg15: memref<1x32xf32, #tpu.memory_space<vmem>>, %arg16: memref<1x32xf32, #tpu.memory_space<vmem>>, %arg17: memref<32x32xbf16, #tpu.memory_space<vmem>>, %arg18: memref<1x32xf32, #tpu.memory_space<vmem>>, %arg19: memref<32x32xbf16, #tpu.memory_space<vmem>>, %arg20: memref<32x8xbf16, #tpu.memory_space<vmem>>, %arg21: memref<1x8xf32, #tpu.memory_space<vmem>>, %arg22: memref<8x32xbf16, #tpu.memory_space<vmem>>, %arg23: memref<1x32xf32, #tpu.memory_space<vmem>>, %arg24: memref<32x32xbf16, #tpu.memory_space<vmem>>, %arg25: memref<1x32xf32, #tpu.memory_space<vmem>>, %arg26: memref<32x8xbf16, #tpu.memory_space<vmem>>, %arg27: memref<1x8xf32, #tpu.memory_space<vmem>>, %arg28: memref<5xf32, #tpu.memory_space<smem>>, %arg29: memref<64x8xf32, #tpu.memory_space<vmem>>) attributes {dimension_semantics = [#tpu.dimension_semantics<parallel>], iteration_bounds = array<i64: 2>, scalar_prefetch = 0 : i64, scratch_operands = 0 : i64, tpu.core_type = #tpu.core_type<tc>, window_params = [{transform_indices = @transform_0, window_bounds = array<i64: 64, 128>}, {transform_indices = @transform_1, window_bounds = array<i64: 64, 128>}, {transform_indices = @transform_2, window_bounds = array<i64: 64, 128>}, {transform_indices = @transform_3, window_bounds = array<i64: 64, 8>}, {pipeline_mode = #tpu.pipeline_mode<synchronous>, transform_indices = @transform_4, window_bounds = array<i64: 128, 32>}, {pipeline_mode = #tpu.pipeline_mode<synchronous>, transform_indices = @transform_5, window_bounds = array<i64: 128, 32>}, {pipeline_mode = #tpu.pipeline_mode<synchronous>, transform_indices = @transform_6, window_bounds = array<i64: 128, 32>}, {pipeline_mode = #tpu.pipeline_mode<synchronous>, transform_indices = @transform_7, window_bounds = array<i64: 32, 32>}, {pipeline_mode = #tpu.pipeline_mode<synchronous>, transform_indices = @transform_8, window_bounds = array<i64: 32, 32>}, {pipeline_mode = #tpu.pipeline_mode<synchronous>, transform_indices = @transform_9, window_bounds = array<i64: 32, 32>}, {pipeline_mode = #tpu.pipeline_mode<synchronous>, transform_indices = @transform_10, window_bounds = array<i64: 1, 32>}, {pipeline_mode = #tpu.pipeline_mode<synchronous>, transform_indices = @transform_11, window_bounds = array<i64: 32, 32>}, {pipeline_mode = #tpu.pipeline_mode<synchronous>, transform_indices = @transform_12, window_bounds = array<i64: 32, 32>}, {pipeline_mode = #tpu.pipeline_mode<synchronous>, transform_indices = @transform_13, window_bounds = array<i64: 1, 32>}, {pipeline_mode = #tpu.pipeline_mode<synchronous>, transform_indices = @transform_14, window_bounds = array<i64: 1, 32>}, {pipeline_mode = #tpu.pipeline_mode<synchronous>, transform_indices = @transform_15, window_bounds = array<i64: 1, 32>}, {pipeline_mode = #tpu.pipeline_mode<synchronous>, transform_indices = @transform_16, window_bounds = array<i64: 32, 32>}, {pipeline_mode = #tpu.pipeline_mode<synchronous>, transform_indices = @transform_17, window_bounds = array<i64: 1, 32>}, {pipeline_mode = #tpu.pipeline_mode<synchronous>, transform_indices = @transform_18, window_bounds = array<i64: 32, 32>}, {pipeline_mode = #tpu.pipeline_mode<synchronous>, transform_indices = @transform_19, window_bounds = array<i64: 32, 8>}, {pipeline_mode = #tpu.pipeline_mode<synchronous>, transform_indices = @transform_20, window_bounds = array<i64: 1, 8>}, {pipeline_mode = #tpu.pipeline_mode<synchronous>, transform_indices = @transform_21, window_bounds = array<i64: 8, 32>}, {pipeline_mode = #tpu.pipeline_mode<synchronous>, transform_indices = @transform_22, window_bounds = array<i64: 1, 32>}, {pipeline_mode = #tpu.pipeline_mode<synchronous>, transform_indices = @transform_23, window_bounds = array<i64: 32, 32>}, {pipeline_mode = #tpu.pipeline_mode<synchronous>, transform_indices = @transform_24, window_bounds = array<i64: 1, 32>}, {pipeline_mode = #tpu.pipeline_mode<synchronous>, transform_indices = @transform_25, window_bounds = array<i64: 32, 8>}, {pipeline_mode = #tpu.pipeline_mode<synchronous>, transform_indices = @transform_26, window_bounds = array<i64: 1, 8>}, {transform_indices = @transform_27, window_bounds = array<i64: 5>}, {transform_indices = @transform_28, window_bounds = array<i64: 64, 8>}]} {
    %c0 = arith.constant 0 : index
    %0 = memref.load %arg28[%c0] : memref<5xf32, #tpu.memory_space<smem>>
    %c1 = arith.constant 1 : index
    %1 = memref.load %arg28[%c1] : memref<5xf32, #tpu.memory_space<smem>>
    %c2 = arith.constant 2 : index
    %2 = memref.load %arg28[%c2] : memref<5xf32, #tpu.memory_space<smem>>
    %c3 = arith.constant 3 : index
    %3 = memref.load %arg28[%c3] : memref<5xf32, #tpu.memory_space<smem>>
    %c4 = arith.constant 4 : index
    %4 = memref.load %arg28[%c4] : memref<5xf32, #tpu.memory_space<smem>>
    %c0_0 = arith.constant 0 : index
    %c0_1 = arith.constant 0 : index
    %5 = vector.load %arg1[%c0_0, %c0_1] : memref<64x128xf32, #tpu.memory_space<vmem>>, vector<64x128xf32>
    %6 = arith.truncf %5 : vector<64x128xf32> to vector<64x128xbf16>
    %c0_2 = arith.constant 0 : index
    %c0_3 = arith.constant 0 : index
    %7 = vector.load %arg5[%c0_2, %c0_3] : memref<128x32xbf16, #tpu.memory_space<vmem>>, vector<128x32xbf16>
    %cst = arith.constant dense<0.000000e+00> : vector<64x32xf32>
    %8 = tpu.matmul %6, %7, %cst {dimension_numbers = #tpu.dot_dimension_numbers<[1], [0], [0], [1], [0, 0, 1, 1], [], []>} : vector<64x128xbf16>, vector<128x32xbf16>, vector<64x32xf32> -> vector<64x32xf32>
    %c0_4 = arith.constant 0 : index
    %c0_5 = arith.constant 0 : index
    %9 = vector.load %arg2[%c0_4, %c0_5] : memref<64x128xf32, #tpu.memory_space<vmem>>, vector<64x128xf32>
    %10 = arith.truncf %9 : vector<64x128xf32> to vector<64x128xbf16>
    %c0_6 = arith.constant 0 : index
    %c0_7 = arith.constant 0 : index
    %11 = vector.load %arg6[%c0_6, %c0_7] : memref<128x32xbf16, #tpu.memory_space<vmem>>, vector<128x32xbf16>
    %cst_8 = arith.constant dense<0.000000e+00> : vector<64x32xf32>
    %12 = tpu.matmul %10, %11, %cst_8 {dimension_numbers = #tpu.dot_dimension_numbers<[1], [0], [0], [1], [0, 0, 1, 1], [], []>} : vector<64x128xbf16>, vector<128x32xbf16>, vector<64x32xf32> -> vector<64x32xf32>
    %c0_9 = arith.constant 0 : index
    %c0_10 = arith.constant 0 : index
    %13 = vector.load %arg3[%c0_9, %c0_10] : memref<64x128xf32, #tpu.memory_space<vmem>>, vector<64x128xf32>
    %14 = arith.truncf %13 : vector<64x128xf32> to vector<64x128xbf16>
    %c0_11 = arith.constant 0 : index
    %c0_12 = arith.constant 0 : index
    %15 = vector.load %arg7[%c0_11, %c0_12] : memref<128x32xbf16, #tpu.memory_space<vmem>>, vector<128x32xbf16>
    %cst_13 = arith.constant dense<0.000000e+00> : vector<64x32xf32>
    %16 = tpu.matmul %14, %15, %cst_13 {dimension_numbers = #tpu.dot_dimension_numbers<[1], [0], [0], [1], [0, 0, 1, 1], [], []>} : vector<64x128xbf16>, vector<128x32xbf16>, vector<64x32xf32> -> vector<64x32xf32>
    %17 = arith.truncf %8 : vector<64x32xf32> to vector<64x32xbf16>
    %c0_14 = arith.constant 0 : index
    %c0_15 = arith.constant 0 : index
    %18 = vector.load %arg8[%c0_14, %c0_15] : memref<32x32xbf16, #tpu.memory_space<vmem>>, vector<32x32xbf16>
    %cst_16 = arith.constant dense<0.000000e+00> : vector<64x32xf32>
    %19 = tpu.matmul %17, %18, %cst_16 {dimension_numbers = #tpu.dot_dimension_numbers<[1], [0], [0], [1], [0, 0, 1, 1], [], []>} : vector<64x32xbf16>, vector<32x32xbf16>, vector<64x32xf32> -> vector<64x32xf32>
    %20 = arith.truncf %12 : vector<64x32xf32> to vector<64x32xbf16>
    %c0_17 = arith.constant 0 : index
    %c0_18 = arith.constant 0 : index
    %21 = vector.load %arg9[%c0_17, %c0_18] : memref<32x32xbf16, #tpu.memory_space<vmem>>, vector<32x32xbf16>
    %cst_19 = arith.constant dense<0.000000e+00> : vector<64x32xf32>
    %22 = tpu.matmul %20, %21, %cst_19 {dimension_numbers = #tpu.dot_dimension_numbers<[1], [0], [0], [1], [0, 0, 1, 1], [], []>} : vector<64x32xbf16>, vector<32x32xbf16>, vector<64x32xf32> -> vector<64x32xf32>
    %23 = arith.addf %19, %22 : vector<64x32xf32>
    %24 = arith.truncf %16 : vector<64x32xf32> to vector<64x32xbf16>
    %c0_20 = arith.constant 0 : index
    %c0_21 = arith.constant 0 : index
    %25 = vector.load %arg10[%c0_20, %c0_21] : memref<32x32xbf16, #tpu.memory_space<vmem>>, vector<32x32xbf16>
    %cst_22 = arith.constant dense<0.000000e+00> : vector<64x32xf32>
    %26 = tpu.matmul %24, %25, %cst_22 {dimension_numbers = #tpu.dot_dimension_numbers<[1], [0], [0], [1], [0, 0, 1, 1], [], []>} : vector<64x32xbf16>, vector<32x32xbf16>, vector<64x32xf32> -> vector<64x32xf32>
    %27 = arith.addf %23, %26 : vector<64x32xf32>
    %c0_23 = arith.constant 0 : index
    %c0_24 = arith.constant 0 : index
    %28 = vector.load %arg11[%c0_23, %c0_24] : memref<1x32xf32, #tpu.memory_space<vmem>>, vector<1x32xf32>
    %29 = vector.broadcast %28 : vector<1x32xf32> to vector<64x32xf32>
    %30 = arith.addf %27, %29 : vector<64x32xf32>
    %cst_25 = arith.constant 0.000000e+00 : f32
    %31 = vector.broadcast %cst_25 : f32 to vector<64x32xf32>
    %32 = arith.cmpf oge, %30, %31 : vector<64x32xf32>
    %33 = vector.broadcast %0 : f32 to vector<64x32xf32>
    %34 = arith.mulf %30, %33 : vector<64x32xf32>
    %35 = arith.select %32, %30, %34 : vector<64x32xi1>, vector<64x32xf32>
    %cst_26 = arith.constant 5.000000e-01 : f32
    %36 = vector.broadcast %cst_26 : f32 to vector<64x32xf32>
    %37 = arith.mulf %36, %35 : vector<64x32xf32>
    %cst_27 = arith.constant 5.000000e-01 : f32
    %38 = vector.broadcast %cst_27 : f32 to vector<64x32xf32>
    %39 = arith.mulf %38, %30 : vector<64x32xf32>
    %40 = arith.addf %37, %39 : vector<64x32xf32>
    %41 = arith.truncf %40 : vector<64x32xf32> to vector<64x32xbf16>
    %c0_28 = arith.constant 0 : index
    %c0_29 = arith.constant 0 : index
    %42 = vector.load %arg12[%c0_28, %c0_29] : memref<32x32xbf16, #tpu.memory_space<vmem>>, vector<32x32xbf16>
    %cst_30 = arith.constant dense<0.000000e+00> : vector<64x32xf32>
    %43 = tpu.matmul %41, %42, %cst_30 {dimension_numbers = #tpu.dot_dimension_numbers<[1], [0], [0], [1], [0, 0, 1, 1], [], []>} : vector<64x32xbf16>, vector<32x32xbf16>, vector<64x32xf32> -> vector<64x32xf32>
    %44 = arith.addf %43, %35 : vector<64x32xf32>
    %cst_31 = arith.constant 0.000000e+00 : f32
    %45 = vector.broadcast %cst_31 : f32 to vector<64x32xf32>
    %46 = arith.cmpf oge, %44, %45 : vector<64x32xf32>
    %47 = vector.broadcast %0 : f32 to vector<64x32xf32>
    %48 = arith.mulf %44, %47 : vector<64x32xf32>
    %49 = arith.select %46, %44, %48 : vector<64x32xi1>, vector<64x32xf32>
    %50 = arith.truncf %49 : vector<64x32xf32> to vector<64x32xbf16>
    %c0_32 = arith.constant 0 : index
    %c0_33 = arith.constant 0 : index
    %51 = vector.load %arg13[%c0_32, %c0_33] : memref<32x32xbf16, #tpu.memory_space<vmem>>, vector<32x32xbf16>
    %cst_34 = arith.constant dense<0.000000e+00> : vector<64x32xf32>
    %52 = tpu.matmul %50, %51, %cst_34 {dimension_numbers = #tpu.dot_dimension_numbers<[1], [0], [0], [1], [0, 0, 1, 1], [], []>} : vector<64x32xbf16>, vector<32x32xbf16>, vector<64x32xf32> -> vector<64x32xf32>
    %c0_35 = arith.constant 0 : index
    %c0_36 = arith.constant 0 : index
    %53 = vector.load %arg14[%c0_35, %c0_36] : memref<1x32xf32, #tpu.memory_space<vmem>>, vector<1x32xf32>
    %54 = vector.broadcast %53 : vector<1x32xf32> to vector<64x32xf32>
    %55 = arith.addf %52, %54 : vector<64x32xf32>
    %56 = arith.addf %55, %49 : vector<64x32xf32>
    %cst_37 = arith.constant 0.000000e+00 : f32
    %57 = vector.broadcast %cst_37 : f32 to vector<64x32xf32>
    %58 = arith.cmpf oge, %56, %57 : vector<64x32xf32>
    %59 = vector.broadcast %1 : f32 to vector<64x32xf32>
    %60 = arith.mulf %56, %59 : vector<64x32xf32>
    %61 = arith.select %58, %56, %60 : vector<64x32xi1>, vector<64x32xf32>
    %c0_38 = arith.constant 0 : index
    %c0_39 = arith.constant 0 : index
    %62 = vector.load %arg15[%c0_38, %c0_39] : memref<1x32xf32, #tpu.memory_space<vmem>>, vector<1x32xf32>
    %63 = vector.broadcast %62 : vector<1x32xf32> to vector<64x32xf32>
    %64 = arith.mulf %61, %63 : vector<64x32xf32>
    %cst_40 = arith.constant dense<0.000000e+00> : vector<64xf32>
    %65 = vector.multi_reduction <add>, %64, %cst_40 [1] : vector<64x32xf32> to vector<64xf32>
    %66 = vector.shape_cast %65 : vector<64xf32> to vector<64x1xf32>
    %c0_41 = arith.constant 0 : index
    %c0_42 = arith.constant 0 : index
    %67 = vector.load %arg16[%c0_41, %c0_42] : memref<1x32xf32, #tpu.memory_space<vmem>>, vector<1x32xf32>
    %68 = vector.broadcast %67 : vector<1x32xf32> to vector<64x32xf32>
    %69 = arith.mulf %8, %68 : vector<64x32xf32>
    %cst_43 = arith.constant dense<0.000000e+00> : vector<64xf32>
    %70 = vector.multi_reduction <add>, %69, %cst_43 [1] : vector<64x32xf32> to vector<64xf32>
    %71 = vector.shape_cast %70 : vector<64xf32> to vector<64x1xf32>
    %72 = arith.addf %66, %71 : vector<64x1xf32>
    %73 = vector.broadcast %4 : f32 to vector<64x1xf32>
    %74 = arith.addf %72, %73 : vector<64x1xf32>
    %cst_44 = arith.constant 0.000000e+00 : f32
    %75 = vector.broadcast %cst_44 : f32 to vector<64x1xf32>
    %76 = arith.maximumf %74, %75 : vector<64x1xf32>
    %c0_45 = arith.constant 0 : index
    %c0_46 = arith.constant 0 : index
    %77 = vector.load %arg16[%c0_45, %c0_46] : memref<1x32xf32, #tpu.memory_space<vmem>>, vector<1x32xf32>
    %78 = vector.broadcast %77 : vector<1x32xf32> to vector<64x32xf32>
    %79 = arith.mulf %12, %78 : vector<64x32xf32>
    %cst_47 = arith.constant dense<0.000000e+00> : vector<64xf32>
    %80 = vector.multi_reduction <add>, %79, %cst_47 [1] : vector<64x32xf32> to vector<64xf32>
    %81 = vector.shape_cast %80 : vector<64xf32> to vector<64x1xf32>
    %82 = arith.addf %66, %81 : vector<64x1xf32>
    %83 = vector.broadcast %4 : f32 to vector<64x1xf32>
    %84 = arith.addf %82, %83 : vector<64x1xf32>
    %cst_48 = arith.constant 0.000000e+00 : f32
    %85 = vector.broadcast %cst_48 : f32 to vector<64x1xf32>
    %86 = arith.maximumf %84, %85 : vector<64x1xf32>
    %c0_49 = arith.constant 0 : index
    %c0_50 = arith.constant 0 : index
    %87 = vector.load %arg16[%c0_49, %c0_50] : memref<1x32xf32, #tpu.memory_space<vmem>>, vector<1x32xf32>
    %88 = vector.broadcast %87 : vector<1x32xf32> to vector<64x32xf32>
    %89 = arith.mulf %16, %88 : vector<64x32xf32>
    %cst_51 = arith.constant dense<0.000000e+00> : vector<64xf32>
    %90 = vector.multi_reduction <add>, %89, %cst_51 [1] : vector<64x32xf32> to vector<64xf32>
    %91 = vector.shape_cast %90 : vector<64xf32> to vector<64x1xf32>
    %92 = arith.addf %66, %91 : vector<64x1xf32>
    %93 = vector.broadcast %4 : f32 to vector<64x1xf32>
    %94 = arith.addf %92, %93 : vector<64x1xf32>
    %cst_52 = arith.constant 0.000000e+00 : f32
    %95 = vector.broadcast %cst_52 : f32 to vector<64x1xf32>
    %96 = arith.maximumf %94, %95 : vector<64x1xf32>
    %97 = arith.maximumf %76, %86 : vector<64x1xf32>
    %98 = arith.maximumf %97, %96 : vector<64x1xf32>
    %99 = arith.subf %76, %98 : vector<64x1xf32>
    %100 = math.exp %99 : vector<64x1xf32>
    %101 = arith.subf %86, %98 : vector<64x1xf32>
    %102 = math.exp %101 : vector<64x1xf32>
    %103 = arith.subf %96, %98 : vector<64x1xf32>
    %104 = math.exp %103 : vector<64x1xf32>
    %105 = arith.addf %100, %102 : vector<64x1xf32>
    %106 = arith.addf %105, %104 : vector<64x1xf32>
    %107 = tpu.reciprocal %106 : vector<64x1xf32> -> vector<64x1xf32>
    %108 = arith.mulf %100, %107 : vector<64x1xf32>
    %109 = vector.broadcast %108 : vector<64x1xf32> to vector<64x32xf32>
    %110 = arith.mulf %8, %109 : vector<64x32xf32>
    %111 = arith.mulf %102, %107 : vector<64x1xf32>
    %112 = vector.broadcast %111 : vector<64x1xf32> to vector<64x32xf32>
    %113 = arith.mulf %12, %112 : vector<64x32xf32>
    %114 = arith.addf %110, %113 : vector<64x32xf32>
    %115 = arith.mulf %104, %107 : vector<64x1xf32>
    %116 = vector.broadcast %115 : vector<64x1xf32> to vector<64x32xf32>
    %117 = arith.mulf %16, %116 : vector<64x32xf32>
    %118 = arith.addf %114, %117 : vector<64x32xf32>
    %119 = arith.truncf %118 : vector<64x32xf32> to vector<64x32xbf16>
    %c0_53 = arith.constant 0 : index
    %c0_54 = arith.constant 0 : index
    %120 = vector.load %arg17[%c0_53, %c0_54] : memref<32x32xbf16, #tpu.memory_space<vmem>>, vector<32x32xbf16>
    %cst_55 = arith.constant dense<0.000000e+00> : vector<64x32xf32>
    %121 = tpu.matmul %119, %120, %cst_55 {dimension_numbers = #tpu.dot_dimension_numbers<[1], [0], [0], [1], [0, 0, 1, 1], [], []>} : vector<64x32xbf16>, vector<32x32xbf16>, vector<64x32xf32> -> vector<64x32xf32>
    %c0_56 = arith.constant 0 : index
    %c0_57 = arith.constant 0 : index
    %122 = vector.load %arg18[%c0_56, %c0_57] : memref<1x32xf32, #tpu.memory_space<vmem>>, vector<1x32xf32>
    %123 = vector.broadcast %122 : vector<1x32xf32> to vector<64x32xf32>
    %124 = arith.addf %121, %123 : vector<64x32xf32>
    %125 = arith.addf %124, %118 : vector<64x32xf32>
    %cst_58 = arith.constant 0.000000e+00 : f32
    %126 = vector.broadcast %cst_58 : f32 to vector<64x32xf32>
    %127 = arith.cmpf oge, %125, %126 : vector<64x32xf32>
    %128 = vector.broadcast %2 : f32 to vector<64x32xf32>
    %129 = arith.mulf %125, %128 : vector<64x32xf32>
    %130 = arith.select %127, %125, %129 : vector<64x32xi1>, vector<64x32xf32>
    %cst_59 = arith.constant 5.000000e-01 : f32
    %131 = vector.broadcast %cst_59 : f32 to vector<64x32xf32>
    %132 = arith.mulf %131, %130 : vector<64x32xf32>
    %cst_60 = arith.constant 5.000000e-01 : f32
    %133 = vector.broadcast %cst_60 : f32 to vector<64x32xf32>
    %134 = arith.mulf %133, %125 : vector<64x32xf32>
    %135 = arith.addf %132, %134 : vector<64x32xf32>
    %136 = arith.truncf %135 : vector<64x32xf32> to vector<64x32xbf16>
    %c0_61 = arith.constant 0 : index
    %c0_62 = arith.constant 0 : index
    %137 = vector.load %arg19[%c0_61, %c0_62] : memref<32x32xbf16, #tpu.memory_space<vmem>>, vector<32x32xbf16>
    %cst_63 = arith.constant dense<0.000000e+00> : vector<64x32xf32>
    %138 = tpu.matmul %136, %137, %cst_63 {dimension_numbers = #tpu.dot_dimension_numbers<[1], [0], [0], [1], [0, 0, 1, 1], [], []>} : vector<64x32xbf16>, vector<32x32xbf16>, vector<64x32xf32> -> vector<64x32xf32>
    %139 = arith.addf %138, %130 : vector<64x32xf32>
    %cst_64 = arith.constant 0.000000e+00 : f32
    %140 = vector.broadcast %cst_64 : f32 to vector<64x32xf32>
    %141 = arith.cmpf oge, %139, %140 : vector<64x32xf32>
    %142 = vector.broadcast %2 : f32 to vector<64x32xf32>
    %143 = arith.mulf %139, %142 : vector<64x32xf32>
    %144 = arith.select %141, %139, %143 : vector<64x32xi1>, vector<64x32xf32>
    %145 = arith.truncf %144 : vector<64x32xf32> to vector<64x32xbf16>
    %c0_65 = arith.constant 0 : index
    %c0_66 = arith.constant 0 : index
    %146 = vector.load %arg20[%c0_65, %c0_66] : memref<32x8xbf16, #tpu.memory_space<vmem>>, vector<32x8xbf16>
    %cst_67 = arith.constant dense<0.000000e+00> : vector<64x8xf32>
    %147 = tpu.matmul %145, %146, %cst_67 {dimension_numbers = #tpu.dot_dimension_numbers<[1], [0], [0], [1], [0, 0, 1, 1], [], []>} : vector<64x32xbf16>, vector<32x8xbf16>, vector<64x8xf32> -> vector<64x8xf32>
    %c0_68 = arith.constant 0 : index
    %c0_69 = arith.constant 0 : index
    %148 = vector.load %arg21[%c0_68, %c0_69] : memref<1x8xf32, #tpu.memory_space<vmem>>, vector<1x8xf32>
    %149 = vector.broadcast %148 : vector<1x8xf32> to vector<64x8xf32>
    %150 = arith.addf %147, %149 : vector<64x8xf32>
    %c0_70 = arith.constant 0 : index
    %c0_71 = arith.constant 0 : index
    %151 = vector.load %arg4[%c0_70, %c0_71] : memref<64x8xf32, #tpu.memory_space<vmem>>, vector<64x8xf32>
    %152 = arith.truncf %151 : vector<64x8xf32> to vector<64x8xbf16>
    %c0_72 = arith.constant 0 : index
    %c0_73 = arith.constant 0 : index
    %153 = vector.load %arg22[%c0_72, %c0_73] : memref<8x32xbf16, #tpu.memory_space<vmem>>, vector<8x32xbf16>
    %cst_74 = arith.constant dense<0.000000e+00> : vector<64x32xf32>
    %154 = tpu.matmul %152, %153, %cst_74 {dimension_numbers = #tpu.dot_dimension_numbers<[1], [0], [0], [1], [0, 0, 1, 1], [], []>} : vector<64x8xbf16>, vector<8x32xbf16>, vector<64x32xf32> -> vector<64x32xf32>
    %c0_75 = arith.constant 0 : index
    %c0_76 = arith.constant 0 : index
    %155 = vector.load %arg23[%c0_75, %c0_76] : memref<1x32xf32, #tpu.memory_space<vmem>>, vector<1x32xf32>
    %156 = vector.broadcast %155 : vector<1x32xf32> to vector<64x32xf32>
    %157 = arith.addf %154, %156 : vector<64x32xf32>
    %cst_77 = arith.constant 0.000000e+00 : f32
    %158 = vector.broadcast %cst_77 : f32 to vector<64x32xf32>
    %159 = arith.cmpf oge, %157, %158 : vector<64x32xf32>
    %160 = vector.broadcast %3 : f32 to vector<64x32xf32>
    %161 = arith.mulf %157, %160 : vector<64x32xf32>
    %162 = arith.select %159, %157, %161 : vector<64x32xi1>, vector<64x32xf32>
    %163 = arith.truncf %162 : vector<64x32xf32> to vector<64x32xbf16>
    %c0_78 = arith.constant 0 : index
    %c0_79 = arith.constant 0 : index
    %164 = vector.load %arg24[%c0_78, %c0_79] : memref<32x32xbf16, #tpu.memory_space<vmem>>, vector<32x32xbf16>
    %cst_80 = arith.constant dense<0.000000e+00> : vector<64x32xf32>
    %165 = tpu.matmul %163, %164, %cst_80 {dimension_numbers = #tpu.dot_dimension_numbers<[1], [0], [0], [1], [0, 0, 1, 1], [], []>} : vector<64x32xbf16>, vector<32x32xbf16>, vector<64x32xf32> -> vector<64x32xf32>
    %c0_81 = arith.constant 0 : index
    %c0_82 = arith.constant 0 : index
    %166 = vector.load %arg25[%c0_81, %c0_82] : memref<1x32xf32, #tpu.memory_space<vmem>>, vector<1x32xf32>
    %167 = vector.broadcast %166 : vector<1x32xf32> to vector<64x32xf32>
    %168 = arith.addf %165, %167 : vector<64x32xf32>
    %cst_83 = arith.constant 0.000000e+00 : f32
    %169 = vector.broadcast %cst_83 : f32 to vector<64x32xf32>
    %170 = arith.cmpf oge, %168, %169 : vector<64x32xf32>
    %171 = vector.broadcast %3 : f32 to vector<64x32xf32>
    %172 = arith.mulf %168, %171 : vector<64x32xf32>
    %173 = arith.select %170, %168, %172 : vector<64x32xi1>, vector<64x32xf32>
    %174 = arith.truncf %173 : vector<64x32xf32> to vector<64x32xbf16>
    %c0_84 = arith.constant 0 : index
    %c0_85 = arith.constant 0 : index
    %175 = vector.load %arg26[%c0_84, %c0_85] : memref<32x8xbf16, #tpu.memory_space<vmem>>, vector<32x8xbf16>
    %cst_86 = arith.constant dense<0.000000e+00> : vector<64x8xf32>
    %176 = tpu.matmul %174, %175, %cst_86 {dimension_numbers = #tpu.dot_dimension_numbers<[1], [0], [0], [1], [0, 0, 1, 1], [], []>} : vector<64x32xbf16>, vector<32x8xbf16>, vector<64x8xf32> -> vector<64x8xf32>
    %c0_87 = arith.constant 0 : index
    %c0_88 = arith.constant 0 : index
    %177 = vector.load %arg27[%c0_87, %c0_88] : memref<1x8xf32, #tpu.memory_space<vmem>>, vector<1x8xf32>
    %178 = vector.broadcast %177 : vector<1x8xf32> to vector<64x8xf32>
    %179 = arith.addf %176, %178 : vector<64x8xf32>
    %180 = arith.addf %150, %179 : vector<64x8xf32>
    %c0_89 = arith.constant 0 : index
    %c0_90 = arith.constant 0 : index
    %181 = vector.load %arg29[%c0_89, %c0_90] : memref<64x8xf32, #tpu.memory_space<vmem>>, vector<64x8xf32>
    tpu.vector_store %arg29[%c0_89, %c0_90], %180 {strides = array<i32>} : memref<64x8xf32, #tpu.memory_space<vmem>>, vector<64x8xf32>,
    return
  }
  func.func @transform_0(%arg0: i32) -> (i32, i32) {
    %c0_i32 = arith.constant 0 : i32
    %c0_i32_0 = arith.constant 0 : i32
    return %arg0, %c0_i32 : i32, i32
  }
  func.func @transform_1(%arg0: i32) -> (i32, i32) {
    %c0_i32 = arith.constant 0 : i32
    %c0_i32_0 = arith.constant 0 : i32
    return %arg0, %c0_i32 : i32, i32
  }
  func.func @transform_2(%arg0: i32) -> (i32, i32) {
    %c0_i32 = arith.constant 0 : i32
    %c0_i32_0 = arith.constant 0 : i32
    return %arg0, %c0_i32 : i32, i32
  }
  func.func @transform_3(%arg0: i32) -> (i32, i32) {
    %c0_i32 = arith.constant 0 : i32
    %c0_i32_0 = arith.constant 0 : i32
    return %arg0, %c0_i32 : i32, i32
  }
  func.func @transform_4(%arg0: i32) -> (i32, i32) {
    %c0_i32 = arith.constant 0 : i32
    %c0_i32_0 = arith.constant 0 : i32
    %c0_i32_1 = arith.constant 0 : i32
    return %c0_i32, %c0_i32_0 : i32, i32
  }
  func.func @transform_5(%arg0: i32) -> (i32, i32) {
    %c0_i32 = arith.constant 0 : i32
    %c0_i32_0 = arith.constant 0 : i32
    %c0_i32_1 = arith.constant 0 : i32
    return %c0_i32, %c0_i32_0 : i32, i32
  }
  func.func @transform_6(%arg0: i32) -> (i32, i32) {
    %c0_i32 = arith.constant 0 : i32
    %c0_i32_0 = arith.constant 0 : i32
    %c0_i32_1 = arith.constant 0 : i32
    return %c0_i32, %c0_i32_0 : i32, i32
  }
  func.func @transform_7(%arg0: i32) -> (i32, i32) {
    %c0_i32 = arith.constant 0 : i32
    %c0_i32_0 = arith.constant 0 : i32
    %c0_i32_1 = arith.constant 0 : i32
    return %c0_i32, %c0_i32_0 : i32, i32
  }
  func.func @transform_8(%arg0: i32) -> (i32, i32) {
    %c0_i32 = arith.constant 0 : i32
    %c0_i32_0 = arith.constant 0 : i32
    %c0_i32_1 = arith.constant 0 : i32
    return %c0_i32, %c0_i32_0 : i32, i32
  }
  func.func @transform_9(%arg0: i32) -> (i32, i32) {
    %c0_i32 = arith.constant 0 : i32
    %c0_i32_0 = arith.constant 0 : i32
    %c0_i32_1 = arith.constant 0 : i32
    return %c0_i32, %c0_i32_0 : i32, i32
  }
  func.func @transform_10(%arg0: i32) -> (i32, i32) {
    %c0_i32 = arith.constant 0 : i32
    %c0_i32_0 = arith.constant 0 : i32
    %c0_i32_1 = arith.constant 0 : i32
    return %c0_i32, %c0_i32_0 : i32, i32
  }
  func.func @transform_11(%arg0: i32) -> (i32, i32) {
    %c0_i32 = arith.constant 0 : i32
    %c0_i32_0 = arith.constant 0 : i32
    %c0_i32_1 = arith.constant 0 : i32
    return %c0_i32, %c0_i32_0 : i32, i32
  }
  func.func @transform_12(%arg0: i32) -> (i32, i32) {
    %c0_i32 = arith.constant 0 : i32
    %c0_i32_0 = arith.constant 0 : i32
    %c0_i32_1 = arith.constant 0 : i32
    return %c0_i32, %c0_i32_0 : i32, i32
  }
  func.func @transform_13(%arg0: i32) -> (i32, i32) {
    %c0_i32 = arith.constant 0 : i32
    %c0_i32_0 = arith.constant 0 : i32
    %c0_i32_1 = arith.constant 0 : i32
    return %c0_i32, %c0_i32_0 : i32, i32
  }
  func.func @transform_14(%arg0: i32) -> (i32, i32) {
    %c0_i32 = arith.constant 0 : i32
    %c0_i32_0 = arith.constant 0 : i32
    %c0_i32_1 = arith.constant 0 : i32
    return %c0_i32, %c0_i32_0 : i32, i32
  }
  func.func @transform_15(%arg0: i32) -> (i32, i32) {
    %c0_i32 = arith.constant 0 : i32
    %c0_i32_0 = arith.constant 0 : i32
    %c0_i32_1 = arith.constant 0 : i32
    return %c0_i32, %c0_i32_0 : i32, i32
  }
  func.func @transform_16(%arg0: i32) -> (i32, i32) {
    %c0_i32 = arith.constant 0 : i32
    %c0_i32_0 = arith.constant 0 : i32
    %c0_i32_1 = arith.constant 0 : i32
    return %c0_i32, %c0_i32_0 : i32, i32
  }
  func.func @transform_17(%arg0: i32) -> (i32, i32) {
    %c0_i32 = arith.constant 0 : i32
    %c0_i32_0 = arith.constant 0 : i32
    %c0_i32_1 = arith.constant 0 : i32
    return %c0_i32, %c0_i32_0 : i32, i32
  }
  func.func @transform_18(%arg0: i32) -> (i32, i32) {
    %c0_i32 = arith.constant 0 : i32
    %c0_i32_0 = arith.constant 0 : i32
    %c0_i32_1 = arith.constant 0 : i32
    return %c0_i32, %c0_i32_0 : i32, i32
  }
  func.func @transform_19(%arg0: i32) -> (i32, i32) {
    %c0_i32 = arith.constant 0 : i32
    %c0_i32_0 = arith.constant 0 : i32
    %c0_i32_1 = arith.constant 0 : i32
    return %c0_i32, %c0_i32_0 : i32, i32
  }
  func.func @transform_20(%arg0: i32) -> (i32, i32) {
    %c0_i32 = arith.constant 0 : i32
    %c0_i32_0 = arith.constant 0 : i32
    %c0_i32_1 = arith.constant 0 : i32
    return %c0_i32, %c0_i32_0 : i32, i32
  }
  func.func @transform_21(%arg0: i32) -> (i32, i32) {
    %c0_i32 = arith.constant 0 : i32
    %c0_i32_0 = arith.constant 0 : i32
    %c0_i32_1 = arith.constant 0 : i32
    return %c0_i32, %c0_i32_0 : i32, i32
  }
  func.func @transform_22(%arg0: i32) -> (i32, i32) {
    %c0_i32 = arith.constant 0 : i32
    %c0_i32_0 = arith.constant 0 : i32
    %c0_i32_1 = arith.constant 0 : i32
    return %c0_i32, %c0_i32_0 : i32, i32
  }
  func.func @transform_23(%arg0: i32) -> (i32, i32) {
    %c0_i32 = arith.constant 0 : i32
    %c0_i32_0 = arith.constant 0 : i32
    %c0_i32_1 = arith.constant 0 : i32
    return %c0_i32, %c0_i32_0 : i32, i32
  }
  func.func @transform_24(%arg0: i32) -> (i32, i32) {
    %c0_i32 = arith.constant 0 : i32
    %c0_i32_0 = arith.constant 0 : i32
    %c0_i32_1 = arith.constant 0 : i32
    return %c0_i32, %c0_i32_0 : i32, i32
  }
  func.func @transform_25(%arg0: i32) -> (i32, i32) {
    %c0_i32 = arith.constant 0 : i32
    %c0_i32_0 = arith.constant 0 : i32
    %c0_i32_1 = arith.constant 0 : i32
    return %c0_i32, %c0_i32_0 : i32, i32
  }
  func.func @transform_26(%arg0: i32) -> (i32, i32) {
    %c0_i32 = arith.constant 0 : i32
    %c0_i32_0 = arith.constant 0 : i32
    %c0_i32_1 = arith.constant 0 : i32
    return %c0_i32, %c0_i32_0 : i32, i32
  }
  func.func @transform_27(%arg0: i32) -> i32 {
    %c0_i32 = arith.constant 0 : i32
    %c0_i32_0 = arith.constant 0 : i32
    return %c0_i32 : i32
  }
  func.func @transform_28(%arg0: i32) -> (i32, i32) {
    %c0_i32 = arith.constant 0 : i32
    %c0_i32_0 = arith.constant 0 : i32
    return %arg0, %c0_i32 : i32, i32
  }
}

module attributes {stable_mosaic.version = 11 : i64} {
  func.func @kernel(%arg0: i32, %arg1: memref<64x128xf32, #tpu.memory_space<vmem>>, %arg2: memref<64x128xf32, #tpu.memory_space<vmem>>, %arg3: memref<64x128xf32, #tpu.memory_space<vmem>>, %arg4: memref<64x8xf32, #tpu.memory_space<vmem>>, %arg5: memref<128x32xbf16, #tpu.memory_space<vmem>>, %arg6: memref<128x32xbf16, #tpu.memory_space<vmem>>, %arg7: memref<128x32xbf16, #tpu.memory_space<vmem>>, %arg8: memref<32x32xbf16, #tpu.memory_space<vmem>>, %arg9: memref<32x32xbf16, #tpu.memory_space<vmem>>, %arg10: memref<32x32xbf16, #tpu.memory_space<vmem>>, %arg11: memref<1x32xf32, #tpu.memory_space<vmem>>, %arg12: memref<32x32xbf16, #tpu.memory_space<vmem>>, %arg13: memref<32x32xbf16, #tpu.memory_space<vmem>>, %arg14: memref<1x32xf32, #tpu.memory_space<vmem>>, %arg15: memref<1x32xf32, #tpu.memory_space<vmem>>, %arg16: memref<1x32xf32, #tpu.memory_space<vmem>>, %arg17: memref<32x32xbf16, #tpu.memory_space<vmem>>, %arg18: memref<1x32xf32, #tpu.memory_space<vmem>>, %arg19: memref<32x32xbf16, #tpu.memory_space<vmem>>, %arg20: memref<32x8xbf16, #tpu.memory_space<vmem>>, %arg21: memref<1x8xf32, #tpu.memory_space<vmem>>, %arg22: memref<8x32xbf16, #tpu.memory_space<vmem>>, %arg23: memref<1x32xf32, #tpu.memory_space<vmem>>, %arg24: memref<32x32xbf16, #tpu.memory_space<vmem>>, %arg25: memref<1x32xf32, #tpu.memory_space<vmem>>, %arg26: memref<32x8xbf16, #tpu.memory_space<vmem>>, %arg27: memref<1x8xf32, #tpu.memory_space<vmem>>, %arg28: memref<5xf32, #tpu.memory_space<smem>>, %arg29: memref<64x8xf32, #tpu.memory_space<vmem>>) attributes {dimension_semantics = [#tpu.dimension_semantics<parallel>], iteration_bounds = array<i64: 2>, scalar_prefetch = 0 : i64, scratch_operands = 0 : i64, tpu.core_type = #tpu.core_type<tc>, window_params = [{transform_indices = @transform_0, window_bounds = array<i64: 64, 128>}, {transform_indices = @transform_1, window_bounds = array<i64: 64, 128>}, {transform_indices = @transform_2, window_bounds = array<i64: 64, 128>}, {transform_indices = @transform_3, window_bounds = array<i64: 64, 8>}, {pipeline_mode = #tpu.pipeline_mode<synchronous>, transform_indices = @transform_4, window_bounds = array<i64: 128, 32>}, {pipeline_mode = #tpu.pipeline_mode<synchronous>, transform_indices = @transform_5, window_bounds = array<i64: 128, 32>}, {pipeline_mode = #tpu.pipeline_mode<synchronous>, transform_indices = @transform_6, window_bounds = array<i64: 128, 32>}, {pipeline_mode = #tpu.pipeline_mode<synchronous>, transform_indices = @transform_7, window_bounds = array<i64: 32, 32>}, {pipeline_mode = #tpu.pipeline_mode<synchronous>, transform_indices = @transform_8, window_bounds = array<i64: 32, 32>}, {pipeline_mode = #tpu.pipeline_mode<synchronous>, transform_indices = @transform_9, window_bounds = array<i64: 32, 32>}, {pipeline_mode = #tpu.pipeline_mode<synchronous>, transform_indices = @transform_10, window_bounds = array<i64: 1, 32>}, {pipeline_mode = #tpu.pipeline_mode<synchronous>, transform_indices = @transform_11, window_bounds = array<i64: 32, 32>}, {pipeline_mode = #tpu.pipeline_mode<synchronous>, transform_indices = @transform_12, window_bounds = array<i64: 32, 32>}, {pipeline_mode = #tpu.pipeline_mode<synchronous>, transform_indices = @transform_13, window_bounds = array<i64: 1, 32>}, {pipeline_mode = #tpu.pipeline_mode<synchronous>, transform_indices = @transform_14, window_bounds = array<i64: 1, 32>}, {pipeline_mode = #tpu.pipeline_mode<synchronous>, transform_indices = @transform_15, window_bounds = array<i64: 1, 32>}, {pipeline_mode = #tpu.pipeline_mode<synchronous>, transform_indices = @transform_16, window_bounds = array<i64: 32, 32>}, {pipeline_mode = #tpu.pipeline_mode<synchronous>, transform_indices = @transform_17, window_bounds = array<i64: 1, 32>}, {pipeline_mode = #tpu.pipeline_mode<synchronous>, transform_indices = @transform_18, window_bounds = array<i64: 32, 32>}, {pipeline_mode = #tpu.pipeline_mode<synchronous>, transform_indices = @transform_19, window_bounds = array<i64: 32, 8>}, {pipeline_mode = #tpu.pipeline_mode<synchronous>, transform_indices = @transform_20, window_bounds = array<i64: 1, 8>}, {pipeline_mode = #tpu.pipeline_mode<synchronous>, transform_indices = @transform_21, window_bounds = array<i64: 8, 32>}, {pipeline_mode = #tpu.pipeline_mode<synchronous>, transform_indices = @transform_22, window_bounds = array<i64: 1, 32>}, {pipeline_mode = #tpu.pipeline_mode<synchronous>, transform_indices = @transform_23, window_bounds = array<i64: 32, 32>}, {pipeline_mode = #tpu.pipeline_mode<synchronous>, transform_indices = @transform_24, window_bounds = array<i64: 1, 32>}, {pipeline_mode = #tpu.pipeline_mode<synchronous>, transform_indices = @transform_25, window_bounds = array<i64: 32, 8>}, {pipeline_mode = #tpu.pipeline_mode<synchronous>, transform_indices = @transform_26, window_bounds = array<i64: 1, 8>}, {transform_indices = @transform_27, window_bounds = array<i64: 5>}, {transform_indices = @transform_28, window_bounds = array<i64: 64, 8>}]} {
    %c0 = arith.constant 0 : index
    %0 = memref.load %arg28[%c0] : memref<5xf32, #tpu.memory_space<smem>>
    %c1 = arith.constant 1 : index
    %1 = memref.load %arg28[%c1] : memref<5xf32, #tpu.memory_space<smem>>
    %c2 = arith.constant 2 : index
    %2 = memref.load %arg28[%c2] : memref<5xf32, #tpu.memory_space<smem>>
    %c3 = arith.constant 3 : index
    %3 = memref.load %arg28[%c3] : memref<5xf32, #tpu.memory_space<smem>>
    %c4 = arith.constant 4 : index
    %4 = memref.load %arg28[%c4] : memref<5xf32, #tpu.memory_space<smem>>
    %c0_0 = arith.constant 0 : index
    %c0_1 = arith.constant 0 : index
    %5 = vector.load %arg1[%c0_0, %c0_1] : memref<64x128xf32, #tpu.memory_space<vmem>>, vector<64x128xf32>
    %6 = arith.truncf %5 : vector<64x128xf32> to vector<64x128xbf16>
    %c0_2 = arith.constant 0 : index
    %c0_3 = arith.constant 0 : index
    %7 = vector.load %arg5[%c0_2, %c0_3] : memref<128x32xbf16, #tpu.memory_space<vmem>>, vector<128x32xbf16>
    %cst = arith.constant dense<0.000000e+00> : vector<64x32xf32>
    %8 = tpu.matmul %6, %7, %cst {dimension_numbers = #tpu.dot_dimension_numbers<[1], [0], [0], [1], [0, 0, 1, 1], [], []>} : vector<64x128xbf16>, vector<128x32xbf16>, vector<64x32xf32> -> vector<64x32xf32>
    %c0_4 = arith.constant 0 : index
    %c0_5 = arith.constant 0 : index
    %9 = vector.load %arg2[%c0_4, %c0_5] : memref<64x128xf32, #tpu.memory_space<vmem>>, vector<64x128xf32>
    %10 = arith.truncf %9 : vector<64x128xf32> to vector<64x128xbf16>
    %c0_6 = arith.constant 0 : index
    %c0_7 = arith.constant 0 : index
    %11 = vector.load %arg6[%c0_6, %c0_7] : memref<128x32xbf16, #tpu.memory_space<vmem>>, vector<128x32xbf16>
    %cst_8 = arith.constant dense<0.000000e+00> : vector<64x32xf32>
    %12 = tpu.matmul %10, %11, %cst_8 {dimension_numbers = #tpu.dot_dimension_numbers<[1], [0], [0], [1], [0, 0, 1, 1], [], []>} : vector<64x128xbf16>, vector<128x32xbf16>, vector<64x32xf32> -> vector<64x32xf32>
    %c0_9 = arith.constant 0 : index
    %c0_10 = arith.constant 0 : index
    %13 = vector.load %arg3[%c0_9, %c0_10] : memref<64x128xf32, #tpu.memory_space<vmem>>, vector<64x128xf32>
    %14 = arith.truncf %13 : vector<64x128xf32> to vector<64x128xbf16>
    %c0_11 = arith.constant 0 : index
    %c0_12 = arith.constant 0 : index
    %15 = vector.load %arg7[%c0_11, %c0_12] : memref<128x32xbf16, #tpu.memory_space<vmem>>, vector<128x32xbf16>
    %cst_13 = arith.constant dense<0.000000e+00> : vector<64x32xf32>
    %16 = tpu.matmul %14, %15, %cst_13 {dimension_numbers = #tpu.dot_dimension_numbers<[1], [0], [0], [1], [0, 0, 1, 1], [], []>} : vector<64x128xbf16>, vector<128x32xbf16>, vector<64x32xf32> -> vector<64x32xf32>
    %17 = arith.truncf %8 : vector<64x32xf32> to vector<64x32xbf16>
    %c0_14 = arith.constant 0 : index
    %c0_15 = arith.constant 0 : index
    %18 = vector.load %arg8[%c0_14, %c0_15] : memref<32x32xbf16, #tpu.memory_space<vmem>>, vector<32x32xbf16>
    %cst_16 = arith.constant dense<0.000000e+00> : vector<64x32xf32>
    %19 = tpu.matmul %17, %18, %cst_16 {dimension_numbers = #tpu.dot_dimension_numbers<[1], [0], [0], [1], [0, 0, 1, 1], [], []>} : vector<64x32xbf16>, vector<32x32xbf16>, vector<64x32xf32> -> vector<64x32xf32>
    %20 = arith.truncf %12 : vector<64x32xf32> to vector<64x32xbf16>
    %c0_17 = arith.constant 0 : index
    %c0_18 = arith.constant 0 : index
    %21 = vector.load %arg9[%c0_17, %c0_18] : memref<32x32xbf16, #tpu.memory_space<vmem>>, vector<32x32xbf16>
    %cst_19 = arith.constant dense<0.000000e+00> : vector<64x32xf32>
    %22 = tpu.matmul %20, %21, %cst_19 {dimension_numbers = #tpu.dot_dimension_numbers<[1], [0], [0], [1], [0, 0, 1, 1], [], []>} : vector<64x32xbf16>, vector<32x32xbf16>, vector<64x32xf32> -> vector<64x32xf32>
    %23 = arith.addf %19, %22 : vector<64x32xf32>
    %24 = arith.truncf %16 : vector<64x32xf32> to vector<64x32xbf16>
    %c0_20 = arith.constant 0 : index
    %c0_21 = arith.constant 0 : index
    %25 = vector.load %arg10[%c0_20, %c0_21] : memref<32x32xbf16, #tpu.memory_space<vmem>>, vector<32x32xbf16>
    %cst_22 = arith.constant dense<0.000000e+00> : vector<64x32xf32>
    %26 = tpu.matmul %24, %25, %cst_22 {dimension_numbers = #tpu.dot_dimension_numbers<[1], [0], [0], [1], [0, 0, 1, 1], [], []>} : vector<64x32xbf16>, vector<32x32xbf16>, vector<64x32xf32> -> vector<64x32xf32>
    %27 = arith.addf %23, %26 : vector<64x32xf32>
    %c0_23 = arith.constant 0 : index
    %c0_24 = arith.constant 0 : index
    %28 = vector.load %arg11[%c0_23, %c0_24] : memref<1x32xf32, #tpu.memory_space<vmem>>, vector<1x32xf32>
    %29 = vector.broadcast %28 : vector<1x32xf32> to vector<64x32xf32>
    %30 = arith.addf %27, %29 : vector<64x32xf32>
    %cst_25 = arith.constant 0.000000e+00 : f32
    %31 = vector.broadcast %cst_25 : f32 to vector<64x32xf32>
    %32 = arith.cmpf oge, %30, %31 : vector<64x32xf32>
    %33 = vector.broadcast %0 : f32 to vector<64x32xf32>
    %34 = arith.mulf %30, %33 : vector<64x32xf32>
    %35 = arith.select %32, %30, %34 : vector<64x32xi1>, vector<64x32xf32>
    %cst_26 = arith.constant 5.000000e-01 : f32
    %36 = vector.broadcast %cst_26 : f32 to vector<64x32xf32>
    %37 = arith.mulf %36, %35 : vector<64x32xf32>
    %cst_27 = arith.constant 5.000000e-01 : f32
    %38 = vector.broadcast %cst_27 : f32 to vector<64x32xf32>
    %39 = arith.mulf %38, %30 : vector<64x32xf32>
    %40 = arith.addf %37, %39 : vector<64x32xf32>
    %41 = arith.truncf %40 : vector<64x32xf32> to vector<64x32xbf16>
    %c0_28 = arith.constant 0 : index
    %c0_29 = arith.constant 0 : index
    %42 = vector.load %arg12[%c0_28, %c0_29] : memref<32x32xbf16, #tpu.memory_space<vmem>>, vector<32x32xbf16>
    %cst_30 = arith.constant dense<0.000000e+00> : vector<64x32xf32>
    %43 = tpu.matmul %41, %42, %cst_30 {dimension_numbers = #tpu.dot_dimension_numbers<[1], [0], [0], [1], [0, 0, 1, 1], [], []>} : vector<64x32xbf16>, vector<32x32xbf16>, vector<64x32xf32> -> vector<64x32xf32>
    %44 = arith.addf %43, %35 : vector<64x32xf32>
    %cst_31 = arith.constant 0.000000e+00 : f32
    %45 = vector.broadcast %cst_31 : f32 to vector<64x32xf32>
    %46 = arith.cmpf oge, %44, %45 : vector<64x32xf32>
    %47 = vector.broadcast %0 : f32 to vector<64x32xf32>
    %48 = arith.mulf %44, %47 : vector<64x32xf32>
    %49 = arith.select %46, %44, %48 : vector<64x32xi1>, vector<64x32xf32>
    %50 = arith.truncf %49 : vector<64x32xf32> to vector<64x32xbf16>
    %c0_32 = arith.constant 0 : index
    %c0_33 = arith.constant 0 : index
    %51 = vector.load %arg13[%c0_32, %c0_33] : memref<32x32xbf16, #tpu.memory_space<vmem>>, vector<32x32xbf16>
    %cst_34 = arith.constant dense<0.000000e+00> : vector<64x32xf32>
    %52 = tpu.matmul %50, %51, %cst_34 {dimension_numbers = #tpu.dot_dimension_numbers<[1], [0], [0], [1], [0, 0, 1, 1], [], []>} : vector<64x32xbf16>, vector<32x32xbf16>, vector<64x32xf32> -> vector<64x32xf32>
    %c0_35 = arith.constant 0 : index
    %c0_36 = arith.constant 0 : index
    %53 = vector.load %arg14[%c0_35, %c0_36] : memref<1x32xf32, #tpu.memory_space<vmem>>, vector<1x32xf32>
    %54 = vector.broadcast %53 : vector<1x32xf32> to vector<64x32xf32>
    %55 = arith.addf %52, %54 : vector<64x32xf32>
    %56 = arith.addf %55, %49 : vector<64x32xf32>
    %cst_37 = arith.constant 0.000000e+00 : f32
    %57 = vector.broadcast %cst_37 : f32 to vector<64x32xf32>
    %58 = arith.cmpf oge, %56, %57 : vector<64x32xf32>
    %59 = vector.broadcast %1 : f32 to vector<64x32xf32>
    %60 = arith.mulf %56, %59 : vector<64x32xf32>
    %61 = arith.select %58, %56, %60 : vector<64x32xi1>, vector<64x32xf32>
    %c0_38 = arith.constant 0 : index
    %c0_39 = arith.constant 0 : index
    %62 = vector.load %arg15[%c0_38, %c0_39] : memref<1x32xf32, #tpu.memory_space<vmem>>, vector<1x32xf32>
    %63 = vector.broadcast %62 : vector<1x32xf32> to vector<64x32xf32>
    %64 = arith.mulf %61, %63 : vector<64x32xf32>
    %cst_40 = arith.constant dense<0.000000e+00> : vector<64xf32>
    %65 = vector.multi_reduction <add>, %64, %cst_40 [1] : vector<64x32xf32> to vector<64xf32>
    %66 = vector.shape_cast %65 : vector<64xf32> to vector<64x1xf32>
    %c0_41 = arith.constant 0 : index
    %c0_42 = arith.constant 0 : index
    %67 = vector.load %arg16[%c0_41, %c0_42] : memref<1x32xf32, #tpu.memory_space<vmem>>, vector<1x32xf32>
    %68 = vector.broadcast %67 : vector<1x32xf32> to vector<64x32xf32>
    %69 = arith.mulf %8, %68 : vector<64x32xf32>
    %cst_43 = arith.constant dense<0.000000e+00> : vector<64xf32>
    %70 = vector.multi_reduction <add>, %69, %cst_43 [1] : vector<64x32xf32> to vector<64xf32>
    %71 = vector.shape_cast %70 : vector<64xf32> to vector<64x1xf32>
    %72 = arith.addf %66, %71 : vector<64x1xf32>
    %73 = vector.broadcast %4 : f32 to vector<64x1xf32>
    %74 = arith.addf %72, %73 : vector<64x1xf32>
    %cst_44 = arith.constant 0.000000e+00 : f32
    %75 = vector.broadcast %cst_44 : f32 to vector<64x1xf32>
    %76 = arith.maximumf %74, %75 : vector<64x1xf32>
    %c0_45 = arith.constant 0 : index
    %c0_46 = arith.constant 0 : index
    %77 = vector.load %arg16[%c0_45, %c0_46] : memref<1x32xf32, #tpu.memory_space<vmem>>, vector<1x32xf32>
    %78 = vector.broadcast %77 : vector<1x32xf32> to vector<64x32xf32>
    %79 = arith.mulf %12, %78 : vector<64x32xf32>
    %cst_47 = arith.constant dense<0.000000e+00> : vector<64xf32>
    %80 = vector.multi_reduction <add>, %79, %cst_47 [1] : vector<64x32xf32> to vector<64xf32>
    %81 = vector.shape_cast %80 : vector<64xf32> to vector<64x1xf32>
    %82 = arith.addf %66, %81 : vector<64x1xf32>
    %83 = vector.broadcast %4 : f32 to vector<64x1xf32>
    %84 = arith.addf %82, %83 : vector<64x1xf32>
    %cst_48 = arith.constant 0.000000e+00 : f32
    %85 = vector.broadcast %cst_48 : f32 to vector<64x1xf32>
    %86 = arith.maximumf %84, %85 : vector<64x1xf32>
    %c0_49 = arith.constant 0 : index
    %c0_50 = arith.constant 0 : index
    %87 = vector.load %arg16[%c0_49, %c0_50] : memref<1x32xf32, #tpu.memory_space<vmem>>, vector<1x32xf32>
    %88 = vector.broadcast %87 : vector<1x32xf32> to vector<64x32xf32>
    %89 = arith.mulf %16, %88 : vector<64x32xf32>
    %cst_51 = arith.constant dense<0.000000e+00> : vector<64xf32>
    %90 = vector.multi_reduction <add>, %89, %cst_51 [1] : vector<64x32xf32> to vector<64xf32>
    %91 = vector.shape_cast %90 : vector<64xf32> to vector<64x1xf32>
    %92 = arith.addf %66, %91 : vector<64x1xf32>
    %93 = vector.broadcast %4 : f32 to vector<64x1xf32>
    %94 = arith.addf %92, %93 : vector<64x1xf32>
    %cst_52 = arith.constant 0.000000e+00 : f32
    %95 = vector.broadcast %cst_52 : f32 to vector<64x1xf32>
    %96 = arith.maximumf %94, %95 : vector<64x1xf32>
    %97 = arith.maximumf %76, %86 : vector<64x1xf32>
    %98 = arith.maximumf %97, %96 : vector<64x1xf32>
    %99 = arith.subf %76, %98 : vector<64x1xf32>
    %100 = math.exp %99 : vector<64x1xf32>
    %101 = arith.subf %86, %98 : vector<64x1xf32>
    %102 = math.exp %101 : vector<64x1xf32>
    %103 = arith.subf %96, %98 : vector<64x1xf32>
    %104 = math.exp %103 : vector<64x1xf32>
    %105 = arith.addf %100, %102 : vector<64x1xf32>
    %106 = arith.addf %105, %104 : vector<64x1xf32>
    %107 = tpu.reciprocal %106 : vector<64x1xf32> -> vector<64x1xf32>
    %108 = arith.mulf %100, %107 : vector<64x1xf32>
    %109 = vector.broadcast %108 : vector<64x1xf32> to vector<64x32xf32>
    %110 = arith.mulf %8, %109 : vector<64x32xf32>
    %111 = arith.mulf %102, %107 : vector<64x1xf32>
    %112 = vector.broadcast %111 : vector<64x1xf32> to vector<64x32xf32>
    %113 = arith.mulf %12, %112 : vector<64x32xf32>
    %114 = arith.addf %110, %113 : vector<64x32xf32>
    %115 = arith.mulf %104, %107 : vector<64x1xf32>
    %116 = vector.broadcast %115 : vector<64x1xf32> to vector<64x32xf32>
    %117 = arith.mulf %16, %116 : vector<64x32xf32>
    %118 = arith.addf %114, %117 : vector<64x32xf32>
    %119 = arith.truncf %118 : vector<64x32xf32> to vector<64x32xbf16>
    %c0_53 = arith.constant 0 : index
    %c0_54 = arith.constant 0 : index
    %120 = vector.load %arg17[%c0_53, %c0_54] : memref<32x32xbf16, #tpu.memory_space<vmem>>, vector<32x32xbf16>
    %cst_55 = arith.constant dense<0.000000e+00> : vector<64x32xf32>
    %121 = tpu.matmul %119, %120, %cst_55 {dimension_numbers = #tpu.dot_dimension_numbers<[1], [0], [0], [1], [0, 0, 1, 1], [], []>} : vector<64x32xbf16>, vector<32x32xbf16>, vector<64x32xf32> -> vector<64x32xf32>
    %c0_56 = arith.constant 0 : index
    %c0_57 = arith.constant 0 : index
    %122 = vector.load %arg18[%c0_56, %c0_57] : memref<1x32xf32, #tpu.memory_space<vmem>>, vector<1x32xf32>
    %123 = vector.broadcast %122 : vector<1x32xf32> to vector<64x32xf32>
    %124 = arith.addf %121, %123 : vector<64x32xf32>
    %125 = arith.addf %124, %118 : vector<64x32xf32>
    %cst_58 = arith.constant 0.000000e+00 : f32
    %126 = vector.broadcast %cst_58 : f32 to vector<64x32xf32>
    %127 = arith.cmpf oge, %125, %126 : vector<64x32xf32>
    %128 = vector.broadcast %2 : f32 to vector<64x32xf32>
    %129 = arith.mulf %125, %128 : vector<64x32xf32>
    %130 = arith.select %127, %125, %129 : vector<64x32xi1>, vector<64x32xf32>
    %cst_59 = arith.constant 5.000000e-01 : f32
    %131 = vector.broadcast %cst_59 : f32 to vector<64x32xf32>
    %132 = arith.mulf %131, %130 : vector<64x32xf32>
    %cst_60 = arith.constant 5.000000e-01 : f32
    %133 = vector.broadcast %cst_60 : f32 to vector<64x32xf32>
    %134 = arith.mulf %133, %125 : vector<64x32xf32>
    %135 = arith.addf %132, %134 : vector<64x32xf32>
    %136 = arith.truncf %135 : vector<64x32xf32> to vector<64x32xbf16>
    %c0_61 = arith.constant 0 : index
    %c0_62 = arith.constant 0 : index
    %137 = vector.load %arg19[%c0_61, %c0_62] : memref<32x32xbf16, #tpu.memory_space<vmem>>, vector<32x32xbf16>
    %cst_63 = arith.constant dense<0.000000e+00> : vector<64x32xf32>
    %138 = tpu.matmul %136, %137, %cst_63 {dimension_numbers = #tpu.dot_dimension_numbers<[1], [0], [0], [1], [0, 0, 1, 1], [], []>} : vector<64x32xbf16>, vector<32x32xbf16>, vector<64x32xf32> -> vector<64x32xf32>
    %139 = arith.addf %138, %130 : vector<64x32xf32>
    %cst_64 = arith.constant 0.000000e+00 : f32
    %140 = vector.broadcast %cst_64 : f32 to vector<64x32xf32>
    %141 = arith.cmpf oge, %139, %140 : vector<64x32xf32>
    %142 = vector.broadcast %2 : f32 to vector<64x32xf32>
    %143 = arith.mulf %139, %142 : vector<64x32xf32>
    %144 = arith.select %141, %139, %143 : vector<64x32xi1>, vector<64x32xf32>
    %145 = arith.truncf %144 : vector<64x32xf32> to vector<64x32xbf16>
    %c0_65 = arith.constant 0 : index
    %c0_66 = arith.constant 0 : index
    %146 = vector.load %arg20[%c0_65, %c0_66] : memref<32x8xbf16, #tpu.memory_space<vmem>>, vector<32x8xbf16>
    %cst_67 = arith.constant dense<0.000000e+00> : vector<64x8xf32>
    %147 = tpu.matmul %145, %146, %cst_67 {dimension_numbers = #tpu.dot_dimension_numbers<[1], [0], [0], [1], [0, 0, 1, 1], [], []>} : vector<64x32xbf16>, vector<32x8xbf16>, vector<64x8xf32> -> vector<64x8xf32>
    %c0_68 = arith.constant 0 : index
    %c0_69 = arith.constant 0 : index
    %148 = vector.load %arg21[%c0_68, %c0_69] : memref<1x8xf32, #tpu.memory_space<vmem>>, vector<1x8xf32>
    %149 = vector.broadcast %148 : vector<1x8xf32> to vector<64x8xf32>
    %150 = arith.addf %147, %149 : vector<64x8xf32>
    %c0_70 = arith.constant 0 : index
    %c0_71 = arith.constant 0 : index
    %151 = vector.load %arg4[%c0_70, %c0_71] : memref<64x8xf32, #tpu.memory_space<vmem>>, vector<64x8xf32>
    %152 = arith.truncf %151 : vector<64x8xf32> to vector<64x8xbf16>
    %c0_72 = arith.constant 0 : index
    %c0_73 = arith.constant 0 : index
    %153 = vector.load %arg22[%c0_72, %c0_73] : memref<8x32xbf16, #tpu.memory_space<vmem>>, vector<8x32xbf16>
    %cst_74 = arith.constant dense<0.000000e+00> : vector<64x32xf32>
    %154 = tpu.matmul %152, %153, %cst_74 {dimension_numbers = #tpu.dot_dimension_numbers<[1], [0], [0], [1], [0, 0, 1, 1], [], []>} : vector<64x8xbf16>, vector<8x32xbf16>, vector<64x32xf32> -> vector<64x32xf32>
    %c0_75 = arith.constant 0 : index
    %c0_76 = arith.constant 0 : index
    %155 = vector.load %arg23[%c0_75, %c0_76] : memref<1x32xf32, #tpu.memory_space<vmem>>, vector<1x32xf32>
    %156 = vector.broadcast %155 : vector<1x32xf32> to vector<64x32xf32>
    %157 = arith.addf %154, %156 : vector<64x32xf32>
    %cst_77 = arith.constant 0.000000e+00 : f32
    %158 = vector.broadcast %cst_77 : f32 to vector<64x32xf32>
    %159 = arith.cmpf oge, %157, %158 : vector<64x32xf32>
    %160 = vector.broadcast %3 : f32 to vector<64x32xf32>
    %161 = arith.mulf %157, %160 : vector<64x32xf32>
    %162 = arith.select %159, %157, %161 : vector<64x32xi1>, vector<64x32xf32>
    %163 = arith.truncf %162 : vector<64x32xf32> to vector<64x32xbf16>
    %c0_78 = arith.constant 0 : index
    %c0_79 = arith.constant 0 : index
    %164 = vector.load %arg24[%c0_78, %c0_79] : memref<32x32xbf16, #tpu.memory_space<vmem>>, vector<32x32xbf16>
    %cst_80 = arith.constant dense<0.000000e+00> : vector<64x32xf32>
    %165 = tpu.matmul %163, %164, %cst_80 {dimension_numbers = #tpu.dot_dimension_numbers<[1], [0], [0], [1], [0, 0, 1, 1], [], []>} : vector<64x32xbf16>, vector<32x32xbf16>, vector<64x32xf32> -> vector<64x32xf32>
    %c0_81 = arith.constant 0 : index
    %c0_82 = arith.constant 0 : index
    %166 = vector.load %arg25[%c0_81, %c0_82] : memref<1x32xf32, #tpu.memory_space<vmem>>, vector<1x32xf32>
    %167 = vector.broadcast %166 : vector<1x32xf32> to vector<64x32xf32>
    %168 = arith.addf %165, %167 : vector<64x32xf32>
    %cst_83 = arith.constant 0.000000e+00 : f32
    %169 = vector.broadcast %cst_83 : f32 to vector<64x32xf32>
    %170 = arith.cmpf oge, %168, %169 : vector<64x32xf32>
    %171 = vector.broadcast %3 : f32 to vector<64x32xf32>
    %172 = arith.mulf %168, %171 : vector<64x32xf32>
    %173 = arith.select %170, %168, %172 : vector<64x32xi1>, vector<64x32xf32>
    %174 = arith.truncf %173 : vector<64x32xf32> to vector<64x32xbf16>
    %c0_84 = arith.constant 0 : index
    %c0_85 = arith.constant 0 : index
    %175 = vector.load %arg26[%c0_84, %c0_85] : memref<32x8xbf16, #tpu.memory_space<vmem>>, vector<32x8xbf16>
    %cst_86 = arith.constant dense<0.000000e+00> : vector<64x8xf32>
    %176 = tpu.matmul %174, %175, %cst_86 {dimension_numbers = #tpu.dot_dimension_numbers<[1], [0], [0], [1], [0, 0, 1, 1], [], []>} : vector<64x32xbf16>, vector<32x8xbf16>, vector<64x8xf32> -> vector<64x8xf32>
    %c0_87 = arith.constant 0 : index
    %c0_88 = arith.constant 0 : index
    %177 = vector.load %arg27[%c0_87, %c0_88] : memref<1x8xf32, #tpu.memory_space<vmem>>, vector<1x8xf32>
    %178 = vector.broadcast %177 : vector<1x8xf32> to vector<64x8xf32>
    %179 = arith.addf %176, %178 : vector<64x8xf32>
    %180 = arith.addf %150, %179 : vector<64x8xf32>
    %c0_89 = arith.constant 0 : index
    %c0_90 = arith.constant 0 : index
    %181 = vector.load %arg29[%c0_89, %c0_90] : memref<64x8xf32, #tpu.memory_space<vmem>>, vector<64x8xf32>
    tpu.vector_store %arg29[%c0_89, %c0_90], %180 {strides = array<i32>} : memref<64x8xf32, #tpu.memory_space<vmem>>, vector<64x8xf32>,
    return
  }
  func.func @transform_0(%arg0: i32) -> (i32, i32) {
    %c0_i32 = arith.constant 0 : i32
    %c0_i32_0 = arith.constant 0 : i32
    return %arg0, %c0_i32 : i32, i32
  }
  func.func @transform_1(%arg0: i32) -> (i32, i32) {
    %c0_i32 = arith.constant 0 : i32
    %c0_i32_0 = arith.constant 0 : i32
    return %arg0, %c0_i32 : i32, i32
  }
  func.func @transform_2(%arg0: i32) -> (i32, i32) {
    %c0_i32 = arith.constant 0 : i32
    %c0_i32_0 = arith.constant 0 : i32
    return %arg0, %c0_i32 : i32, i32
  }
  func.func @transform_3(%arg0: i32) -> (i32, i32) {
    %c0_i32 = arith.constant 0 : i32
    %c0_i32_0 = arith.constant 0 : i32
    return %arg0, %c0_i32 : i32, i32
  }
  func.func @transform_4(%arg0: i32) -> (i32, i32) {
    %c0_i32 = arith.constant 0 : i32
    %c0_i32_0 = arith.constant 0 : i32
    %c0_i32_1 = arith.constant 0 : i32
    return %c0_i32, %c0_i32_0 : i32, i32
  }
  func.func @transform_5(%arg0: i32) -> (i32, i32) {
    %c0_i32 = arith.constant 0 : i32
    %c0_i32_0 = arith.constant 0 : i32
    %c0_i32_1 = arith.constant 0 : i32
    return %c0_i32, %c0_i32_0 : i32, i32
  }
  func.func @transform_6(%arg0: i32) -> (i32, i32) {
    %c0_i32 = arith.constant 0 : i32
    %c0_i32_0 = arith.constant 0 : i32
    %c0_i32_1 = arith.constant 0 : i32
    return %c0_i32, %c0_i32_0 : i32, i32
  }
  func.func @transform_7(%arg0: i32) -> (i32, i32) {
    %c0_i32 = arith.constant 0 : i32
    %c0_i32_0 = arith.constant 0 : i32
    %c0_i32_1 = arith.constant 0 : i32
    return %c0_i32, %c0_i32_0 : i32, i32
  }
  func.func @transform_8(%arg0: i32) -> (i32, i32) {
    %c0_i32 = arith.constant 0 : i32
    %c0_i32_0 = arith.constant 0 : i32
    %c0_i32_1 = arith.constant 0 : i32
    return %c0_i32, %c0_i32_0 : i32, i32
  }
  func.func @transform_9(%arg0: i32) -> (i32, i32) {
    %c0_i32 = arith.constant 0 : i32
    %c0_i32_0 = arith.constant 0 : i32
    %c0_i32_1 = arith.constant 0 : i32
    return %c0_i32, %c0_i32_0 : i32, i32
  }
  func.func @transform_10(%arg0: i32) -> (i32, i32) {
    %c0_i32 = arith.constant 0 : i32
    %c0_i32_0 = arith.constant 0 : i32
    %c0_i32_1 = arith.constant 0 : i32
    return %c0_i32, %c0_i32_0 : i32, i32
  }
  func.func @transform_11(%arg0: i32) -> (i32, i32) {
    %c0_i32 = arith.constant 0 : i32
    %c0_i32_0 = arith.constant 0 : i32
    %c0_i32_1 = arith.constant 0 : i32
    return %c0_i32, %c0_i32_0 : i32, i32
  }
  func.func @transform_12(%arg0: i32) -> (i32, i32) {
    %c0_i32 = arith.constant 0 : i32
    %c0_i32_0 = arith.constant 0 : i32
    %c0_i32_1 = arith.constant 0 : i32
    return %c0_i32, %c0_i32_0 : i32, i32
  }
  func.func @transform_13(%arg0: i32) -> (i32, i32) {
    %c0_i32 = arith.constant 0 : i32
    %c0_i32_0 = arith.constant 0 : i32
    %c0_i32_1 = arith.constant 0 : i32
    return %c0_i32, %c0_i32_0 : i32, i32
  }
  func.func @transform_14(%arg0: i32) -> (i32, i32) {
    %c0_i32 = arith.constant 0 : i32
    %c0_i32_0 = arith.constant 0 : i32
    %c0_i32_1 = arith.constant 0 : i32
    return %c0_i32, %c0_i32_0 : i32, i32
  }
  func.func @transform_15(%arg0: i32) -> (i32, i32) {
    %c0_i32 = arith.constant 0 : i32
    %c0_i32_0 = arith.constant 0 : i32
    %c0_i32_1 = arith.constant 0 : i32
    return %c0_i32, %c0_i32_0 : i32, i32
  }
  func.func @transform_16(%arg0: i32) -> (i32, i32) {
    %c0_i32 = arith.constant 0 : i32
    %c0_i32_0 = arith.constant 0 : i32
    %c0_i32_1 = arith.constant 0 : i32
    return %c0_i32, %c0_i32_0 : i32, i32
  }
  func.func @transform_17(%arg0: i32) -> (i32, i32) {
    %c0_i32 = arith.constant 0 : i32
    %c0_i32_0 = arith.constant 0 : i32
    %c0_i32_1 = arith.constant 0 : i32
    return %c0_i32, %c0_i32_0 : i32, i32
  }
  func.func @transform_18(%arg0: i32) -> (i32, i32) {
    %c0_i32 = arith.constant 0 : i32
    %c0_i32_0 = arith.constant 0 : i32
    %c0_i32_1 = arith.constant 0 : i32
    return %c0_i32, %c0_i32_0 : i32, i32
  }
  func.func @transform_19(%arg0: i32) -> (i32, i32) {
    %c0_i32 = arith.constant 0 : i32
    %c0_i32_0 = arith.constant 0 : i32
    %c0_i32_1 = arith.constant 0 : i32
    return %c0_i32, %c0_i32_0 : i32, i32
  }
  func.func @transform_20(%arg0: i32) -> (i32, i32) {
    %c0_i32 = arith.constant 0 : i32
    %c0_i32_0 = arith.constant 0 : i32
    %c0_i32_1 = arith.constant 0 : i32
    return %c0_i32, %c0_i32_0 : i32, i32
  }
  func.func @transform_21(%arg0: i32) -> (i32, i32) {
    %c0_i32 = arith.constant 0 : i32
    %c0_i32_0 = arith.constant 0 : i32
    %c0_i32_1 = arith.constant 0 : i32
    return %c0_i32, %c0_i32_0 : i32, i32
  }
  func.func @transform_22(%arg0: i32) -> (i32, i32) {
    %c0_i32 = arith.constant 0 : i32
    %c0_i32_0 = arith.constant 0 : i32
    %c0_i32_1 = arith.constant 0 : i32
    return %c0_i32, %c0_i32_0 : i32, i32
  }
  func.func @transform_23(%arg0: i32) -> (i32, i32) {
    %c0_i32 = arith.constant 0 : i32
    %c0_i32_0 = arith.constant 0 : i32
    %c0_i32_1 = arith.constant 0 : i32
    return %c0_i32, %c0_i32_0 : i32, i32
  }
  func.func @transform_24(%arg0: i32) -> (i32, i32) {
    %c0_i32 = arith.constant 0 : i32
    %c0_i32_0 = arith.constant 0 : i32
    %c0_i32_1 = arith.constant 0 : i32
    return %c0_i32, %c0_i32_0 : i32, i32
  }
  func.func @transform_25(%arg0: i32) -> (i32, i32) {
    %c0_i32 = arith.constant 0 : i32
    %c0_i32_0 = arith.constant 0 : i32
    %c0_i32_1 = arith.constant 0 : i32
    return %c0_i32, %c0_i32_0 : i32, i32
  }
  func.func @transform_26(%arg0: i32) -> (i32, i32) {
    %c0_i32 = arith.constant 0 : i32
    %c0_i32_0 = arith.constant 0 : i32
    %c0_i32_1 = arith.constant 0 : i32
    return %c0_i32, %c0_i32_0 : i32, i32
  }
  func.func @transform_27(%arg0: i32) -> i32 {
    %c0_i32 = arith.constant 0 : i32
    %c0_i32_0 = arith.constant 0 : i32
    return %c0_i32 : i32
  }
  func.func @transform_28(%arg0: i32) -> (i32, i32) {
    %c0_i32 = arith.constant 0 : i32
    %c0_i32_0 = arith.constant 0 : i32
    return %arg0, %c0_i32 : i32, i32
  }
}

</mosaic_0001>

<bundles_post_ra>
// kernel: nars_jk_gamlp_forward.1
= control target key start
LH: loop header
LB: loop body
LE: loop exit
PB: predicated region body
PF: predicated region fallthrough
CT: control target
= control target key end

     0   :  { %s4284_s0 = inlined_call_operand.vmem [shape: f32[128,128], index: 0, kind: input, shape index: {}]   ;;  %s4285_s1 = inlined_call_operand.vmem [shape: f32[128,128], index: 1, kind: input, shape index: {}]   ;;  %s4286_s2 = inlined_call_operand.vmem [shape: f32[128,128], index: 2, kind: input, shape index: {}]   ;;  %s4287_s3 = inlined_call_operand.vmem [shape: f32[128,8], index: 3, kind: input, shape index: {}]   ;;  %s4288_s4 = inlined_call_operand.vmem [shape: bf16[128,32], index: 4, kind: input, shape index: {}]   ;;  %s4289_s5 = inlined_call_operand.vmem [shape: bf16[128,32], index: 5, kind: input, shape index: {}]   ;;  %s4290_s6 = inlined_call_operand.vmem [shape: bf16[128,32], index: 6, kind: input, shape index: {}]   ;;  %s4291_s7 = inlined_call_operand.vmem [shape: bf16[32,32], index: 7, kind: input, shape index: {}]   ;;  %s4292_s8 = inlined_call_operand.vmem [shape: bf16[32,32], index: 8, kind: input, shape index: {}]   ;;  %s4293_s9 = inlined_call_operand.vmem [shape: bf16[32,32], index: 9, kind: input, shape index: {}]   ;;  %s4294_s10 = inlined_call_operand.vmem [shape: f32[1,32], index: 10, kind: input, shape index: {}]   ;;  %s4295_s11 = inlined_call_operand.vmem [shape: bf16[32,32], index: 11, kind: input, shape index: {}]   ;;  %s4296_s12 = inlined_call_operand.vmem [shape: bf16[32,32], index: 12, kind: input, shape index: {}]   ;;  %s4297_s13 = inlined_call_operand.vmem [shape: f32[1,32], index: 13, kind: input, shape index: {}]   ;;  %s4298_s14 = inlined_call_operand.vmem [shape: f32[1,32], index: 14, kind: input, shape index: {}]   ;;  %s4299_s15 = inlined_call_operand.vmem [shape: f32[1,32], index: 15, kind: input, shape index: {}]   ;;  %s4300_s16 = inlined_call_operand.vmem [shape: bf16[32,32], index: 16, kind: input, shape index: {}]   ;;  %s4301_s17 = inlined_call_operand.vmem [shape: f32[1,32], index: 17, kind: input, shape index: {}]   ;;  %s4302_s18 = inlined_call_operand.vmem [shape: bf16[32,32], index: 18, kind: input, shape index: {}]   ;;  %s4303_s19 = inlined_call_operand.vmem [shape: bf16[32,8], index: 19, kind: input, shape index: {}]   ;;  %s4304_s20 = inlined_call_operand.vmem [shape: f32[1,8], index: 20, kind: input, shape index: {}]   ;;  %s4305_s21 = inlined_call_operand.vmem [shape: bf16[8,32], index: 21, kind: input, shape index: {}]   ;;  %s4306_s22 = inlined_call_operand.vmem [shape: f32[1,32], index: 22, kind: input, shape index: {}]   ;;  %s4307_s23 = inlined_call_operand.vmem [shape: bf16[32,32], index: 23, kind: input, shape index: {}]   ;;  %s4308_s24 = inlined_call_operand.vmem [shape: f32[1,32], index: 24, kind: input, shape index: {}]   ;;  %s4309_s25 = inlined_call_operand.vmem [shape: bf16[32,8], index: 25, kind: input, shape index: {}]   ;;  %s4310_s26 = inlined_call_operand.vmem [shape: f32[1,8], index: 26, kind: input, shape index: {}]   ;;  %s4311_s27 = inlined_call_operand.vmem [shape: f32[5], index: 27, kind: input, shape index: {}]   ;;  %s4312_s28 = inlined_call_operand.vmem [shape: f32[128,8], index: 28, kind: output, shape index: {}]  }
   0x1   :  { %4322 = sst [smem:[#allocation5_spill]] %s4284_s0 }
   0x2   :  { %4323 = sst [smem:[#allocation6_spill]] %s4285_s1 }
   0x3   :  { %4324 = sst [smem:[#allocation7_spill]] %s4286_s2 }
   0x4   :  { %4325 = sst [smem:[#allocation8_spill]] %s4287_s3 }
   0x5   :  { %4326 = sst [smem:[#allocation9_spill]] %s4288_s4 }
   0x6   :  { %4327 = sst [smem:[#allocation10_spill]] %s4289_s5 }
   0x7   :  { %4328 = sst [smem:[#allocation11_spill]] %s4290_s6 }
   0x8   :  { %4329 = sst [smem:[#allocation12_spill]] %s4291_s7 }
   0x9   :  { %4330 = sst [smem:[#allocation13_spill]] %s4292_s8 }
   0xa   :  { %4331 = sst [smem:[#allocation14_spill]] %s4293_s9 }
   0xb   :  { %4332 = sst [smem:[#allocation15_spill]] %s4294_s10 }
   0xc   :  { %4333 = sst [smem:[#allocation16_spill]] %s4295_s11 }
   0xd   :  { %4334 = sst [smem:[#allocation17_spill]] %s4296_s12 }
   0xe   :  { %4335 = sst [smem:[#allocation18_spill]] %s4311_s27 }
   0xf   :  { %33 = vsyncpa [#allocation3], 0  ;;  %s3369_s8 = smov 0  }
  0x10 LB: > { %s2809_s5 = sadd.s32 4294967295, %s3221_s8   ;;  %p2811_p0 = scmp.ge.s32.totalorder %s3221_s8, 1  ;;  %s3221_s8 = sphi %s3369_s8, %s39_s8  }
  0x11   : > { %p678_p1 = scmp.lt.s32.totalorder %s3221_s8, 3  ;;  %s4336_s27 = sld [smem:[#allocation18_spill]] }
  0x12   : > { %p3112_p3 = scmp.eq.s32.totalorder %s2809_s5, 0  ;;  %s3223_s6 = smov [#allocation2]  }
  0x13   : > { %p679_p2 = pnand %p2811_p0, %p678_p1 }
  0x15   : > { %p3108_p4 = pneg %p679_p2  ;;  %808 = sbr.rel (%p679_p2) target bundleno = 1404 (0x57c), region = 132 }
  0x17   : > { %s759_s3 = sshll.u32 %s4336_s27, 4  ;;  %p3109_p5 = pnand %p3112_p3, %p3108_p4  ;;  %s760_s3 = int_to_ptr.vmem [resolvable:$true] %s759_s3 }
  0x19   : > { %3111 = dma.vmem_to_smem (!%p3109_p5), %s760_s3, 16, %s3223_s6, [#allocation3]  }
  0x1a   : > { %3216 = dma.done.wait (%p3112_p3), [#allocation3], 16  }
  0x1b   : > { %3218 = vsyncadd (%p3112_p3), [#allocation3], 4294967280 }
  0x1c   : > { %815 = sfence }
  0x1d   : > { %s4337_s11 = sld [smem:[#allocation9_spill]]  ;;  %s2816_s2 = sshll.u32 %s2809_s5, 3  ;;  %v3491_v61 = vld [vmem:[%s4299_s15] ss:$0 sm:$0xff]  ;;  %vm1278_vm0 = vcmask 261120  }
  0x1e   : > { %s4338_s7 = sld [smem:[#allocation11_spill]]  ;;  %p900_p6 = scmp.lt.s32.totalorder %s2816_s2, 15 }
  0x1f   : > { %s4339_s5 = sld [smem:[#allocation5_spill]] }
  0x20   : > { %s4357_s2 = smov (!%p900_p6, %s2816_s2), 15  ;;  %s4340_s0 = sld [smem:[#allocation7_spill]] }
  0x21   : > { %s3416_s29 = sshll.u32 %s4357_s2, 3  ;;  %s4342_s9 = sld [smem:[#allocation6_spill]] }
  0x22   : > { %s930_s10 = sld [smem:[#allocation2]] }
  0x23   : > { %v3059_v0 = vld [vmem:[%s4337_s11 + $0x38] sm:$0xff]  ;;  %v3058_v2 = vld [vmem:[%s4337_s11 + $0x30] sm:$0xff]  ;;  %v3057_v4 = vld [vmem:[%s4337_s11 + $0x28] sm:$0xff]  ;;  %s4347_s1 = sld [smem:[#allocation15_spill]] }
  0x24   : > { %v3075_v1 = vld [vmem:[%s4338_s7 + $0x38] sm:$0xff]  ;;  %3096 = vmatpush.bf16.msra.mxu1 %v3059_v0  ;;  %v3074_v3 = vld [vmem:[%s4338_s7 + $0x30] sm:$0xff]  ;;  %1011 = vmatpush.bf16.msra.mxu0 %v3059_v0  ;;  %v3073_v5 = vld [vmem:[%s4338_s7 + $0x28] sm:$0xff]  ;;  %s4348_s2 = sld [smem:[#allocation17_spill]] }
  0x25   : > { %1221 = vmatpush.bf16.msra.mxu2 %v3075_v1  ;;  %v3056_v6 = vld [vmem:[%s4337_s11 + $0x20] sm:$0xff]  ;;  %v3055_v8 = vld [vmem:[%s4337_s11 + $0x18] sm:$0xff]  ;;  %v3054_v10 = vld [vmem:[%s4337_s11 + $0x10] sm:$0xff]  ;;  %s3428_s6 = scalar_lea.vmem %s4339_s5, %s3416_s29  ;;  %s4341_s5 = sld [smem:[#allocation10_spill]] }
  0x26   : > { %v3072_v7 = vld [vmem:[%s4338_s7 + $0x20] sm:$0xff]  ;;  %v3071_v9 = vld [vmem:[%s4338_s7 + $0x18] sm:$0xff]  ;;  %v3070_v11 = vld [vmem:[%s4338_s7 + $0x10] sm:$0xff]  ;;  %s3434_s27 = scalar_lea.vmem %s4340_s0, %s3416_s29  ;;  %s4345_s0 = sld [smem:[#allocation14_spill]] }
  0x27   : > { %v3053_v12 = vld [vmem:[%s4337_s11 + $0x8] sm:$0xff]  ;;  %v3052_v14 = vld [vmem:[%s4337_s11] sm:$0xff]  ;;  %v941_v29 = vld [vmem:[%s3428_s6 + $0x30] sm:$0xff]  ;;  %s909_s30 = scalar_lea.vmem %s4342_s9, %s3416_s29  ;;  %s4344_s9 = sld [smem:[#allocation12_spill]] }
  0x28   : > { %3097 = vmatpush.bf16.msra.mxu1 %v3058_v2  ;;  %1012 = vmatpush.bf16.msra.mxu0 %v3058_v2  ;;  %v3069_v13 = vld [vmem:[%s4338_s7 + $0x8] sm:$0xff]  ;;  %v3068_v15 = vld [vmem:[%s4338_s7] sm:$0xff]  ;;  %v942_v30 = vld [vmem:[%s3428_s6 + $0x38] sm:$0xff]  ;;  %s2826_s12 = sld [smem:[#allocation2 + $0x1]] }
  0x29   : > { %1222 = vmatpush.bf16.msra.mxu2 %v3074_v3  ;;  %v939_v16 = vld [vmem:[%s3428_s6 + $0x20] sm:$0xff]  ;;  %v940_v17 = vld [vmem:[%s3428_s6 + $0x28] sm:$0xff]  ;;  %v1147_v31 = vld [vmem:[%s3434_s27 + $0x10] sm:$0xff]  ;;  %v946_v36 = vpack.c.bf16 %v942_v30, %v941_v29 }
  0x2a   : > { %v1145_v18 = vld [vmem:[%s3434_s27] sm:$0xff]  ;;  %v1146_v19 = vld [vmem:[%s3434_s27 + $0x8] sm:$0xff]  ;;  %v945_v23 = vpack.c.bf16 %v940_v17, %v939_v16  ;;  %v1148_v32 = vld [vmem:[%s3434_s27 + $0x18] sm:$0xff] }
  0x2b   : > { %v3067_v20 = vld [vmem:[%s4341_s5 + $0x38] sm:$0xff]  ;;  %v935_v21 = vld [vmem:[%s3428_s6] sm:$0xff]  ;;  %v936_v22 = vld [vmem:[%s3428_s6 + $0x8] sm:$0xff]  ;;  %v1153_v24 = vpack.c.bf16 %v1146_v19, %v1145_v18  ;;  %v1154_v37 = vpack.c.bf16 %v1148_v32, %v1147_v31 }
  0x2c   : > { %3098 = vmatpush.bf16.msra.mxu1 %v3057_v4  ;;  %1013 = vmatpush.bf16.msra.mxu0 %v3057_v4  ;;  %v943_v25 = vpack.c.bf16 %v936_v22, %v935_v21  ;;  %v3066_v26 = vld [vmem:[%s4341_s5 + $0x30] sm:$0xff]  ;;  %v3065_v27 = vld [vmem:[%s4341_s5 + $0x28] sm:$0xff]  ;;  %v3064_v28 = vld [vmem:[%s4341_s5 + $0x20] sm:$0xff] }
  0x2d   : > { %1223 = vmatpush.bf16.msra.mxu2 %v3073_v5  ;;  %v3063_v33 = vld [vmem:[%s4341_s5 + $0x18] sm:$0xff]  ;;  %v937_v34 = vld [vmem:[%s3428_s6 + $0x10] sm:$0xff]  ;;  %v3061_v40 = vld [vmem:[%s4341_s5 + $0x8] sm:$0xff] }
  0x2e   : > { %v938_v35 = vld [vmem:[%s3428_s6 + $0x18] sm:$0xff]  ;;  %v3062_v39 = vld [vmem:[%s4341_s5 + $0x10] sm:$0xff]  ;;  %v3060_v41 = vld [vmem:[%s4341_s5] sm:$0xff]  ;;  %s4343_s6 = sld [smem:[#allocation13_spill]] }
  0x2f   : > { %v944_v38 = vpack.c.bf16 %v938_v35, %v937_v34  ;;  %v1040_v42 = vld [vmem:[%s909_s30] sm:$0xff]  ;;  %v1041_v43 = vld [vmem:[%s909_s30 + $0x8] sm:$0xff]  ;;  %v1042_v45 = vld [vmem:[%s909_s30 + $0x10] sm:$0xff] }
  0x30   : > { %3099 = vmatpush.bf16.msra.mxu1 %v3056_v6  ;;  %1014 = vmatpush.bf16.msra.mxu0 %v3056_v6  ;;  %v1048_v44 = vpack.c.bf16 %v1041_v43, %v1040_v42  ;;  %v1043_v46 = vld [vmem:[%s909_s30 + $0x18] sm:$0xff]  ;;  %v1149_v48 = vld [vmem:[%s3434_s27 + $0x20] sm:$0xff]  ;;  %v1150_v49 = vld [vmem:[%s3434_s27 + $0x28] sm:$0xff] }
  0x31   : > { %1224 = vmatpush.bf16.msra.mxu2 %v3072_v7  ;;  %v1049_v47 = vpack.c.bf16 %v1043_v46, %v1042_v45  ;;  %v1155_v50 = vpack.c.bf16 %v1150_v49, %v1149_v48  ;;  %v1044_v51 = vld [vmem:[%s909_s30 + $0x20] sm:$0xff]  ;;  %v1045_v52 = vld [vmem:[%s909_s30 + $0x28] sm:$0xff]  ;;  %v1046_v54 = vld [vmem:[%s909_s30 + $0x30] sm:$0xff] }
  0x32   : > { %v1050_v53 = vpack.c.bf16 %v1045_v52, %v1044_v51  ;;  %v1047_v55 = vld [vmem:[%s909_s30 + $0x38] sm:$0xff]  ;;  %v1151_v57 = vld [vmem:[%s3434_s27 + $0x30] sm:$0xff]  ;;  %v3076_v30 = vld [vmem:[%s4344_s9] sm:$0xff]  ;;  %s4346_s30 = sld [smem:[#allocation16_spill]] }
  0x33   : > { %v1051_v56 = vpack.c.bf16 %v1047_v55, %v1046_v54  ;;  %v1152_v58 = vld [vmem:[%s3434_s27 + $0x38] sm:$0xff]  ;;  %s2829_s27 = sld [smem:[#allocation2 + $0x4]] }
  0x34   : > { %3100 = vmatpush.bf16.msra.mxu1 %v3055_v8  ;;  %1015 = vmatpush.bf16.msra.mxu0 %v3055_v8  ;;  %v1156_v59 = vpack.c.bf16 %v1152_v58, %v1151_v57  ;;  %v3079_v0 = vld [vmem:[%s4343_s6 + $0x8] sm:$0xff]  ;;  %v3078_v3 = vld [vmem:[%s4343_s6] sm:$0xff] }
  0x35   : > { %1225 = vmatpush.bf16.msra.mxu2 %v3071_v9  ;;  %1297 = vmatpush.bf16.msra.mxu3 %v3079_v0  ;;  %v3077_v8 = vld [vmem:[%s4344_s9 + $0x8] sm:$0xff] }
  0x38   : > { %3101 = vmatpush.bf16.msra.mxu1 %v3054_v10  ;;  %1016 = vmatpush.bf16.msra.mxu0 %v3054_v10 }
  0x39   : > { %1226 = vmatpush.bf16.msra.mxu2 %v3070_v11  ;;  %1298 = vmatpush.bf16.msra.mxu3 %v3078_v3 }
  0x3c   : > { %3102 = vmatpush.bf16.msra.mxu1 %v3053_v12  ;;  %1017 = vmatpush.bf16.msra.mxu0 %v3053_v12 }
  0x3d   : > { %1227 = vmatpush.bf16.msra.mxu2 %v3069_v13  ;;  %1350 = vmatpush.bf16.msrb.mxu3 %v3077_v8 }
  0x40   : > { %3103 = vmatpush.bf16.msra.mxu1 %v3052_v14  ;;  %1018 = vmatpush.bf16.msra.mxu0 %v3052_v14 }
  0x41   : > { %1228 = vmatpush.bf16.msra.mxu2 %v3068_v15  ;;  %1351 = vmatpush.bf16.msrb.mxu3 %v3076_v30 }
  0x43   : > { %1029 = vmatmul.bf16.vlgmr.msra.gmra.mxu1 %v945_v23  ;;  %1019 = vmatmul.bf16.vlgmr.msra.gmra.mxu0 %v943_v25 }
  0x44   : > { %1116 = vmatpush.bf16.msrb.mxu1 %v3067_v20  ;;  %1229 = vmatmul.bf16.vlgmr.msra.gmra.mxu2 %v1153_v24 }
  0x48   : > { %1117 = vmatpush.bf16.msrb.mxu1 %v3066_v26 }
  0x4c   : > { %1118 = vmatpush.bf16.msrb.mxu1 %v3065_v27 }
  0x50   : > { %1119 = vmatpush.bf16.msrb.mxu1 %v3064_v28 }
  0x53   : > { %1034 = vmatmul.bf16.gmra.mxu1 %v946_v36  ;;  %1024 = vmatmul.bf16.gmra.mxu0 %v944_v38 }
  0x54   : > { %1120 = vmatpush.bf16.msrb.mxu1 %v3063_v33  ;;  %1234 = vmatmul.bf16.gmra.mxu2 %v1154_v37  ;;  %v3081_v33 = vld [vmem:[%s4345_s0 + $0x8] sm:$0xff] }
  0x55   : > { %1411 = vmatpush.bf16.msrb.mxu0 %v3081_v33  ;;  %v3650_v33 = vstv %s930_s10  ;;  %s4349_s10 = sld [smem:[#allocation8_spill]] }
  0x58   : > { %1121 = vmatpush.bf16.msrb.mxu1 %v3062_v39 }
  0x5c   : > { %1122 = vmatpush.bf16.msrb.mxu1 %v3061_v40 }
  0x60   : > { %1123 = vmatpush.bf16.msrb.mxu1 %v3060_v41  ;;  %v3080_v41 = vld [vmem:[%s4345_s0] sm:$0xff]  ;;  %s2827_s0 = sld [smem:[#allocation2 + $0x2]] }
  0x61   : > { %1412 = vmatpush.bf16.msrb.mxu0 %v3080_v41 }
  0x63   : > { %1124 = vmatmul.bf16.vlgmr.msrb.gmra.mxu1 %v1048_v44 }
  0x64   : > { %1239 = vmatmul.bf16.gmra.mxu2 %v1155_v50 }
  0x73   : > { %1129 = vmatmul.bf16.gmra.mxu1 %v1049_v47 }
  0x74   : > { %1244 = vmatmul.bf16.gmra.mxu2 %v1156_v59 }
  0x83   : > { %1134 = vmatmul.bf16.gmra.mxu1 %v1050_v53 }
  0x93   : > { %1139 = vmatmul.bf16.gmra.mxu1 %v1051_v56 }
  0xc0   : > { %v3486_v60 = vpop.f32.mrf.mxu1  ;;  %v3493_v62 = vpop.f32.mrf.mxu0 }
  0xc1   : > { %v1726_v63 = vmul.f32 %v3491_v61, %v3493_v62 }
  0xc3   : > { %v1734_v1 = vsel %vm1278_vm0, %v1726_v63, 0.0 }
  0xc4   : > { %1735 = vadd.xlane.f32.xlu1 %v1734_v1 }
  0xc7   : > { %v3501_v2 = vpop.f32.mrf.mxu2 }
  0xc8   : > { %v3506_v4 = vpop.f32.mrf.mxu1  ;;  %v3508_v5 = vpop.f32.mrf.mxu0  ;;  %v1839_v6 = vmul.f32 %v3491_v61, %v3501_v2 }
  0xc9   : > { %v1727_v7 = vmul.f32 %v3491_v61, %v3508_v5  ;;  %v1731_v43 = vmul.f32 %v3491_v61, %v3506_v4  ;;  %v1250_v57 = vpack.c.bf16 %v3508_v5, %v3493_v62  ;;  %v1252_v3 = vpack.c.bf16 %v3506_v4, %v3486_v60 }
  0xca   : > { %v1847_v9 = vsel %vm1278_vm0, %v1839_v6, 0.0 }
  0xcb   : > { %v1737_v10 = vsel %vm1278_vm0, %v1727_v7, 0.0  ;;  %1848 = vadd.xlane.f32.xlu0 %v1847_v9  ;;  %v1749_v45 = vsel %vm1278_vm0, %v1731_v43, 0.0  ;;  %v3083_v7 = vld [vmem:[%s4346_s30 + $0x8] sm:$0xff] }
  0xcc   : > { %1738 = vadd.xlane.f32.xlu1 %v1737_v10  ;;  %1541 = vmatpush.bf16.msra.mxu1 %v3083_v7 }
  0xcf   : > { %v3519_v11 = vpop.f32.mrf.mxu2 }
  0xd0   : > { %v1840_v12 = vmul.f32 %v3491_v61, %v3519_v11  ;;  %v3523_v13 = vpop.f32.mrf.mxu1  ;;  %v3525_v14 = vpop.f32.mrf.mxu0  ;;  %v1373_v42 = vpack.c.bf16 %v3519_v11, %v3501_v2 }
  0xd1   : > { %v1728_v17 = vmul.f32 %v3491_v61, %v3525_v14 }
  0xd2   : > { %v1850_v15 = vsel %vm1278_vm0, %v1840_v12, 0.0  ;;  %2958 = vmatmul.msk.bf16.vlgmr.msrb.gmra.mxu0 %vm1278_vm0, %v1373_v42 }
  0xd3   : > { %v1740_v22 = vsel %vm1278_vm0, %v1728_v17, 0.0 }
  0xd4   : > { %1851 = vadd.xlane.f32.xlu1 %v1850_v15  ;;  %v3082_v15 = vld [vmem:[%s4346_s30] sm:$0xff] }
  0xd5   : > { %1542 = vmatpush.bf16.msra.mxu1 %v3082_v15 }
  0xd7   : > { %v3528_v16 = vpop.f32.mrf.mxu2 }
  0xd8   : > { %v1841_v18 = vmul.f32 %v3491_v61, %v3528_v16  ;;  %v3534_v19 = vpop.f32.mrf.mxu1  ;;  %v3537_v21 = vpop.f32.mrf.mxu0 }
  0xd9   : > { %v1729_v23 = vmul.f32 %v3491_v61, %v3537_v21  ;;  %v1251_v1 = vpack.c.bf16 %v3537_v21, %v3525_v14  ;;  %v1253_v6 = vpack.c.bf16 %v3534_v19, %v3523_v13 }
  0xda   : > { %v1853_v20 = vsel %vm1278_vm0, %v1841_v18, 0.0 }
  0xdb   : > { %1854 = vadd.xlane.f32.xlu2 %v1853_v20  ;;  %v1743_v24 = vsel %vm1278_vm0, %v1729_v23, 0.0 }
  0xdc   : > { %1741 = vadd.xlane.f32.xlu1 %v1740_v22 }
  0xdf   : > { %v3591_v48 = vpop.f32.mrf.mxu2 }
  0xe0   : > { %v3543_v25 = vpop.f32.mrf.mxu1  ;;  %v1374_v49 = vpack.c.bf16 %v3591_v48, %v3528_v16 }
  0xe1   : > { %v1783_v26 = vmul.f32 %v3491_v61, %v3543_v25 }
  0xe2   : > { %2959 = vmatmul.msk.bf16.gmra.mxu0 %vm1278_vm0, %v1374_v49 }
  0xe3   : > { %1744 = vadd.xlane.f32.xlu2 %v1743_v24  ;;  %v1791_v29 = vsel %vm1278_vm0, %v1783_v26, 0.0 }
  0xe7   : > { %v3598_v51 = vpop.f32.mrf.mxu2 }
  0xe8   : > { %v3547_v27 = vpop.f32.mrf.mxu1  ;;  %v1843_v58 = vmul.f32 %v3491_v61, %v3598_v51 }
  0xe9   : > { %v1258_v28 = vpack.c.bf16 %v3547_v27, %v3543_v25  ;;  %v1784_v31 = vmul.f32 %v3491_v61, %v3547_v27 }
  0xea   : > { %v1859_v59 = vsel %vm1278_vm0, %v1843_v58, 0.0 }
  0xeb   : > { %1792 = vadd.xlane.f32.xlu2 %v1791_v29  ;;  %2934 = vmatmul.msk.bf16.vlgmr.msra.gmra.mxu3 %vm1278_vm0, %v1258_v28  ;;  %v1794_v34 = vsel %vm1278_vm0, %v1784_v31, 0.0  ;;  %v3647_v29 = vld [vmem:[%s4347_s1] ss:$0 sm:$0xff] }
  0xef   : > { %v3605_v54 = vpop.f32.mrf.mxu2 }
  0xf0   : > { %v3558_v32 = vpop.f32.mrf.mxu1  ;;  %v1375_v55 = vpack.c.bf16 %v3605_v54, %v3598_v51 }
  0xf1   : > { %v1785_v35 = vmul.f32 %v3491_v61, %v3558_v32 }
  0xf2   : > { %2960 = vmatmul.msk.bf16.gmra.mxu0 %vm1278_vm0, %v1375_v55 }
  0xf3   : > { %1795 = vadd.xlane.f32.xlu2 %v1794_v34  ;;  %v1797_v36 = vsel %vm1278_vm0, %v1785_v35, 0.0 }
  0xf4   : > { %1798 = vadd.xlane.f32.xlu0 %v1797_v36 }
  0xf7   : > { %v3610_v56 = vpop.f32.mrf.mxu2 }
  0xf8   : > { %v3567_v37 = vpop.f32.mrf.mxu1 }
  0xf9   : > { %v1259_v38 = vpack.c.bf16 %v3567_v37, %v3558_v32  ;;  %v1786_v39 = vmul.f32 %v3491_v61, %v3567_v37 }
  0xfb   : > { %2935 = vmatmul.msk.bf16.gmra.mxu3 %vm1278_vm0, %v1259_v38  ;;  %v1800_v40 = vsel %vm1278_vm0, %v1786_v39, 0.0 }
  0xfc   : > { %1801 = vadd.xlane.f32.xlu1 %v1800_v40 }
  0xff   : > { %v3618_v63 = vpop.f32.mrf.mxu2 }
 0x100   : > { %v3582_v44 = vpop.f32.mrf.mxu1  ;;  %v1376_v0 = vpack.c.bf16 %v3618_v63, %v3610_v56 }
 0x102   : > { %2961 = vmatmul.msk.bf16.gmra.mxu0 %vm1278_vm0, %v1376_v0 }
 0x104   : > { %1750 = vadd.xlane.f32.xlu1 %v1749_v45 }
 0x108   : > { %v3586_v46 = vpop.f32.mrf.mxu1 }
 0x109   : > { %v1260_v47 = vpack.c.bf16 %v3586_v46, %v3582_v44 }
 0x10b   : > { %2936 = vmatmul.msk.bf16.gmra.mxu3 %vm1278_vm0, %v1260_v47 }
 0x10c   : > { %1860 = vadd.xlane.f32.xlu1 %v1859_v59 }
 0x110   : > { %v3595_v50 = vpop.f32.mrf.mxu1 }
 0x118   : > { %v3600_v52 = vpop.f32.mrf.mxu1 }
 0x119   : > { %v1261_v53 = vpack.c.bf16 %v3600_v52, %v3595_v50 }
 0x11b   : > { %2937 = vmatmul.msk.bf16.gmra.mxu3 %vm1278_vm0, %v1261_v53 }
 0x12b   : > { %2946 = vmatmul.msk.bf16.vlgmr.msrb.gmra.mxu3 %vm1278_vm0, %v1250_v57 }
 0x13b   : > { %2947 = vmatmul.msk.bf16.gmra.mxu3 %vm1278_vm0, %v1251_v1 }
 0x14b   : > { %2948 = vmatmul.msk.bf16.gmra.mxu3 %vm1278_vm0, %v1252_v3 }
 0x14f   : > { %v1414_v22 = vpop.f32.mrf.mxu0 }
 0x157   : > { %v1416_v24 = vpop.f32.mrf.mxu0 }
 0x15b   : > { %2949 = vmatmul.msk.bf16.gmra.mxu3 %vm1278_vm0, %v1253_v6 }
 0x15f   : > { %v1419_v34 = vpop.f32.mrf.mxu0 }
 0x167   : > { %v1421_v58 = vpop.f32.mrf.mxu0 }
 0x16e   : > { %v1300_v8 = vpop.f32.mrf.mxu3 }
 0x176   : > { %v1302_v9 = vpop.f32.mrf.mxu3 }
 0x17e   : > { %v1305_v10 = vpop.f32.mrf.mxu3 }
 0x186   : > { %v1307_v12 = vpop.f32.mrf.mxu3 }
 0x18e   : > { %v1310_v17 = vpop.f32.mrf.mxu3 }
 0x196   : > { %v3638_v18 = vpop.f32.mrf.mxu3 }
 0x19e   : > { %v3640_v20 = vpop.f32.mrf.mxu3 }
 0x1a6   : > { %v3642_v23 = vpop.f32.mrf.mxu3 }
 0x1ae   : > { %v1353_v26 = vpop.f32.mrf.mxu3 }
 0x1af   : > { %v1354_v28 = vadd.f32 %v1353_v26, %v1300_v8 }
 0x1b1   : > { %v1434_v30 = vadd.f32 %v1414_v22, %v1354_v28 }
 0x1b3   : > { %v1446_v31 = vadd.f32 %v3647_v29, %v1434_v30 }
 0x1b5   : > { %v1463_v36 = vmul.f32 %v3650_v33, %v1446_v31  ;;  %vm1454_vm1 = vcmp.ge.f32.partialorder %v1446_v31, 0.0  ;;  %v1487_v53 = vmul.f32 0.5, %v1446_v31 }
 0x1b6   : > { %v1355_v35 = vpop.f32.mrf.mxu3 }
 0x1b7   : > { %v1356_v38 = vadd.f32 %v1355_v35, %v1302_v9  ;;  %v3653_v40 = vsel %vm1454_vm1, %v1446_v31, %v1463_v36 }
 0x1b8   : > { %v1479_v43 = vmul.f32 0.5, %v3653_v40 }
 0x1b9   : > { %v1435_v39 = vadd.f32 %v1416_v24, %v1356_v38 }
 0x1ba   : > { %v1495_v0 = vadd.f32 %v1487_v53, %v1479_v43 }
 0x1bb   : > { %v1447_v41 = vadd.f32 %v3647_v29, %v1435_v39 }
 0x1bd   : > { %vm1455_vm2 = vcmp.ge.f32.partialorder %v1447_v41, 0.0  ;;  %v1464_v42 = vmul.f32 %v3650_v33, %v1447_v41  ;;  %v1488_v57 = vmul.f32 0.5, %v1447_v41 }
 0x1be   : > { %v1358_v45 = vpop.f32.mrf.mxu3 }
 0x1bf   : > { %v3658_v47 = vsel %vm1455_vm2, %v1447_v41, %v1464_v42  ;;  %v1359_v49 = vadd.f32 %v1358_v45, %v1305_v10  ;;  %v1424_v10 = vpop.f32.mrf.mxu0 }
 0x1c0   : > { %v1480_v55 = vmul.f32 0.5, %v3658_v47 }
 0x1c1   : > { %v1436_v59 = vadd.f32 %v1419_v34, %v1359_v49 }
 0x1c2   : > { %v1496_v1 = vadd.f32 %v1488_v57, %v1480_v55  ;;  %v3084_v57 = vld [vmem:[%s4348_s2] sm:$0xff] }
 0x1c3   : > { %v1448_v3 = vadd.f32 %v3647_v29, %v1436_v59 }
 0x1c4   : > { %v1503_v6 = vpack.c.bf16 %v1496_v1, %v1495_v0 }
 0x1c5   : > { %v1465_v8 = vmul.f32 %v3650_v33, %v1448_v3  ;;  %vm1456_vm3 = vcmp.ge.f32.partialorder %v1448_v3, 0.0  ;;  %v1489_v36 = vmul.f32 0.5, %v1448_v3 }
 0x1c6   : > { %v1360_v7 = vpop.f32.mrf.mxu3  ;;  %2970 = vmatmul.msk.bf16.vlgmr.msra.gmra.mxu1 %vm1278_vm0, %v1503_v6 }
 0x1c7   : > { %v1361_v9 = vadd.f32 %v1360_v7, %v1307_v12  ;;  %v3665_v24 = vsel %vm1456_vm3, %v1448_v3, %v1465_v8  ;;  %v1426_v43 = vpop.f32.mrf.mxu0 }
 0x1c8   : > { %v1481_v30 = vmul.f32 0.5, %v3665_v24 }
 0x1c9   : > { %v1437_v15 = vadd.f32 %v1421_v58, %v1361_v9 }
 0x1ca   : > { %v1497_v39 = vadd.f32 %v1489_v36, %v1481_v30 }
 0x1cb   : > { %v1449_v22 = vadd.f32 %v3647_v29, %v1437_v15 }
 0x1cd   : > { %v1466_v26 = vmul.f32 %v3650_v33, %v1449_v22  ;;  %vm1457_vm4 = vcmp.ge.f32.partialorder %v1449_v22, 0.0  ;;  %v1490_v12 = vmul.f32 0.5, %v1449_v22 }
 0x1ce   : > { %v1363_v28 = vpop.f32.mrf.mxu3 }
 0x1cf   : > { %v1364_v31 = vadd.f32 %v1363_v28, %v1310_v17  ;;  %v3669_v34 = vsel %vm1457_vm4, %v1449_v22, %v1466_v26  ;;  %v3085_v17 = vld [vmem:[%s4348_s2 + $0x8] sm:$0xff]  ;;  %v1429_v3 = vpop.f32.mrf.mxu0 }
 0x1d0   : > { %v1482_v35 = vmul.f32 0.5, %v3669_v34  ;;  %1630 = vmatpush.bf16.msrb.mxu2 %v3085_v17 }
 0x1d1   : > { %v1438_v38 = vadd.f32 %v1424_v10, %v1364_v31 }
 0x1d2   : > { %v1498_v41 = vadd.f32 %v1490_v12, %v1482_v35 }
 0x1d3   : > { %v1450_v42 = vadd.f32 %v3647_v29, %v1438_v38 }
 0x1d4   : > { %v1504_v45 = vpack.c.bf16 %v1498_v41, %v1497_v39  ;;  %1631 = vmatpush.bf16.msrb.mxu2 %v3084_v57 }
 0x1d5   : > { %v1467_v53 = vmul.f32 %v3650_v33, %v1450_v42  ;;  %vm1458_vm5 = vcmp.ge.f32.partialorder %v1450_v42, 0.0  ;;  %v1491_v15 = vmul.f32 0.5, %v1450_v42 }
 0x1d6   : > { %v1365_v49 = vpop.f32.mrf.mxu3  ;;  %2971 = vmatmul.msk.bf16.gmra.mxu1 %vm1278_vm0, %v1504_v45 }
 0x1d7   : > { %v1366_v55 = vadd.f32 %v1365_v49, %v3638_v18  ;;  %v1475_v0 = vsel %vm1458_vm5, %v1450_v42, %v1467_v53  ;;  %v1431_v38 = vpop.f32.mrf.mxu0 }
 0x1d8   : > { %v1483_v7 = vmul.f32 0.5, %v1475_v0 }
 0x1d9   : > { %v1439_v58 = vadd.f32 %v1426_v43, %v1366_v55 }
 0x1da   : > { %v1499_v26 = vadd.f32 %v1491_v15, %v1483_v7 }
 0x1db   : > { %v1451_v59 = vadd.f32 %v3647_v29, %v1439_v58 }
 0x1dd   : > { %v1468_v1 = vmul.f32 %v3650_v33, %v1451_v59  ;;  %vm1459_vm6 = vcmp.ge.f32.partialorder %v1451_v59, 0.0  ;;  %v1492_v10 = vmul.f32 0.5, %v1451_v59 }
 0x1de   : > { %v1368_v6 = vpop.f32.mrf.mxu3 }
 0x1df   : > { %v1369_v8 = vadd.f32 %v1368_v6, %v3640_v20  ;;  %v1476_v18 = vsel %vm1459_vm6, %v1451_v59, %v1468_v1 }
 0x1e0   : > { %v1484_v9 = vmul.f32 0.5, %v1476_v18 }
 0x1e1   : > { %v1440_v22 = vadd.f32 %v1429_v3, %v1369_v8 }
 0x1e2   : > { %v1500_v28 = vadd.f32 %v1492_v10, %v1484_v9 }
 0x1e3   : > { %v1452_v30 = vadd.f32 %v3647_v29, %v1440_v22 }
 0x1e4   : > { %v1505_v31 = vpack.c.bf16 %v1500_v28, %v1499_v26 }
 0x1e5   : > { %v1469_v36 = vmul.f32 %v3650_v33, %v1452_v30  ;;  %vm1460_vm7 = vcmp.ge.f32.partialorder %v1452_v30, 0.0  ;;  %v1493_v17 = vmul.f32 0.5, %v1452_v30 }
 0x1e6   : > { %v1370_v35 = vpop.f32.mrf.mxu3  ;;  %2972 = vmatmul.msk.bf16.gmra.mxu1 %vm1278_vm0, %v1505_v31 }
 0x1e7   : > { %v1371_v12 = vadd.f32 %v1370_v35, %v3642_v23  ;;  %v1477_v41 = vsel %vm1460_vm7, %v1452_v30, %v1469_v36 }
 0x1e8   : > { %v1485_v43 = vmul.f32 0.5, %v1477_v41 }
 0x1e9   : > { %v1441_v20 = vadd.f32 %v1431_v38, %v1371_v12 }
 0x1ea   : > { %v1501_v55 = vadd.f32 %v1493_v17, %v1485_v43 }
 0x1eb   : > { %v1453_v39 = vadd.f32 %v3647_v29, %v1441_v20 }
 0x1ed   : > { %v1470_v42 = vmul.f32 %v3650_v33, %v1453_v39  ;;  %vm1461_vm8 = vcmp.ge.f32.partialorder %v1453_v39, 0.0  ;;  %v1494_v53 = vmul.f32 0.5, %v1453_v39 }
 0x1ef   : > { %v1478_v45 = vsel %vm1461_vm8, %v1453_v39, %v1470_v42 }
 0x1f0   : > { %v1486_v49 = vmul.f32 0.5, %v1478_v45 }
 0x1f2   : > { %v1502_v57 = vadd.f32 %v1494_v53, %v1486_v49 }
 0x1f4   : > { %v1506_v58 = vpack.c.bf16 %v1502_v57, %v1501_v55 }
 0x1f6   : > { %2973 = vmatmul.msk.bf16.gmra.mxu1 %vm1278_vm0, %v1506_v58 }
 0x243   : > { %v1544_v23 = vpop.f32.mrf.mxu1 }
 0x244   : > { %v1545_v59 = vadd.f32 %v1544_v23, %v3653_v40 }
 0x246   : > { %v1572_v29 = vmul.f32 %v1545_v59, %v3650_v33  ;;  %vm1564_vm9 = vcmp.ge.f32.partialorder %v1545_v59, 0.0 }
 0x248   : > { %v1580_v7 = vsel %vm1564_vm9, %v1545_v59, %v1572_v29  ;;  %v3723_v59 = vstv %s2826_s12  ;;  %s2828_s12 = sld [smem:[#allocation2 + $0x3]] }
 0x24b   : > { %v1546_v1 = vpop.f32.mrf.mxu1 }
 0x24c   : > { %v1547_v3 = vadd.f32 %v1546_v1, %v3658_v47  ;;  %v3728_v1 = vld [vmem:[%s4298_s14] ss:$0 sm:$0xff] }
 0x24e   : > { %vm1565_vm10 = vcmp.ge.f32.partialorder %v1547_v3, 0.0  ;;  %v1573_v6 = vmul.f32 %v1547_v3, %v3650_v33 }
 0x250   : > { %v1581_v8 = vsel %vm1565_vm10, %v1547_v3, %v1573_v6  ;;  %vm2477_vm10 = vcmask 1043456  }
 0x251   : > { %v1588_v9 = vpack.c.bf16 %v1581_v8, %v1580_v7 }
 0x253   : > { %v1549_v15 = vpop.f32.mrf.mxu1  ;;  %2982 = vmatmul.msk.bf16.vlgmr.msrb.gmra.mxu2 %vm1278_vm0, %v1588_v9 }
 0x254   : > { %v1550_v10 = vadd.f32 %v1549_v15, %v3665_v24 }
 0x256   : > { %v1574_v40 = vmul.f32 %v1550_v10, %v3650_v33  ;;  %vm1566_vm11 = vcmp.ge.f32.partialorder %v1550_v10, 0.0 }
 0x258   : > { %v1582_v28 = vsel %vm1566_vm11, %v1550_v10, %v1574_v40  ;;  %vm2464_vm11 = vcmask 64512  }
 0x25b   : > { %v1551_v22 = vpop.f32.mrf.mxu1 }
 0x25c   : > { %v1552_v26 = vadd.f32 %v1551_v22, %v3669_v34 }
 0x25e   : > { %vm1567_vm12 = vcmp.ge.f32.partialorder %v1552_v26, 0.0  ;;  %v1575_v47 = vmul.f32 %v1552_v26, %v3650_v33 }
 0x260   : > { %v1583_v30 = vsel %vm1567_vm12, %v1552_v26, %v1575_v47 }
 0x261   : > { %v1589_v31 = vpack.c.bf16 %v1583_v30, %v1582_v28 }
 0x263   : > { %v1554_v35 = vpop.f32.mrf.mxu1  ;;  %2983 = vmatmul.msk.bf16.gmra.mxu2 %vm1278_vm0, %v1589_v31 }
 0x264   : > { %v1555_v36 = vadd.f32 %v1554_v35, %v1475_v0 }
 0x266   : > { %v1576_v38 = vmul.f32 %v1555_v36, %v3650_v33  ;;  %vm1568_vm13 = vcmp.ge.f32.partialorder %v1555_v36, 0.0 }
 0x268   : > { %v1584_v34 = vsel %vm1568_vm13, %v1555_v36, %v1576_v38 }
 0x26b   : > { %v1556_v12 = vpop.f32.mrf.mxu1 }
 0x26c   : > { %v1557_v24 = vadd.f32 %v1556_v12, %v1476_v18 }
 0x26e   : > { %vm1569_vm14 = vcmp.ge.f32.partialorder %v1557_v24, 0.0  ;;  %v1577_v20 = vmul.f32 %v1557_v24, %v3650_v33 }
 0x270   : > { %v3704_v39 = vsel %vm1569_vm14, %v1557_v24, %v1577_v20 }
 0x271   : > { %v1590_v42 = vpack.c.bf16 %v3704_v39, %v1584_v34 }
 0x273   : > { %v1559_v43 = vpop.f32.mrf.mxu1  ;;  %2984 = vmatmul.msk.bf16.gmra.mxu2 %vm1278_vm0, %v1590_v42 }
 0x274   : > { %v1560_v49 = vadd.f32 %v1559_v43, %v1477_v41  ;;  %v3720_v41 = vld [vmem:[%s4297_s13] ss:$0 sm:$0xff] }
 0x276   : > { %v1578_v0 = vmul.f32 %v1560_v49, %v3650_v33  ;;  %vm1570_vm15 = vcmp.ge.f32.partialorder %v1560_v49, 0.0 }
 0x278   : > { %v3710_v55 = vsel %vm1570_vm15, %v1560_v49, %v1578_v0  ;;  %v1787_v0 = vmul.f32 %v3491_v61, %v3582_v44 }
 0x27b   : > { %v1561_v17 = vpop.f32.mrf.mxu1 }
 0x27c   : > { %v1562_v53 = vadd.f32 %v1561_v17, %v1478_v45 }
 0x27e   : > { %vm1571_vm1 = vcmp.ge.f32.partialorder %v1562_v53, 0.0  ;;  %v1579_v18 = vmul.f32 %v1562_v53, %v3650_v33 }
 0x280   : > { %v3712_v57 = vsel %vm1571_vm1, %v1562_v53, %v1579_v18 }
 0x281   : > { %v1591_v58 = vpack.c.bf16 %v3712_v57, %v3710_v55 }
 0x283   : > { %2985 = vmatmul.msk.bf16.gmra.mxu2 %vm1278_vm0, %v1591_v58 }
 0x2d6   : > { %v1633_v45 = vpop.f32.mrf.mxu2 }
 0x2d7   : > { %v1634_v23 = vadd.f32 %v3720_v41, %v1633_v45 }
 0x2d9   : > { %v1653_v33 = vadd.f32 %v1634_v23, %v1580_v7 }
 0x2db   : > { %v1670_v29 = vmul.f32 %v3723_v59, %v1653_v33  ;;  %vm1661_vm2 = vcmp.ge.f32.partialorder %v1653_v33, 0.0 }
 0x2dd   : > { %v1678_v3 = vsel %vm1661_vm2, %v1653_v33, %v1670_v29  ;;  %v1803_v33 = vsel %vm1278_vm0, %v1787_v0, 0.0 }
 0x2de   : > { %v1635_v6 = vpop.f32.mrf.mxu2  ;;  %v1690_v9 = vmul.f32 %v3728_v1, %v1678_v3  ;;  %v1730_v3 = vmul.f32 %v3491_v61, %v3486_v60 }
 0x2df   : > { %v1636_v15 = vadd.f32 %v3720_v41, %v1635_v6 }
 0x2e0   : > { %v1698_v10 = vsel %vm1278_vm0, %v1690_v9, 0.0  ;;  %v1844_v9 = vmul.f32 %v3491_v61, %v3605_v54 }
 0x2e1   : > { %v1654_v22 = vadd.f32 %v1636_v15, %v1581_v8  ;;  %1699 = vadd.xlane.f32.xlu0 %v1698_v10  ;;  %v1842_v8 = vmul.f32 %v3491_v61, %v3591_v48 }
 0x2e3   : > { %v1671_v7 = vmul.f32 %v3723_v59, %v1654_v22  ;;  %vm1662_vm3 = vcmp.ge.f32.partialorder %v1654_v22, 0.0  ;;  %v1856_v43 = vsel %vm1278_vm0, %v1842_v8, 0.0 }
 0x2e5   : > { %v1679_v40 = vsel %vm1662_vm3, %v1654_v22, %v1671_v7 }
 0x2e6   : > { %v1638_v26 = vpop.f32.mrf.mxu2  ;;  %v1691_v47 = vmul.f32 %v3728_v1, %v1679_v40 }
 0x2e7   : > { %v1639_v31 = vadd.f32 %v3720_v41, %v1638_v26  ;;  %v1862_v26 = vsel %vm1278_vm0, %v1844_v9, 0.0 }
 0x2e8   : > { %v1701_v35 = vsel %vm1278_vm0, %v1691_v47, 0.0 }
 0x2e9   : > { %v1655_v36 = vadd.f32 %v1639_v31, %v1582_v28  ;;  %1702 = vadd.xlane.f32.xlu0 %v1701_v35  ;;  %v1789_v31 = vmul.f32 %v3491_v61, %v3595_v50  ;;  %v1788_v35 = vmul.f32 %v3491_v61, %v3586_v46 }
 0x2eb   : > { %v1672_v12 = vmul.f32 %v3723_v59, %v1655_v36  ;;  %vm1663_vm4 = vcmp.ge.f32.partialorder %v1655_v36, 0.0 }
 0x2ed   : > { %v1680_v38 = vsel %vm1663_vm4, %v1655_v36, %v1672_v12 }
 0x2ee   : > { %v1640_v24 = vpop.f32.mrf.mxu2  ;;  %v1692_v20 = vmul.f32 %v3728_v1, %v1680_v38  ;;  %v1809_v38 = vsel %vm1278_vm0, %v1789_v31, 0.0 }
 0x2ef   : > { %v1641_v42 = vadd.f32 %v3720_v41, %v1640_v24  ;;  %v1806_v24 = vsel %vm1278_vm0, %v1788_v35, 0.0  ;;  %v3799_v35 = vstv %s2829_s27  ;;  %s3814_s27 = scalar_lea.vmem %s4349_s10, %s3416_s29 }
 0x2f0   : > { %v1704_v49 = vsel %vm1278_vm0, %v1692_v20, 0.0 }
 0x2f1   : > { %v1656_v17 = vadd.f32 %v1641_v42, %v1583_v30  ;;  %1857 = vadd.xlane.f32.xlu0 %v1856_v43  ;;  %1705 = vadd.xlane.f32.xlu2 %v1704_v49  ;;  %v1733_v43 = vmul.f32 %v3491_v61, %v3534_v19 }
 0x2f3   : > { %v1673_v28 = vmul.f32 %v3723_v59, %v1656_v17  ;;  %vm1664_vm5 = vcmp.ge.f32.partialorder %v1656_v17, 0.0 }
 0x2f5   : > { %v1681_v53 = vsel %vm1664_vm5, %v1656_v17, %v1673_v28  ;;  %v1732_v17 = vmul.f32 %v3491_v61, %v3523_v13 }
 0x2f6   : > { %v1643_v18 = vpop.f32.mrf.mxu2  ;;  %v1693_v58 = vmul.f32 %v3728_v1, %v1681_v53  ;;  %v1755_v53 = vsel %vm1278_vm0, %v1733_v43, 0.0 }
 0x2f7   : > { %v1644_v45 = vadd.f32 %v3720_v41, %v1643_v18 }
 0x2f8   : > { %v1707_v23 = vsel %vm1278_vm0, %v1693_v58, 0.0 }
 0x2f9   : > { %v1657_v29 = vadd.f32 %v1644_v45, %v1584_v34  ;;  %1708 = vadd.xlane.f32.xlu0 %v1707_v23  ;;  %1804 = vadd.xlane.f32.xlu2 %v1803_v33  ;;  %v1746_v34 = vsel %vm1278_vm0, %v1730_v3, 0.0 }
 0x2fb   : > { %v1674_v30 = vmul.f32 %v3723_v59, %v1657_v29  ;;  %vm1665_vm6 = vcmp.ge.f32.partialorder %v1657_v29, 0.0 }
 0x2fd   : > { %v1682_v6 = vsel %vm1665_vm6, %v1657_v29, %v1674_v30  ;;  %v1790_v29 = vmul.f32 %v3491_v61, %v3600_v52 }
 0x2fe   : > { %v1645_v15 = vpop.f32.mrf.mxu2  ;;  %v1694_v10 = vmul.f32 %v3728_v1, %v1682_v6  ;;  %v1845_v6 = vmul.f32 %v3491_v61, %v3610_v56 }
 0x2ff   : > { %v1646_v22 = vadd.f32 %v3720_v41, %v1645_v15  ;;  %v1812_v3 = vsel %vm1278_vm0, %v1790_v29, 0.0 }
 0x300   : > { %v1710_v7 = vsel %vm1278_vm0, %v1694_v10, 0.0  ;;  %v1865_v15 = vsel %vm1278_vm0, %v1845_v6, 0.0 }
 0x301   : > { %v1658_v40 = vadd.f32 %v1646_v22, %v3704_v39  ;;  %1711 = vadd.xlane.f32.xlu1 %v1710_v7  ;;  %1747 = vadd.xlane.f32.xlu0 %v1746_v34  ;;  %v1855_v22 = vpop.xlane.xlu2 %1854  ;;  %v1849_v7 = vpop.xlane.xlu0 %1848 }
 0x302   : > { %1863 = vadd.xlane.f32.xlu2 %v1862_v26 }
 0x303   : > { %v1675_v47 = vmul.f32 %v3723_v59, %v1658_v40  ;;  %vm1666_vm7 = vcmp.ge.f32.partialorder %v1658_v40, 0.0 }
 0x305   : > { %v1683_v36 = vsel %vm1666_vm7, %v1658_v40, %v1675_v47 }
 0x306   : > { %v1648_v12 = vpop.f32.mrf.mxu2  ;;  %v1695_v8 = vmul.f32 %v3728_v1, %v1683_v36 }
 0x307   : > { %v1649_v39 = vadd.f32 %v3720_v41, %v1648_v12 }
 0x308   : > { %v1713_v20 = vsel %vm1278_vm0, %v1695_v8, 0.0 }
 0x309   : > { %v1659_v42 = vadd.f32 %v1649_v39, %v3710_v55  ;;  %1810 = vadd.xlane.f32.xlu1 %v1809_v38  ;;  %1807 = vadd.xlane.f32.xlu0 %v1806_v24  ;;  %v1752_v55 = vsel %vm1278_vm0, %v1732_v17, 0.0  ;;  %v3797_v40 = vpop.xlane.xlu2 %1744  ;;  %v1799_v26 = vpop.xlane.xlu0 %1798 }
 0x30a   : > { %1714 = vadd.xlane.f32.xlu2 %v1713_v20  ;;  %v2459_v20 = vld [vmem:[%s4305_s21] sm:$0xf] }
 0x30b   : > { %v1676_v49 = vmul.f32 %v3723_v59, %v1659_v42  ;;  %vm1667_vm8 = vcmp.ge.f32.partialorder %v1659_v42, 0.0  ;;  %v2479_v17 = vsel %vm2477_vm10, %v2459_v20, 0 }
 0x30c   : > { %2488 = vmatpush.bf16.msra.mxu2 %v2479_v17 }
 0x30d   : > { %v1684_v58 = vsel %vm1667_vm8, %v1659_v42, %v1676_v49 }
 0x30e   : > { %v1650_v28 = vpop.f32.mrf.mxu2  ;;  %v1696_v23 = vmul.f32 %v3728_v1, %v1684_v58 }
 0x30f   : > { %v1651_v0 = vadd.f32 %v3720_v41, %v1650_v28 }
 0x311   : > { %v1660_v18 = vadd.f32 %v1651_v0, %v3712_v57  ;;  %1756 = vadd.xlane.f32.xlu0 %v1755_v53  ;;  %v1716_v57 = vsel %vm1278_vm0, %v1696_v23, 0.0  ;;  %v1793_v31 = vpop.xlane.xlu2 %1792 }
 0x312   : > { %1753 = vadd.xlane.f32.xlu2 %v1752_v55 }
 0x313   : > { %v1677_v45 = vmul.f32 %v3723_v59, %v1660_v18  ;;  %vm1668_vm9 = vcmp.ge.f32.partialorder %v1660_v18, 0.0  ;;  %v1846_v59 = vmul.f32 %v3491_v61, %v3618_v63 }
 0x315   : > { %v1685_v33 = vsel %vm1668_vm9, %v1660_v18, %v1677_v45  ;;  %v1868_v9 = vsel %vm1278_vm0, %v1846_v59, 0.0 }
 0x316   : > { %v1697_v41 = vmul.f32 %v3728_v1, %v1685_v33  ;;  %v1736_v1 = vpop.xlane.xlu1 %1735 }
 0x318   : > { %v1719_v30 = vsel %vm1278_vm0, %v1697_v41, 0.0 }
 0x319   : > { %1720 = vadd.xlane.f32.xlu1 %v1719_v30  ;;  %1717 = vadd.xlane.f32.xlu0 %v1716_v57  ;;  %v1796_v53 = vpop.xlane.xlu2 %1795  ;;  %v3087_v57 = vld [vmem:[%s4300_s16 + $0x8] sm:$0xff] }
 0x31a   : > { %1813 = vadd.xlane.f32.xlu2 %v1812_v3  ;;  %2217 = vmatpush.bf16.msra.mxu3 %v3087_v57 }
 0x31e   : > { %v1739_v10 = vpop.xlane.xlu1 %1738 }
 0x321   : > { %1869 = vadd.xlane.f32.xlu1 %v1868_v9  ;;  %1866 = vadd.xlane.f32.xlu0 %v1865_v15 }
 0x326   : > { %v1852_v34 = vpop.xlane.xlu1 %1851 }
 0x32e   : > { %v1742_v47 = vpop.xlane.xlu1 %1741 }
 0x336   : > { %v3807_v42 = vpop.xlane.xlu1 %1801 }
 0x354   : > { %v1700_v61 = vpop.xlane.xlu0 %1699 }
 0x355   : > { %v1758_v36 = vadd.f32 %v1736_v1, %v1700_v61  ;;  %v1815_v12 = vadd.f32 %v1793_v31, %v1700_v61  ;;  %v1871_v8 = vadd.f32 %v1849_v7, %v1700_v61  ;;  %v2447_v7 = vld [vmem:[%s3814_s27] sm:$0xff]  ;;  %v3823_v31 = vpop.xlane.xlu1 %1750 }
 0x357   : > { %v1767_v39 = vadd.f32 %v3799_v35, %v1758_v36  ;;  %v1823_v38 = vadd.f32 %v1815_v12, %v3799_v35  ;;  %v1879_v24 = vadd.f32 %v1871_v8, %v3799_v35 }
 0x359   : > { %v1775_v43 = vmax.f32 %v1767_v39, 0.0  ;;  %v1831_v49 = vmax.f32 %v1823_v38, 0.0  ;;  %v1887_v28 = vmax.f32 %v1879_v24, 0.0 }
 0x35b   : > { %v1895_v0 = vmax.f32 %v1775_v43, %v1831_v49 }
 0x35c   : > { %v1703_v18 = vpop.xlane.xlu0 %1702 }
 0x35d   : > { %v1903_v55 = vmax.f32 %v1895_v0, %v1887_v28  ;;  %v1759_v58 = vadd.f32 %v1739_v10, %v1703_v18  ;;  %v1816_v45 = vadd.f32 %v1796_v53, %v1703_v18  ;;  %v1872_v23 = vadd.f32 %v1852_v34, %v1703_v18  ;;  %v2448_v34 = vld [vmem:[%s3814_s27 + $0x8] sm:$0xff] }
 0x35e   : > { %v2455_v61 = vpack.c.bf16 %v2448_v34, %v2447_v7 }
 0x35f   : > { %v1911_v33 = vsub.f32 %v1775_v43, %v1903_v55  ;;  %v1935_v29 = vsub.f32 %v1831_v49, %v1903_v55  ;;  %v1959_v41 = vsub.f32 %v1887_v28, %v1903_v55  ;;  %v1768_v30 = vadd.f32 %v3799_v35, %v1759_v58 }
 0x360   : > { %v1824_v3 = vadd.f32 %v1816_v45, %v3799_v35  ;;  %v1880_v59 = vadd.f32 %v1872_v23, %v3799_v35  ;;  %3022 = vmatmul.msk.bf16.vlgmr.msra.gmra.mxu2 %vm2464_vm11, %v2455_v61 }
 0x361   : > { %v1919_v6 = vmul.f32 1.442695, %v1911_v33  ;;  %v1943_v9 = vmul.f32 1.442695, %v1935_v29  ;;  %v1967_v15 = vmul.f32 1.442695, %v1959_v41  ;;  %v1861_v33 = vpop.xlane.xlu1 %1860 }
 0x362   : > { %v1776_v1 = vmax.f32 %v1768_v30, 0.0  ;;  %v1832_v10 = vmax.f32 %v1824_v3, 0.0  ;;  %v1888_v36 = vmax.f32 %v1880_v59, 0.0 }
 0x363   : > { %3132 = vpow2.f32 %v1919_v6 }
 0x364   : > { %3134 = vpow2.f32 %v1943_v9  ;;  %v1896_v12 = vmax.f32 %v1776_v1, %v1832_v10  ;;  %v1858_v8 = vpop.xlane.xlu0 %1857  ;;  %v1706_v39 = vpop.xlane.xlu2 %1705 }
 0x365   : > { %v1760_v38 = vadd.f32 %v1742_v47, %v1706_v39  ;;  %v1817_v24 = vadd.f32 %v1799_v26, %v1706_v39  ;;  %v1873_v20 = vadd.f32 %v1855_v22, %v1706_v39  ;;  %3136 = vpow2.f32 %v1967_v15 }
 0x366   : > { %v1904_v43 = vmax.f32 %v1896_v12, %v1888_v36 }
 0x367   : > { %v1769_v49 = vadd.f32 %v3799_v35, %v1760_v38  ;;  %v1825_v17 = vadd.f32 %v1817_v24, %v3799_v35  ;;  %v1881_v28 = vadd.f32 %v1873_v20, %v3799_v35  ;;  %v2449_v38 = vld [vmem:[%s3814_s27 + $0x10] sm:$0xff]  ;;  %v2450_v24 = vld [vmem:[%s3814_s27 + $0x18] sm:$0xff] }
 0x368   : > { %v1912_v0 = vsub.f32 %v1776_v1, %v1904_v43  ;;  %v1936_v53 = vsub.f32 %v1832_v10, %v1904_v43  ;;  %v1960_v18 = vsub.f32 %v1888_v36, %v1904_v43 }
 0x369   : > { %v3829_v55 = vpop.eup %3132  ;;  %v1777_v58 = vmax.f32 %v1769_v49, 0.0  ;;  %v1833_v45 = vmax.f32 %v1825_v17, 0.0  ;;  %v1889_v41 = vmax.f32 %v1881_v28, 0.0  ;;  %v2456_v49 = vpack.c.bf16 %v2450_v24, %v2449_v38 }
 0x36a   : > { %v3831_v47 = vpop.eup %3134  ;;  %v1921_v22 = vmul.f32 1.442695, %v1912_v0  ;;  %v1945_v26 = vmul.f32 1.442695, %v1936_v53  ;;  %v1969_v23 = vmul.f32 1.442695, %v1960_v18 }
 0x36b   : > { %v1983_v29 = vadd.f32 %v3831_v47, %v3829_v55  ;;  %v1897_v30 = vmax.f32 %v1777_v58, %v1833_v45  ;;  %v3835_v57 = vpop.eup %3136 }
 0x36c   : > { %3138 = vpow2.f32 %v1921_v22  ;;  %v1709_v3 = vpop.xlane.xlu0 %1708  ;;  %v1805_v59 = vpop.xlane.xlu2 %1804 }
 0x36d   : > { %v3838_v6 = vadd.f32 %v3835_v57, %v1983_v29  ;;  %3140 = vpow2.f32 %v1945_v26  ;;  %v1905_v9 = vmax.f32 %v1897_v30, %v1889_v41  ;;  %v1761_v15 = vadd.f32 %v3797_v40, %v1709_v3 }
 0x36e   : > { %3142 = vpow2.f32 %v1969_v23  ;;  %v1818_v1 = vadd.f32 %v3807_v42, %v1709_v3  ;;  %v1874_v10 = vadd.f32 %v1858_v8, %v1709_v3 }
 0x36f   : > { %3144 = vrcp.f32 %v3838_v6  ;;  %v1913_v7 = vsub.f32 %v1777_v58, %v1905_v9  ;;  %v1937_v34 = vsub.f32 %v1833_v45, %v1905_v9  ;;  %v1961_v61 = vsub.f32 %v1889_v41, %v1905_v9  ;;  %v3086_v41 = vld [vmem:[%s4300_s16] sm:$0xff] }
 0x370   : > { %v1770_v36 = vadd.f32 %v3799_v35, %v1761_v15  ;;  %v1826_v12 = vadd.f32 %v1818_v1, %v3799_v35  ;;  %v1882_v39 = vadd.f32 %v1874_v10, %v3799_v35  ;;  %3023 = vmatmul.msk.bf16.gmra.mxu2 %vm2464_vm11, %v2456_v49  ;;  %v2008_v3 = vand.u32 2147483647, %v3838_v6  ;;  %2218 = vmatpush.bf16.msra.mxu3 %v3086_v41 }
 0x371   : > { %v1923_v40 = vmul.f32 1.442695, %v1913_v7  ;;  %v1947_v43 = vmul.f32 1.442695, %v1937_v34  ;;  %v1971_v8 = vmul.f32 1.442695, %v1961_v61  ;;  %vm2004_vm12 = vweird.f32 %v3838_v6 }
 0x372   : > { %v3848_v20 = vpop.eup %3138  ;;  %v1778_v17 = vmax.f32 %v1770_v36, 0.0  ;;  %v1834_v28 = vmax.f32 %v1826_v12, 0.0  ;;  %v1890_v22 = vmax.f32 %v1882_v39, 0.0  ;;  %v2010_v7 = vand.u32 2147483648, %v3838_v6 }
 0x373   : > { %v3850_v42 = vpop.eup %3140  ;;  %3146 = vpow2.f32 %v1923_v40  ;;  %vm3875_vm14 = vcmp.eq.f32.partialorder %v2008_v3, 8.507059e+37 }
 0x374   : > { %v3852_v0 = vpop.eup %3142  ;;  %v1984_v53 = vadd.f32 %v3850_v42, %v3848_v20  ;;  %v1712_v18 = vpop.xlane.xlu1 %1711  ;;  %3148 = vpow2.f32 %v1947_v43  ;;  %v1898_v26 = vmax.f32 %v1778_v17, %v1834_v28 }
 0x375   : > { %v1748_v58 = vpop.xlane.xlu0 %1747  ;;  %v3145_v45 = vpop.eup %3144  ;;  %v1819_v23 = vadd.f32 %v1805_v59, %v1712_v18  ;;  %v1875_v15 = vadd.f32 %v1861_v33, %v1712_v18  ;;  %3150 = vpow2.f32 %v1971_v8 }
 0x376   : > { %v3856_v29 = vpop.xlane.xlu2 %1863  ;;  %v2000_v30 = vmul.f32 %v3145_v45, %v3838_v6  ;;  %v3865_v9 = vadd.f32 %v3852_v0, %v1984_v53  ;;  %v1906_v1 = vmax.f32 %v1898_v26, %v1890_v22  ;;  %v1762_v10 = vadd.f32 %v1748_v58, %v1712_v18 }
 0x377   : > { %v3871_v12 = vadd.f32 %v1819_v23, %v3799_v35  ;;  %vm2005_vm13 = vweird.f32 %v3145_v45  ;;  %v3880_v24 = vadd.f32 %v1875_v15, %v3799_v35  ;;  %v2011_v53 = vor.u32 1.1754944e-38, %v2010_v7 }
 0x378   : > { %v2001_v59 = vsub.f32 1.0, %v2000_v30  ;;  %3152 = vrcp.f32 %v3865_v9  ;;  %v1914_v34 = vsub.f32 %v1778_v17, %v1906_v1  ;;  %v1938_v61 = vsub.f32 %v1834_v28, %v1906_v1  ;;  %vm2006_vm15 = vmor %vm2004_vm12, %vm2005_vm13 }
 0x379   : > { %v1962_v36 = vsub.f32 %v1890_v22, %v1906_v1  ;;  %v3873_v39 = vpop.eup %3146  ;;  %v2022_v43 = vand.u32 2147483647, %v3865_v9  ;;  %v1771_v17 = vadd.f32 %v3799_v35, %v1762_v10  ;;  %vm2018_vm1 = vweird.f32 %v3865_v9 }
 0x37a   : > { %v2002_v33 = vmul.f32 %v3145_v45, %v2001_v59  ;;  %v3882_v40 = vpop.eup %3148  ;;  %v1925_v49 = vmul.f32 1.442695, %v1914_v34  ;;  %v1949_v8 = vmul.f32 1.442695, %v1938_v61  ;;  %v2024_v23 = vand.u32 2147483648, %v3865_v9 }
 0x37b   : > { %v1985_v18 = vadd.f32 %v3882_v40, %v3873_v39  ;;  %v1973_v58 = vmul.f32 1.442695, %v1962_v36  ;;  %v3888_v26 = vpop.eup %3150  ;;  %v1835_v41 = vmax.f32 %v3871_v12, 0.0  ;;  %v1779_v30 = vmax.f32 %v1771_v17, 0.0 }
 0x37c   : > { %v2003_v28 = vadd.f32 %v3145_v45, %v2002_v33  ;;  %3154 = vpow2.f32 %v1925_v49  ;;  %vm3902_vm2 = vcmp.eq.f32.partialorder %v2022_v43, 8.507059e+37  ;;  %v2451_v43 = vld [vmem:[%s3814_s27 + $0x20] sm:$0xff]  ;;  %v2025_v17 = vor.u32 1.1754944e-38, %v2024_v23 }
 0x37d   : > { %v1808_v22 = vpop.xlane.xlu0 %1807  ;;  %v3896_v10 = vadd.f32 %v3888_v26, %v1985_v18  ;;  %3156 = vpow2.f32 %v1949_v8  ;;  %v1899_v33 = vmax.f32 %v1779_v30, %v1835_v41  ;;  %v2452_v8 = vld [vmem:[%s3814_s27 + $0x28] sm:$0xff] }
 0x37e   : > { %v1715_v3 = vpop.xlane.xlu2 %1714  ;;  %v3153_v15 = vpop.eup %3152  ;;  %v2007_v1 = vsel %vm2006_vm15, %v3145_v45, %v2003_v28  ;;  %3158 = vpow2.f32 %v1973_v58  ;;  %v1891_v45 = vmax.f32 %v3880_v24, 0.0 }
 0x37f   : > { %v1763_v6 = vadd.f32 %v3823_v31, %v1715_v3  ;;  %v2012_v59 = vsel %vm3875_vm14, %v2011_v53, %v2007_v1  ;;  %v2014_v7 = vmul.f32 %v3153_v15, %v3865_v9  ;;  %3160 = vrcp.f32 %v3896_v10  ;;  %v1811_v1 = vpop.xlane.xlu1 %1810 }
 0x380   : > { %v2111_v61 = vmul.f32 %v3829_v55, %v2012_v59  ;;  %v2127_v36 = vmul.f32 %v3831_v47, %v2012_v59  ;;  %v2151_v12 = vmul.f32 %v3835_v57, %v2012_v59  ;;  %v1820_v49 = vadd.f32 %v1808_v22, %v1715_v3 }
 0x381   : > { %v2015_v31 = vsub.f32 1.0, %v2014_v7  ;;  %v1772_v38 = vadd.f32 %v3799_v35, %v1763_v6  ;;  %v1876_v28 = vadd.f32 %v3856_v29, %v1715_v3  ;;  %vm2019_vm3 = vweird.f32 %v3153_v15 }
 0x382   : > { %v2119_v24 = vmul.f32 %v2111_v61, %v3493_v62  ;;  %v2135_v55 = vmul.f32 %v2127_v36, %v3543_v25  ;;  %v3917_v53 = vpop.eup %3154  ;;  %v1907_v57 = vmax.f32 %v1899_v33, %v1891_v45  ;;  %v1828_v18 = vadd.f32 %v1820_v49, %v3799_v35  ;;  %vm2020_vm4 = vmor %vm2018_vm1, %vm2019_vm3 }
 0x383   : > { %v2016_v47 = vmul.f32 %v3153_v15, %v2015_v31  ;;  %v3920_v58 = vpop.eup %3156  ;;  %v1780_v22 = vmax.f32 %v1772_v38, 0.0  ;;  %v1884_v6 = vadd.f32 %v1876_v28, %v3799_v35  ;;  %v2159_v29 = vmul.f32 %v2151_v12, %v3501_v2 }
 0x384   : > { %v2457_v3 = vpack.c.bf16 %v2452_v8, %v2451_v43  ;;  %v3924_v62 = vpop.eup %3158  ;;  %v1986_v59 = vadd.f32 %v3920_v58, %v3917_v53  ;;  %v1915_v7 = vsub.f32 %v1779_v30, %v1907_v57  ;;  %v1939_v61 = vsub.f32 %v1835_v41, %v1907_v57 }
 0x385   : > { %v1757_v23 = vpop.xlane.xlu0 %1756  ;;  %v2017_v25 = vadd.f32 %v3153_v15, %v2016_v47  ;;  %v3928_v31 = vpop.eup %3160  ;;  %v1963_v33 = vsub.f32 %v1891_v45, %v1907_v57  ;;  %v1836_v38 = vmax.f32 %v1828_v18, 0.0  ;;  %v1892_v49 = vmax.f32 %v1884_v6, 0.0 }
 0x386   : > { %v1754_v36 = vpop.xlane.xlu2 %1753  ;;  %v2143_v2 = vadd.f32 %v2135_v55, %v2119_v24  ;;  %3024 = vmatmul.msk.bf16.gmra.mxu2 %vm2464_vm11, %v2457_v3  ;;  %v3935_v43 = vadd.f32 %v3924_v62, %v1986_v59  ;;  %v1927_v8 = vmul.f32 1.442695, %v1915_v7  ;;  %v1951_v30 = vmul.f32 1.442695, %v1939_v61 }
 0x387   : > { %v2021_v12 = vsel %vm2020_vm4, %v3153_v15, %v2017_v25  ;;  %v1975_v28 = vmul.f32 1.442695, %v1963_v33  ;;  %v1900_v47 = vmax.f32 %v1780_v22, %v1836_v38  ;;  %v2028_v9 = vmul.f32 %v3928_v31, %v3896_v10 }
 0x388   : > { %v2026_v41 = vsel %vm3902_vm2, %v2025_v17, %v2021_v12  ;;  %3162 = vrcp.f32 %v3935_v43  ;;  %v3945_v57 = vadd.f32 %v2159_v29, %v2143_v2  ;;  %vm2033_vm5 = vweird.f32 %v3928_v31 }
 0x389   : > { %v2112_v45 = vmul.f32 %v3848_v20, %v2026_v41  ;;  %v2128_v24 = vmul.f32 %v3850_v42, %v2026_v41  ;;  %v2152_v55 = vmul.f32 %v3852_v0, %v2026_v41  ;;  %3164 = vpow2.f32 %v1927_v8 }
 0x38a   : > { %v1908_v15 = vmax.f32 %v1900_v47, %v1892_v49  ;;  %v2029_v18 = vsub.f32 1.0, %v2028_v9  ;;  %3166 = vpow2.f32 %v1951_v30  ;;  %v2036_v47 = vand.u32 2147483647, %v3896_v10 }
 0x38b   : > { %v2120_v34 = vmul.f32 %v2112_v45, %v3508_v5  ;;  %v2136_v17 = vmul.f32 %v2128_v24, %v3547_v27  ;;  %v2160_v6 = vmul.f32 %v2152_v55, %v3519_v11  ;;  %3168 = vpow2.f32 %v1975_v28 }
 0x38c   : > { %v1916_v20 = vsub.f32 %v1780_v22, %v1908_v15  ;;  %v1940_v3 = vsub.f32 %v1836_v38, %v1908_v15  ;;  %v1964_v42 = vsub.f32 %v1892_v49, %v1908_v15  ;;  %v1721_v25 = vpop.xlane.xlu1 %1720  ;;  %v2030_v38 = vmul.f32 %v3928_v31, %v2029_v18 }
 0x38d   : > { %v1718_v0 = vpop.xlane.xlu0 %1717  ;;  %v1765_v59 = vadd.f32 %v1757_v23, %v1721_v25  ;;  %v2144_v29 = vadd.f32 %v2136_v17, %v2120_v34  ;;  %vm2032_vm6 = vweird.f32 %v3896_v10  ;;  %v2038_v34 = vand.u32 2147483648, %v3896_v10 }
 0x38e   : > { %v1764_v7 = vadd.f32 %v1754_v36, %v1718_v0  ;;  %v1821_v61 = vadd.f32 %v1811_v1, %v1718_v0  ;;  %v1814_v33 = vpop.xlane.xlu2 %1813  ;;  %v1929_v2 = vmul.f32 1.442695, %v1916_v20  ;;  %v1953_v12 = vmul.f32 1.442695, %v1940_v3  ;;  %v3950_v5 = vpop.eup %3162  ;;  %vm2034_vm7 = vmor %vm2032_vm6, %vm2033_vm5 }
 0x38f   : > { %v1977_v8 = vmul.f32 1.442695, %v1964_v42  ;;  %v1822_v30 = vadd.f32 %v1814_v33, %v1721_v25  ;;  %v3953_v27 = vadd.f32 %v3799_v35, %v1765_v59  ;;  %v3961_v23 = vadd.f32 %v2160_v6, %v2144_v29  ;;  %v3963_v1 = vpop.eup %3164 }
 0x390   : > { %v3956_v11 = vadd.f32 %v3799_v35, %v1764_v7  ;;  %v3959_v22 = vadd.f32 %v1821_v61, %v3799_v35  ;;  %3170 = vpow2.f32 %v1929_v2  ;;  %v3970_v49 = vpop.eup %3166  ;;  %v2031_v18 = vadd.f32 %v3928_v31, %v2030_v38  ;;  %v2454_v38 = vld [vmem:[%s3814_s27 + $0x38] sm:$0xff] }
 0x391   : > { %v3966_v36 = vadd.f32 %v1822_v30, %v3799_v35  ;;  %3172 = vpow2.f32 %v1953_v12  ;;  %v3975_v9 = vpop.eup %3168  ;;  %v1987_v45 = vadd.f32 %v3970_v49, %v3963_v1  ;;  %v1782_v24 = vmax.f32 %v3953_v27, 0.0 }
 0x392   : > { %v1781_v41 = vmax.f32 %v3956_v11, 0.0  ;;  %v1837_v28 = vmax.f32 %v3959_v22, 0.0  ;;  %v2175_v15 = vpack.c.bf16 %v3961_v23, %v3945_v57  ;;  %3174 = vpow2.f32 %v1977_v8 }
 0x393   : > { %v1838_v55 = vmax.f32 %v3966_v36, 0.0  ;;  %v3987_v17 = vadd.f32 %v3975_v9, %v1987_v45  ;;  %v2042_v42 = vmul.f32 %v3950_v5, %v3935_v43  ;;  %v2035_v61 = vsel %vm2034_vm7, %v3928_v31, %v2031_v18  ;;  %v2453_v36 = vld [vmem:[%s3814_s27 + $0x30] sm:$0xff] }
 0x394   : > { %2994 = vmatmul.msk.bf16.vlgmr.msra.gmra.mxu3 %vm1278_vm0, %v2175_v15  ;;  %v1870_v6 = vpop.xlane.xlu1 %1869  ;;  %v1901_v3 = vmax.f32 %v1781_v41, %v1837_v28  ;;  %v2039_v10 = vor.u32 1.1754944e-38, %v2038_v34  ;;  %vm2037_vm8 = vcmp.eq.f32.partialorder %v2036_v47, 8.507059e+37  ;;  %v2050_v12 = vand.u32 2147483647, %v3935_v43 }
 0x395   : > { %v1867_v20 = vpop.xlane.xlu0 %1866  ;;  %v1878_v59 = vadd.f32 %v1870_v6, %v1721_v25  ;;  %v1902_v29 = vmax.f32 %v1782_v24, %v1838_v55  ;;  %v2043_v2 = vsub.f32 1.0, %v2042_v42  ;;  %vm2047_vm9 = vweird.f32 %v3950_v5 }
 0x396   : > { %v1877_v7 = vadd.f32 %v1867_v20, %v1718_v0  ;;  %v3995_v33 = vpop.eup %3170  ;;  %v2040_v25 = vsel %vm2037_vm8, %v2039_v10, %v2035_v61  ;;  %v2052_v0 = vand.u32 2147483648, %v3935_v43  ;;  %3176 = vrcp.f32 %v3987_v17 }
 0x397   : > { %v3998_v8 = vpop.eup %3172  ;;  %v1886_v30 = vadd.f32 %v1878_v59, %v3799_v35  ;;  %v2044_v11 = vmul.f32 %v3950_v5, %v2043_v2  ;;  %v2113_v22 = vmul.f32 %v3873_v39, %v2040_v25  ;;  %v2129_v15 = vmul.f32 %v3882_v40, %v2040_v25 }
 0x398   : > { %v1885_v27 = vadd.f32 %v1877_v7, %v3799_v35  ;;  %v1988_v31 = vadd.f32 %v3998_v8, %v3995_v33  ;;  %v4010_v47 = vpop.eup %3174  ;;  %vm2046_vm10 = vweird.f32 %v3935_v43  ;;  %vm4019_vm12 = vcmp.eq.f32.partialorder %v2050_v12, 8.507059e+37 }
 0x399   : > { %v1894_v45 = vmax.f32 %v1886_v30, 0.0  ;;  %v2045_v34 = vadd.f32 %v3950_v5, %v2044_v11  ;;  %vm2048_vm13 = vmor %vm2046_vm10, %vm2047_vm9  ;;  %v2053_v42 = vor.u32 1.1754944e-38, %v2052_v0  ;;  %v2458_v59 = vpack.c.bf16 %v2454_v38, %v2453_v36 }
 0x39a   : > { %v1893_v35 = vmax.f32 %v1885_v27, 0.0  ;;  %v4015_v18 = vadd.f32 %v4010_v47, %v1988_v31  ;;  %v2121_v7 = vmul.f32 %v2113_v22, %v3525_v14  ;;  %v2137_v61 = vmul.f32 %v2129_v15, %v3558_v32 }
 0x39b   : > { %v1910_v39 = vmax.f32 %v1902_v29, %v1894_v45  ;;  %v2049_v40 = vsel %vm2048_vm13, %v3950_v5, %v2045_v34  ;;  %3025 = vmatmul.msk.bf16.gmra.mxu2 %vm2464_vm11, %v2458_v59  ;;  %v2153_v27 = vmul.f32 %v3888_v26, %v2040_v25  ;;  %v2064_v6 = vand.u32 2147483647, %v3987_v17 }
 0x39c   : > { %v1909_v20 = vmax.f32 %v1901_v3, %v1893_v35  ;;  %3178 = vrcp.f32 %v4015_v18  ;;  %v2054_v30 = vsel %vm4019_vm12, %v2053_v42, %v2049_v40  ;;  %v3177_v0 = vpop.eup %3176  ;;  %vm2060_vm15 = vweird.f32 %v3987_v17 }
 0x39d   : > { %v1918_v43 = vsub.f32 %v1782_v24, %v1910_v39  ;;  %v1942_v10 = vsub.f32 %v1838_v55, %v1910_v39  ;;  %v1966_v2 = vsub.f32 %v1894_v45, %v1910_v39  ;;  %v2114_v14 = vmul.f32 %v3917_v53, %v2054_v30 }
 0x39e   : > { %v1917_v12 = vsub.f32 %v1781_v41, %v1909_v20  ;;  %v1941_v3 = vsub.f32 %v1837_v28, %v1909_v20  ;;  %v1965_v29 = vsub.f32 %v1893_v35, %v1909_v20  ;;  %v2130_v24 = vmul.f32 %v3920_v58, %v2054_v30 }
 0x39f   : > { %v1933_v31 = vmul.f32 1.442695, %v1918_v43  ;;  %v1957_v5 = vmul.f32 1.442695, %v1942_v10  ;;  %v1981_v11 = vmul.f32 1.442695, %v1966_v2  ;;  %v2145_v55 = vadd.f32 %v2137_v61, %v2121_v7 }
 0x3a0   : > { %v1931_v32 = vmul.f32 1.442695, %v1917_v12  ;;  %v1955_v41 = vmul.f32 1.442695, %v1941_v3  ;;  %v2122_v28 = vmul.f32 %v2114_v14, %v3537_v21  ;;  %v2154_v22 = vmul.f32 %v3924_v62, %v2054_v30 }
 0x3a1   : > { %3180 = vpow2.f32 %v1933_v31  ;;  %v2138_v26 = vmul.f32 %v2130_v24, %v3567_v37  ;;  %v2056_v25 = vmul.f32 %v3177_v0, %v3987_v17  ;;  %v1979_v38 = vmul.f32 1.442695, %v1965_v29  ;;  %v3093_v31 = vld [vmem:[%s4307_s23 + $0x8] sm:$0xff] }
 0x3a2   : > { %v3179_v36 = vpop.eup %3178  ;;  %3182 = vpow2.f32 %v1957_v5  ;;  %v2161_v53 = vmul.f32 %v2153_v27, %v3528_v16  ;;  %v2162_v45 = vmul.f32 %v2154_v22, %v3591_v48  ;;  %vm2061_vm14 = vweird.f32 %v3177_v0  ;;  %2577 = vmatpush.bf16.msrb.mxu3 %v3093_v31 }
 0x3a3   : > { %3184 = vpow2.f32 %v1981_v11  ;;  %v2146_v58 = vadd.f32 %v2138_v26, %v2122_v28  ;;  %v2057_v35 = vsub.f32 1.0, %v2056_v25  ;;  %v2070_v15 = vmul.f32 %v3179_v36, %v4015_v18  ;;  %vm2062_vm2 = vmor %vm2060_vm15, %vm2061_vm14 }
 0x3a4   : > { %3186 = vpow2.f32 %v1931_v32  ;;  %v4042_v21 = vadd.f32 %v2161_v53, %v2145_v55  ;;  %v2066_v62 = vand.u32 2147483648, %v3987_v17  ;;  %v2078_v48 = vand.u32 2147483647, %v4015_v18 }
 0x3a5   : > { %3188 = vpow2.f32 %v1955_v41  ;;  %v4045_v37 = vadd.f32 %v2162_v45, %v2146_v58  ;;  %v2058_v34 = vmul.f32 %v3177_v0, %v2057_v35  ;;  %v2071_v39 = vsub.f32 1.0, %v2070_v15 }
 0x3a6   : > { %3190 = vpow2.f32 %v1979_v38  ;;  %v2080_v20 = vand.u32 2147483648, %v4015_v18  ;;  %vm2075_vm1 = vweird.f32 %v3179_v36  ;;  %v2067_v17 = vor.u32 1.1754944e-38, %v2066_v62 }
 0x3a7   : > { %v4048_v16 = vpop.eup %3180  ;;  %v2176_v59 = vpack.c.bf16 %v4045_v37, %v4042_v21  ;;  %v2059_v40 = vadd.f32 %v3177_v0, %v2058_v34  ;;  %v2072_v7 = vmul.f32 %v3179_v36, %v2071_v39  ;;  %vm2065_vm3 = vcmp.eq.f32.partialorder %v2064_v6, 8.507059e+37 }
 0x3a8   : > { %v4053_v42 = vpop.eup %3182  ;;  %vm2074_vm4 = vweird.f32 %v4015_v18  ;;  %vm2079_vm6 = vcmp.eq.f32.partialorder %v2078_v48, 8.507059e+37  ;;  %v2081_v27 = vor.u32 1.1754944e-38, %v2080_v20 }
 0x3a9   : > { %v4057_v61 = vpop.eup %3184  ;;  %v1990_v43 = vadd.f32 %v4053_v42, %v4048_v16  ;;  %2995 = vmatmul.msk.bf16.gmra.mxu3 %vm1278_vm0, %v2176_v59  ;;  %v2063_v2 = vsel %vm2062_vm2, %v3177_v0, %v2059_v40  ;;  %v2073_v12 = vadd.f32 %v3179_v36, %v2072_v7  ;;  %vm2076_vm5 = vmor %vm2074_vm4, %vm2075_vm1  ;;  %v3089_v0 = vld [vmem:[%s4302_s18 + $0x8] sm:$0xff] }
 0x3aa   : > { %v4062_v10 = vpop.eup %3186  ;;  %v2068_v30 = vsel %vm2065_vm3, %v2067_v17, %v2063_v2  ;;  %2335 = vmatpush.bf16.msra.mxu0 %v3089_v0 }
 0x3ab   : > { %v4066_v3 = vpop.eup %3188  ;;  %v1998_v29 = vadd.f32 %v4057_v61, %v1990_v43  ;;  %v2077_v18 = vsel %vm2076_vm5, %v3179_v36, %v2073_v12  ;;  %v2115_v11 = vmul.f32 %v3963_v1, %v2068_v30  ;;  %v2131_v14 = vmul.f32 %v3970_v49, %v2068_v30 }
 0x3ac   : > { %v1989_v5 = vadd.f32 %v4066_v3, %v4062_v10  ;;  %v3191_v32 = vpop.eup %3190  ;;  %v2082_v24 = vsel %vm2079_vm6, %v2081_v27, %v2077_v18  ;;  %v2155_v55 = vmul.f32 %v3975_v9, %v2068_v30 }
 0x3ad   : > { %3192 = vrcp.f32 %v1998_v29  ;;  %v2116_v28 = vmul.f32 %v3995_v33, %v2082_v24  ;;  %v2123_v22 = vmul.f32 %v2115_v11, %v3486_v60  ;;  %v2132_v26 = vmul.f32 %v3998_v8, %v2082_v24 }
 0x3ae   : > { %v1997_v41 = vadd.f32 %v3191_v32, %v1989_v5  ;;  %v2139_v36 = vmul.f32 %v2131_v14, %v3582_v44  ;;  %v2156_v1 = vmul.f32 %v4010_v47, %v2082_v24  ;;  %v2163_v53 = vmul.f32 %v2155_v55, %v3598_v51 }
 0x3af   : > { %v2124_v49 = vmul.f32 %v2116_v28, %v3506_v4  ;;  %v2140_v25 = vmul.f32 %v2132_v26, %v3586_v46  ;;  %v2108_v15 = vand.u32 2147483648, %v1998_v29  ;;  %v2106_v62 = vand.u32 2147483647, %v1998_v29 }
 0x3b0   : > { %3194 = vrcp.f32 %v1997_v41  ;;  %v2147_v38 = vadd.f32 %v2139_v36, %v2123_v22  ;;  %v2164_v45 = vmul.f32 %v2156_v1, %v3605_v54  ;;  %v2094_v51 = vand.u32 2147483648, %v1997_v41 }
 0x3b1   : > { %v2148_v9 = vadd.f32 %v2140_v25, %v2124_v49  ;;  %vm2102_vm8 = vweird.f32 %v1998_v29  ;;  %v2092_v39 = vand.u32 2147483647, %v1997_v41  ;;  %v2109_v48 = vor.u32 1.1754944e-38, %v2108_v15 }
 0x3b2   : > { %v4089_v58 = vadd.f32 %v2163_v53, %v2147_v38  ;;  %vm2107_vm12 = vcmp.eq.f32.partialorder %v2106_v62, 8.507059e+37  ;;  %vm2088_vm13 = vweird.f32 %v1997_v41  ;;  %v2095_v7 = vor.u32 1.1754944e-38, %v2094_v51 }
 0x3b3   : > { %v3193_v33 = vpop.eup %3192  ;;  %v4091_v60 = vadd.f32 %v2164_v45, %v2148_v9  ;;  %vm2093_vm15 = vcmp.eq.f32.partialorder %v2092_v39, 8.507059e+37 }
 0x3b4   : > { %v2098_v8 = vmul.f32 %v3193_v33, %v1998_v29  ;;  %vm2103_vm7 = vweird.f32 %v3193_v33 }
 0x3b5   : > { %v2177_v47 = vpack.c.bf16 %v4091_v60, %v4089_v58  ;;  %vm2104_vm10 = vmor %vm2102_vm8, %vm2103_vm7 }
 0x3b6   : > { %v3195_v44 = vpop.eup %3194  ;;  %v2099_v35 = vsub.f32 1.0, %v2098_v8 }
 0x3b7   : > { %v2084_v4 = vmul.f32 %v3195_v44, %v1997_v41  ;;  %vm2089_vm9 = vweird.f32 %v3195_v44 }
 0x3b8   : > { %v2100_v46 = vmul.f32 %v3193_v33, %v2099_v35  ;;  %vm2090_vm14 = vmor %vm2088_vm13, %vm2089_vm9 }
 0x3b9   : > { %v2085_v34 = vsub.f32 1.0, %v2084_v4  ;;  %2996 = vmatmul.msk.bf16.gmra.mxu3 %vm1278_vm0, %v2177_v47 }
 0x3ba   : > { %v2101_v54 = vadd.f32 %v3193_v33, %v2100_v46  ;;  %v4143_v46 = vld [vmem:[%s4301_s17] ss:$0 sm:$0xff] }
 0x3bb   : > { %v2086_v6 = vmul.f32 %v3195_v44, %v2085_v34 }
 0x3bc   : > { %v2105_v20 = vsel %vm2104_vm10, %v3193_v33, %v2101_v54 }
 0x3bd   : > { %v2087_v59 = vadd.f32 %v3195_v44, %v2086_v6  ;;  %v2110_v40 = vsel %vm2107_vm12, %v2109_v48, %v2105_v20  ;;  %v4149_v20 = vstv %s2827_s0 }
 0x3be   : > { %v2118_v43 = vmul.f32 %v4048_v16, %v2110_v40  ;;  %v2134_v17 = vmul.f32 %v4053_v42, %v2110_v40  ;;  %v2158_v12 = vmul.f32 %v4057_v61, %v2110_v40 }
 0x3bf   : > { %v2091_v2 = vsel %vm2090_vm14, %v3195_v44, %v2087_v59 }
 0x3c0   : > { %v2096_v29 = vsel %vm2093_vm15, %v2095_v7, %v2091_v2  ;;  %v2126_v30 = vmul.f32 %v2118_v43, %v3534_v19  ;;  %v2142_v27 = vmul.f32 %v2134_v17, %v3600_v52  ;;  %v2166_v42 = vmul.f32 %v2158_v12, %v3618_v63 }
 0x3c1   : > { %v2117_v31 = vmul.f32 %v4062_v10, %v2096_v29  ;;  %v2133_v0 = vmul.f32 %v4066_v3, %v2096_v29  ;;  %v2157_v5 = vmul.f32 %v3191_v32, %v2096_v29  ;;  %v4126_v3 = vstv %s2828_s12  ;;  %s4263_s12 = scalar_lea.vmem %s4312_s28, %s3416_s29 }
 0x3c2   : > { %v2150_v18 = vadd.f32 %v2142_v27, %v2126_v30 }
 0x3c3   : > { %v2125_v11 = vmul.f32 %v2117_v31, %v3523_v13  ;;  %v2141_v16 = vmul.f32 %v2133_v0, %v3595_v50  ;;  %v2165_v61 = vmul.f32 %v2157_v5, %v3610_v56  ;;  %v3092_v13 = vld [vmem:[%s4307_s23] sm:$0xff] }
 0x3c4   : > { %v4107_v24 = vadd.f32 %v2166_v42, %v2150_v18  ;;  %2578 = vmatpush.bf16.msrb.mxu3 %v3092_v13  ;;  %v3088_v50 = vld [vmem:[%s4302_s18] sm:$0xff] }
 0x3c5   : > { %v2149_v14 = vadd.f32 %v2141_v16, %v2125_v11  ;;  %2336 = vmatpush.bf16.msra.mxu0 %v3088_v50  ;;  %v4123_v56 = vld [vmem:[%s4306_s22] ss:$0 sm:$0xff] }
 0x3c7   : > { %v4109_v19 = vadd.f32 %v2165_v61, %v2149_v14 }
 0x3c9   : > { %v2178_v52 = vpack.c.bf16 %v4107_v24, %v4109_v19 }
 0x3cb   : > { %2997 = vmatmul.msk.bf16.gmra.mxu3 %vm1278_vm0, %v2178_v52 }
 0x3e3   : > { %v2490_v63 = vpop.f32.mrf.mxu2 }
 0x3e4   : > { %v2491_v10 = vadd.f32 %v4123_v56, %v2490_v63 }
 0x3e6   : > { %v2519_v32 = vmul.f32 %v4126_v3, %v2491_v10  ;;  %vm2510_vm1 = vcmp.ge.f32.partialorder %v2491_v10, 0.0 }
 0x3e8   : > { %v2527_v28 = vsel %vm2510_vm1, %v2491_v10, %v2519_v32 }
 0x3eb   : > { %v2492_v55 = vpop.f32.mrf.mxu2 }
 0x3ec   : > { %v2493_v41 = vadd.f32 %v4123_v56, %v2492_v55 }
 0x3ee   : > { %vm2511_vm2 = vcmp.ge.f32.partialorder %v2493_v41, 0.0  ;;  %v2520_v22 = vmul.f32 %v4126_v3, %v2493_v41 }
 0x3f0   : > { %v2528_v26 = vsel %vm2511_vm2, %v2493_v41, %v2520_v22 }
 0x3f1   : > { %v2535_v36 = vpack.c.bf16 %v2528_v26, %v2527_v28 }
 0x3f3   : > { %v2495_v1 = vpop.f32.mrf.mxu2  ;;  %3034 = vmatmul.msk.bf16.vlgmr.msrb.gmra.mxu3 %vm1278_vm0, %v2535_v36 }
 0x3f4   : > { %v2496_v49 = vadd.f32 %v4123_v56, %v2495_v1 }
 0x3f6   : > { %v2521_v25 = vmul.f32 %v4126_v3, %v2496_v49  ;;  %vm2512_vm3 = vcmp.ge.f32.partialorder %v2496_v49, 0.0 }
 0x3f8   : > { %v2529_v53 = vsel %vm2512_vm3, %v2496_v49, %v2521_v25 }
 0x3fb   : > { %v2497_v38 = vpop.f32.mrf.mxu2 }
 0x3fc   : > { %v2498_v9 = vadd.f32 %v4123_v56, %v2497_v38 }
 0x3fe   : > { %vm2513_vm4 = vcmp.ge.f32.partialorder %v2498_v9, 0.0  ;;  %v2522_v45 = vmul.f32 %v4126_v3, %v2498_v9 }
 0x400   : > { %v2530_v33 = vsel %vm2513_vm4, %v2498_v9, %v2522_v45 }
 0x401   : > { %v2536_v8 = vpack.c.bf16 %v2530_v33, %v2529_v53 }
 0x403   : > { %3035 = vmatmul.msk.bf16.gmra.mxu3 %vm1278_vm0, %v2536_v8  ;;  %v3091_v8 = vld [vmem:[%s4303_s19 + $0x8] sm:$0xff] }
 0x404   : > { %2424 = vmatpush.bf16.msrb.mxu1 %v3091_v8 }
 0x409   : > { %v2500_v44 = vpop.f32.mrf.mxu2 }
 0x40a   : > { %v2501_v47 = vadd.f32 %v4123_v56, %v2500_v44  ;;  %v3095_v44 = vld [vmem:[%s4309_s25 + $0x8] sm:$0xff] }
 0x40b   : > { %2666 = vmatpush.bf16.msrb.mxu0 %v3095_v44 }
 0x40c   : > { %v2523_v35 = vmul.f32 %v4126_v3, %v2501_v47  ;;  %vm2514_vm5 = vcmp.ge.f32.partialorder %v2501_v47, 0.0 }
 0x40e   : > { %v2531_v62 = vsel %vm2514_vm5, %v2501_v47, %v2523_v35 }
 0x411   : > { %v2502_v4 = vpop.f32.mrf.mxu2 }
 0x412   : > { %v2503_v15 = vadd.f32 %v4123_v56, %v2502_v4 }
 0x414   : > { %vm2515_vm6 = vcmp.ge.f32.partialorder %v2503_v15, 0.0  ;;  %v2524_v34 = vmul.f32 %v4126_v3, %v2503_v15 }
 0x416   : > { %v2532_v54 = vsel %vm2515_vm6, %v2503_v15, %v2524_v34 }
 0x417   : > { %v2220_v51 = vpop.f32.mrf.mxu3  ;;  %v2537_v39 = vpack.c.bf16 %v2532_v54, %v2531_v62 }
 0x418   : > { %v2221_v6 = vadd.f32 %v4143_v46, %v2220_v51 }
 0x419   : > { %3036 = vmatmul.msk.bf16.gmra.mxu3 %vm1278_vm0, %v2537_v39 }
 0x41a   : > { %v2240_v48 = vadd.f32 %v2221_v6, %v3945_v57 }
 0x41c   : > { %v2257_v59 = vmul.f32 %v4149_v20, %v2240_v48  ;;  %vm2248_vm7 = vcmp.ge.f32.partialorder %v2240_v48, 0.0  ;;  %v2281_v27 = vmul.f32 0.5, %v2240_v48 }
 0x41e   : > { %v2505_v43 = vpop.f32.mrf.mxu2  ;;  %v4153_v17 = vsel %vm2248_vm7, %v2240_v48, %v2257_v59 }
 0x41f   : > { %v2222_v40 = vpop.f32.mrf.mxu3  ;;  %v2506_v12 = vadd.f32 %v4123_v56, %v2505_v43  ;;  %v2273_v29 = vmul.f32 0.5, %v4153_v17 }
 0x420   : > { %v2223_v7 = vadd.f32 %v4143_v46, %v2222_v40 }
 0x421   : > { %v2525_v5 = vmul.f32 %v4126_v3, %v2506_v12  ;;  %vm2516_vm9 = vcmp.ge.f32.partialorder %v2506_v12, 0.0  ;;  %v2289_v11 = vadd.f32 %v2281_v27, %v2273_v29 }
 0x422   : > { %v2241_v2 = vadd.f32 %v2223_v7, %v3961_v23 }
 0x423   : > { %v2533_v14 = vsel %vm2516_vm9, %v2506_v12, %v2525_v5 }
 0x424   : > { %vm2249_vm8 = vcmp.ge.f32.partialorder %v2241_v2, 0.0  ;;  %v2258_v57 = vmul.f32 %v4149_v20, %v2241_v2  ;;  %v2282_v0 = vmul.f32 0.5, %v2241_v2 }
 0x426   : > { %v4159_v30 = vsel %vm2249_vm8, %v2241_v2, %v2258_v57  ;;  %v2507_v18 = vpop.f32.mrf.mxu2 }
 0x427   : > { %v2274_v31 = vmul.f32 0.5, %v4159_v30  ;;  %v2508_v23 = vadd.f32 %v4123_v56, %v2507_v18 }
 0x429   : > { %v2290_v16 = vadd.f32 %v2282_v0, %v2274_v31  ;;  %vm2517_vm10 = vcmp.ge.f32.partialorder %v2508_v23, 0.0  ;;  %v2526_v61 = vmul.f32 %v4126_v3, %v2508_v23 }
 0x42b   : > { %v2297_v42 = vpack.c.bf16 %v2290_v16, %v2289_v11  ;;  %v2534_v13 = vsel %vm2517_vm10, %v2508_v23, %v2526_v61 }
 0x42c   : > { %v2225_v52 = vpop.f32.mrf.mxu3  ;;  %v2538_v63 = vpack.c.bf16 %v2534_v13, %v2533_v14 }
 0x42d   : > { %3006 = vmatmul.msk.bf16.vlgmr.msra.gmra.mxu0 %vm1278_vm0, %v2297_v42  ;;  %v2226_v50 = vadd.f32 %v4143_v46, %v2225_v52  ;;  %v3129_v42 = vld [vmem:[%s4308_s24] ss:$0 sm:$0xff] }
 0x42e   : > { %3037 = vmatmul.msk.bf16.gmra.mxu3 %vm1278_vm0, %v2538_v63 }
 0x42f   : > { %v2242_v10 = vadd.f32 %v2226_v50, %v4042_v21 }
 0x431   : > { %v2259_v32 = vmul.f32 %v4149_v20, %v2242_v10  ;;  %vm2250_vm12 = vcmp.ge.f32.partialorder %v2242_v10, 0.0  ;;  %v2283_v49 = vmul.f32 0.5, %v2242_v10 }
 0x433   : > { %v4172_v28 = vsel %vm2250_vm12, %v2242_v10, %v2259_v32 }
 0x434   : > { %v2227_v56 = vpop.f32.mrf.mxu3  ;;  %v2275_v26 = vmul.f32 0.5, %v4172_v28 }
 0x435   : > { %v2228_v55 = vadd.f32 %v4143_v46, %v2227_v56 }
 0x436   : > { %v2291_v9 = vadd.f32 %v2283_v49, %v2275_v26 }
 0x437   : > { %v2243_v41 = vadd.f32 %v2228_v55, %v4045_v37 }
 0x439   : > { %vm2251_vm13 = vcmp.ge.f32.partialorder %v2243_v41, 0.0  ;;  %v2260_v22 = vmul.f32 %v4149_v20, %v2243_v41  ;;  %v2284_v25 = vmul.f32 0.5, %v2243_v41 }
 0x43b   : > { %v4176_v36 = vsel %vm2251_vm13, %v2243_v41, %v2260_v22 }
 0x43c   : > { %v2230_v21 = vpop.f32.mrf.mxu3  ;;  %v2276_v1 = vmul.f32 0.5, %v4176_v36 }
 0x43d   : > { %v2231_v38 = vadd.f32 %v4143_v46, %v2230_v21 }
 0x43e   : > { %v2292_v53 = vadd.f32 %v2284_v25, %v2276_v1 }
 0x43f   : > { %v2244_v37 = vadd.f32 %v2231_v38, %v4089_v58 }
 0x440   : > { %v2298_v45 = vpack.c.bf16 %v2292_v53, %v2291_v9 }
 0x441   : > { %v2261_v33 = vmul.f32 %v4149_v20, %v2244_v37  ;;  %vm2252_vm14 = vcmp.ge.f32.partialorder %v2244_v37, 0.0  ;;  %v2285_v54 = vmul.f32 0.5, %v2244_v37 }
 0x442   : > { %3007 = vmatmul.msk.bf16.gmra.mxu0 %vm1278_vm0, %v2298_v45 }
 0x443   : > { %v4191_v4 = vsel %vm2252_vm14, %v2244_v37, %v2261_v33 }
 0x444   : > { %v2232_v47 = vpop.f32.mrf.mxu3  ;;  %v2277_v62 = vmul.f32 0.5, %v4191_v4 }
 0x445   : > { %v2233_v35 = vadd.f32 %v4143_v46, %v2232_v47 }
 0x446   : > { %v2293_v59 = vadd.f32 %v2285_v54, %v2277_v62 }
 0x447   : > { %v2245_v58 = vadd.f32 %v2233_v35, %v4091_v60 }
 0x449   : > { %vm2253_vm15 = vcmp.ge.f32.partialorder %v2245_v58, 0.0  ;;  %v2262_v15 = vmul.f32 %v4149_v20, %v2245_v58  ;;  %v2286_v6 = vmul.f32 0.5, %v2245_v58 }
 0x44b   : > { %v4195_v34 = vsel %vm2253_vm15, %v2245_v58, %v2262_v15 }
 0x44c   : > { %v2278_v51 = vmul.f32 0.5, %v4195_v34 }
 0x44e   : > { %v2235_v39 = vpop.f32.mrf.mxu3  ;;  %v2294_v40 = vadd.f32 %v2286_v6, %v2278_v51 }
 0x44f   : > { %v2236_v48 = vadd.f32 %v4143_v46, %v2235_v39 }
 0x450   : > { %v2299_v7 = vpack.c.bf16 %v2294_v40, %v2293_v59 }
 0x451   : > { %v2246_v60 = vadd.f32 %v2236_v48, %v4109_v19 }
 0x452   : > { %3008 = vmatmul.msk.bf16.gmra.mxu0 %vm1278_vm0, %v2299_v7 }
 0x453   : > { %v2263_v43 = vmul.f32 %v4149_v20, %v2246_v60  ;;  %vm2254_vm1 = vcmp.ge.f32.partialorder %v2246_v60, 0.0  ;;  %v2287_v5 = vmul.f32 0.5, %v2246_v60 }
 0x455   : > { %v4204_v29 = vsel %vm2254_vm1, %v2246_v60, %v2263_v43 }
 0x456   : > { %v2237_v2 = vpop.f32.mrf.mxu3  ;;  %v2279_v31 = vmul.f32 0.5, %v4204_v29 }
 0x457   : > { %v2238_v12 = vadd.f32 %v4143_v46, %v2237_v2  ;;  %v3094_v46 = vld [vmem:[%s4309_s25] sm:$0xff] }
 0x458   : > { %v2295_v11 = vadd.f32 %v2287_v5, %v2279_v31  ;;  %2667 = vmatpush.bf16.msrb.mxu0 %v3094_v46 }
 0x459   : > { %v2247_v57 = vadd.f32 %v2238_v12, %v4107_v24  ;;  %v3090_v24 = vld [vmem:[%s4303_s19] sm:$0xff] }
 0x45a   : > { %2425 = vmatpush.bf16.msrb.mxu1 %v3090_v24 }
 0x45b   : > { %vm2255_vm2 = vcmp.ge.f32.partialorder %v2247_v57, 0.0  ;;  %v2264_v27 = vmul.f32 %v4149_v20, %v2247_v57  ;;  %v2288_v18 = vmul.f32 0.5, %v2247_v57 }
 0x45d   : > { %v4208_v0 = vsel %vm2255_vm2, %v2247_v57, %v2264_v27 }
 0x45e   : > { %v2280_v19 = vmul.f32 0.5, %v4208_v0 }
 0x460   : > { %v2296_v16 = vadd.f32 %v2288_v18, %v2280_v19 }
 0x462   : > { %v2300_v23 = vpack.c.bf16 %v2296_v16, %v2295_v11 }
 0x464   : > { %3009 = vmatmul.msk.bf16.gmra.mxu0 %vm1278_vm0, %v2300_v23 }
 0x476   : > { %v2580_v14 = vpop.f32.mrf.mxu3 }
 0x477   : > { %v2581_v61 = vadd.f32 %v3129_v42, %v2580_v14 }
 0x479   : > { %v2608_v52 = vmul.f32 %v2581_v61, %v4126_v3  ;;  %vm2600_vm3 = vcmp.ge.f32.partialorder %v2581_v61, 0.0 }
 0x47b   : > { %v2616_v63 = vsel %vm2600_vm3, %v2581_v61, %v2608_v52 }
 0x47e   : > { %v2582_v13 = vpop.f32.mrf.mxu3 }
 0x47f   : > { %v2583_v50 = vadd.f32 %v3129_v42, %v2582_v13 }
 0x481   : > { %vm2601_vm4 = vcmp.ge.f32.partialorder %v2583_v50, 0.0  ;;  %v2609_v10 = vmul.f32 %v2583_v50, %v4126_v3 }
 0x483   : > { %v2617_v32 = vsel %vm2601_vm4, %v2583_v50, %v2609_v10 }
 0x484   : > { %v2624_v56 = vpack.c.bf16 %v2617_v32, %v2616_v63 }
 0x486   : > { %3046 = vmatmul.msk.bf16.vlgmr.msrb.gmra.mxu0 %vm1278_vm0, %v2624_v56  ;;  %v2585_v55 = vpop.f32.mrf.mxu3 }
 0x487   : > { %v2586_v41 = vadd.f32 %v3129_v42, %v2585_v55 }
 0x489   : > { %v2610_v22 = vmul.f32 %v2586_v41, %v4126_v3  ;;  %vm2602_vm5 = vcmp.ge.f32.partialorder %v2586_v41, 0.0 }
 0x48b   : > { %v2618_v49 = vsel %vm2602_vm5, %v2586_v41, %v2610_v22 }
 0x48e   : > { %v2587_v26 = vpop.f32.mrf.mxu3 }
 0x48f   : > { %v2588_v21 = vadd.f32 %v3129_v42, %v2587_v26  ;;  %v3131_v26 = vld [vmem:[%s4304_s20] ss:$0 sm:$0xff] }
 0x491   : > { %vm2603_vm6 = vcmp.ge.f32.partialorder %v2588_v21, 0.0  ;;  %v2611_v1 = vmul.f32 %v2588_v21, %v4126_v3 }
 0x493   : > { %v2619_v25 = vsel %vm2603_vm6, %v2588_v21, %v2611_v1 }
 0x494   : > { %v2625_v38 = vpack.c.bf16 %v2619_v25, %v2618_v49 }
 0x496   : > { %3047 = vmatmul.msk.bf16.gmra.mxu0 %vm1278_vm0, %v2625_v38 }
 0x49c   : > { %v2590_v9 = vpop.f32.mrf.mxu3 }
 0x49d   : > { %v2591_v53 = vadd.f32 %v3129_v42, %v2590_v9 }
 0x49f   : > { %v2612_v37 = vmul.f32 %v2591_v53, %v4126_v3  ;;  %vm2604_vm7 = vcmp.ge.f32.partialorder %v2591_v53, 0.0 }
 0x4a1   : > { %v2620_v8 = vsel %vm2604_vm7, %v2591_v53, %v2612_v37 }
 0x4a4   : > { %v2592_v45 = vpop.f32.mrf.mxu3 }
 0x4a5   : > { %v2593_v33 = vadd.f32 %v3129_v42, %v2592_v45 }
 0x4a7   : > { %vm2605_vm8 = vcmp.ge.f32.partialorder %v2593_v33, 0.0  ;;  %v2613_v44 = vmul.f32 %v2593_v33, %v4126_v3 }
 0x4a9   : > { %v2621_v35 = vsel %vm2605_vm8, %v2593_v33, %v2613_v44 }
 0x4aa   : > { %v2338_v47 = vpop.f32.mrf.mxu0  ;;  %v2626_v58 = vpack.c.bf16 %v2621_v35, %v2620_v8 }
 0x4ab   : > { %v2339_v15 = vadd.f32 %v2338_v47, %v4153_v17 }
 0x4ac   : > { %3048 = vmatmul.msk.bf16.gmra.mxu0 %vm1278_vm0, %v2626_v58 }
 0x4ad   : > { %v2366_v51 = vmul.f32 %v2339_v15, %v4149_v20  ;;  %vm2358_vm9 = vcmp.ge.f32.partialorder %v2339_v15, 0.0 }
 0x4af   : > { %v2374_v59 = vsel %vm2358_vm9, %v2339_v15, %v2366_v51 }
 0x4b1   : > { %v2595_v6 = vpop.f32.mrf.mxu3 }
 0x4b2   : > { %v2340_v62 = vpop.f32.mrf.mxu0  ;;  %v2596_v48 = vadd.f32 %v3129_v42, %v2595_v6 }
 0x4b3   : > { %v2341_v54 = vadd.f32 %v2340_v62, %v4159_v30 }
 0x4b4   : > { %v2614_v7 = vmul.f32 %v2596_v48, %v4126_v3  ;;  %vm2606_vm12 = vcmp.ge.f32.partialorder %v2596_v48, 0.0 }
 0x4b5   : > { %vm2359_vm10 = vcmp.ge.f32.partialorder %v2341_v54, 0.0  ;;  %v2367_v39 = vmul.f32 %v2341_v54, %v4149_v20 }
 0x4b6   : > { %v2622_v2 = vsel %vm2606_vm12, %v2596_v48, %v2614_v7 }
 0x4b7   : > { %v2375_v40 = vsel %vm2359_vm10, %v2341_v54, %v2367_v39 }
 0x4b8   : > { %v2382_v60 = vpack.c.bf16 %v2375_v40, %v2374_v59 }
 0x4b9   : > { %v2597_v17 = vpop.f32.mrf.mxu3 }
 0x4ba   : > { %3018 = vmatmul.msk.bf16.vlgmr.msrb.gmra.mxu1 %vm1278_vm0, %v2382_v60  ;;  %v2598_v43 = vadd.f32 %v3129_v42, %v2597_v17 }
 0x4bc   : > { %vm2607_vm13 = vcmp.ge.f32.partialorder %v2598_v43, 0.0  ;;  %v2615_v30 = vmul.f32 %v2598_v43, %v4126_v3 }
 0x4be   : > { %v2623_v57 = vsel %vm2607_vm13, %v2598_v43, %v2615_v30 }
 0x4bf   : > { %v2343_v12 = vpop.f32.mrf.mxu0  ;;  %v2627_v27 = vpack.c.bf16 %v2623_v57, %v2622_v2 }
 0x4c0   : > { %v2344_v31 = vadd.f32 %v2343_v12, %v4172_v28 }
 0x4c1   : > { %3049 = vmatmul.msk.bf16.gmra.mxu0 %vm1278_vm0, %v2627_v27 }
 0x4c2   : > { %v2368_v5 = vmul.f32 %v2344_v31, %v4149_v20  ;;  %vm2360_vm14 = vcmp.ge.f32.partialorder %v2344_v31, 0.0 }
 0x4c4   : > { %v2376_v16 = vsel %vm2360_vm14, %v2344_v31, %v2368_v5 }
 0x4c7   : > { %v2345_v19 = vpop.f32.mrf.mxu0 }
 0x4c8   : > { %v2346_v18 = vadd.f32 %v2345_v19, %v4176_v36 }
 0x4ca   : > { %vm2361_vm15 = vcmp.ge.f32.partialorder %v2346_v18, 0.0  ;;  %v2369_v11 = vmul.f32 %v2346_v18, %v4149_v20 }
 0x4cc   : > { %v2377_v23 = vsel %vm2361_vm15, %v2346_v18, %v2369_v11 }
 0x4cd   : > { %v2383_v24 = vpack.c.bf16 %v2377_v23, %v2376_v16 }
 0x4cf   : > { %v2348_v3 = vpop.f32.mrf.mxu0  ;;  %3019 = vmatmul.msk.bf16.gmra.mxu1 %vm1278_vm0, %v2383_v24 }
 0x4d0   : > { %v2349_v46 = vadd.f32 %v2348_v3, %v4191_v4 }
 0x4d2   : > { %v2370_v28 = vmul.f32 %v2349_v46, %v4149_v20  ;;  %vm2362_vm1 = vcmp.ge.f32.partialorder %v2349_v46, 0.0 }
 0x4d4   : > { %v2378_v61 = vsel %vm2362_vm1, %v2349_v46, %v2370_v28 }
 0x4d7   : > { %v2350_v42 = vpop.f32.mrf.mxu0 }
 0x4d8   : > { %v2351_v14 = vadd.f32 %v2350_v42, %v4195_v34 }
 0x4da   : > { %vm2363_vm2 = vcmp.ge.f32.partialorder %v2351_v14, 0.0  ;;  %v2371_v36 = vmul.f32 %v2351_v14, %v4149_v20 }
 0x4dc   : > { %v2379_v52 = vsel %vm2363_vm2, %v2351_v14, %v2371_v36 }
 0x4dd   : > { %v2384_v13 = vpack.c.bf16 %v2379_v52, %v2378_v61 }
 0x4df   : > { %3020 = vmatmul.msk.bf16.gmra.mxu1 %vm1278_vm0, %v2384_v13 }
 0x4e1   : > { %v2353_v50 = vpop.f32.mrf.mxu0 }
 0x4e2   : > { %v2354_v63 = vadd.f32 %v2353_v50, %v4204_v29  ;;  %v3130_v29 = vld [vmem:[%s4310_s26] ss:$0 sm:$0xff] }
 0x4e4   : > { %v2372_v4 = vmul.f32 %v2354_v63, %v4149_v20  ;;  %vm2364_vm3 = vcmp.ge.f32.partialorder %v2354_v63, 0.0 }
 0x4e6   : > { %v2380_v56 = vsel %vm2364_vm3, %v2354_v63, %v2372_v4 }
 0x4e9   : > { %v2355_v10 = vpop.f32.mrf.mxu0 }
 0x4ea   : > { %v2356_v32 = vadd.f32 %v2355_v10, %v4208_v0 }
 0x4ec   : > { %vm2365_vm4 = vcmp.ge.f32.partialorder %v2356_v32, 0.0  ;;  %v2373_v34 = vmul.f32 %v2356_v32, %v4149_v20 }
 0x4ee   : > { %v2381_v55 = vsel %vm2365_vm4, %v2356_v32, %v2373_v34 }
 0x4ef   : > { %v2385_v41 = vpack.c.bf16 %v2381_v55, %v2380_v56 }
 0x4f1   : > { %3021 = vmatmul.msk.bf16.gmra.mxu1 %vm1278_vm0, %v2385_v41 }
 0x503   : > { %v2669_v22 = vpop.f32.mrf.mxu0 }
 0x504   : > { %v2670_v0 = vadd.f32 %v3130_v29, %v2669_v22 }
 0x50b   : > { %v2671_v1 = vpop.f32.mrf.mxu0 }
 0x50c   : > { %v2672_v38 = vadd.f32 %v3130_v29, %v2671_v1 }
 0x513   : > { %v2674_v53 = vpop.f32.mrf.mxu0 }
 0x514   : > { %v2675_v8 = vadd.f32 %v3130_v29, %v2674_v53 }
 0x51b   : > { %v2676_v45 = vpop.f32.mrf.mxu0 }
 0x51c   : > { %v2677_v58 = vadd.f32 %v3130_v29, %v2676_v45 }
 0x529   : > { %v2679_v15 = vpop.f32.mrf.mxu0 }
 0x52a   : > { %v2680_v6 = vadd.f32 %v3130_v29, %v2679_v15 }
 0x531   : > { %v2681_v48 = vpop.f32.mrf.mxu0 }
 0x532   : > { %v2682_v60 = vadd.f32 %v3130_v29, %v2681_v48 }
 0x537   : > { %v2427_v21 = vpop.f32.mrf.mxu1 }
 0x538   : > { %v2428_v49 = vadd.f32 %v3131_v26, %v2427_v21 }
 0x53a   : > { %v2689_v20 = vadd.f32 %v2670_v0, %v2428_v49 }
 0x53c   : > { %2697 = vst.msk [vmem:[%s4263_s12] sm:$0xff] %vm2464_vm11, %v2689_v20 }
 0x53e   : > { %v2684_v43 = vpop.f32.mrf.mxu0 }
 0x53f   : > { %v2429_v25 = vpop.f32.mrf.mxu1  ;;  %v2685_v30 = vadd.f32 %v3130_v29, %v2684_v43 }
 0x540   : > { %v2430_v9 = vadd.f32 %v3131_v26, %v2429_v25 }
 0x542   : > { %v2690_v37 = vadd.f32 %v2672_v38, %v2430_v9 }
 0x544   : > { %2698 = vst.msk [vmem:[%s4263_s12 + $0x8] sm:$0xff] %vm2464_vm11, %v2690_v37 }
 0x546   : > { %v2686_v27 = vpop.f32.mrf.mxu0 }
 0x547   : > { %v2687_v19 = vadd.f32 %v3130_v29, %v2686_v27 }
 0x54c   : > { %v2432_v33 = vpop.f32.mrf.mxu1 }
 0x54d   : > { %v2433_v44 = vadd.f32 %v3131_v26, %v2432_v33 }
 0x54f   : > { %v2691_v47 = vadd.f32 %v2675_v8, %v2433_v44 }
 0x551   : > { %2699 = vst.msk [vmem:[%s4263_s12 + $0x10] sm:$0xff] %vm2464_vm11, %v2691_v47 }
 0x554   : > { %v2434_v35 = vpop.f32.mrf.mxu1 }
 0x555   : > { %v2435_v62 = vadd.f32 %v3131_v26, %v2434_v35 }
 0x557   : > { %v2692_v51 = vadd.f32 %v2677_v58, %v2435_v62 }
 0x559   : > { %2700 = vst.msk [vmem:[%s4263_s12 + $0x18] sm:$0xff] %vm2464_vm11, %v2692_v51 }
 0x55c   : > { %v2437_v54 = vpop.f32.mrf.mxu1 }
 0x55d   : > { %v2438_v39 = vadd.f32 %v3131_v26, %v2437_v54 }
 0x55f   : > { %v2693_v59 = vadd.f32 %v2680_v6, %v2438_v39 }
 0x561   : > { %2701 = vst.msk [vmem:[%s4263_s12 + $0x20] sm:$0xff] %vm2464_vm11, %v2693_v59 }
 0x564   : > { %v2439_v40 = vpop.f32.mrf.mxu1 }
 0x565   : > { %v2440_v7 = vadd.f32 %v3131_v26, %v2439_v40 }
 0x567   : > { %v2694_v17 = vadd.f32 %v2682_v60, %v2440_v7 }
 0x569   : > { %2702 = vst.msk [vmem:[%s4263_s12 + $0x28] sm:$0xff] %vm2464_vm11, %v2694_v17 }
 0x56e   : > { %v2442_v2 = vpop.f32.mrf.mxu1 }
 0x56f   : > { %v2443_v12 = vadd.f32 %v3131_v26, %v2442_v2 }
 0x571   : > { %v2695_v57 = vadd.f32 %v2685_v30, %v2443_v12 }
 0x573   : > { %2703 = vst.msk [vmem:[%s4263_s12 + $0x30] sm:$0xff] %vm2464_vm11, %v2695_v57 }
 0x576   : > { %v2444_v31 = vpop.f32.mrf.mxu1 }
 0x577   : > { %v2445_v5 = vadd.f32 %v3131_v26, %v2444_v31 }
 0x579   : > { %v2696_v18 = vadd.f32 %v2687_v19, %v2445_v5 }
 0x57b   : > { %2704 = vst.msk [vmem:[%s4263_s12 + $0x38] sm:$0xff] %vm2464_vm11, %v2696_v18 }
 0x57c PF: > { %s39_s8 = sadd.s32 1, %s3221_s8  }
 0x57d   : > { %p36_p7 = scmp.ge.s32.totalorder %s39_s8, 4  }
 0x57f   :  { %38 = sbr.rel (!%p36_p7) target bundleno = 16 (0x10), region = 176 }
 0x584   :  { %2727 = vsyncpa [#allocation3], 1 }
 0x585   :  { %2729 = vsyncpa [#allocation3 + $0x1], 1 }

// kernel: nars_jk_gamlp_forward.1
= control target key start
LH: loop header
LB: loop body
LE: loop exit
PB: predicated region body
PF: predicated region fallthrough
CT: control target
= control target key end

     0   :  { %s4284_s0 = inlined_call_operand.vmem [shape: f32[128,128], index: 0, kind: input, shape index: {}]   ;;  %s4285_s1 = inlined_call_operand.vmem [shape: f32[128,128], index: 1, kind: input, shape index: {}]   ;;  %s4286_s2 = inlined_call_operand.vmem [shape: f32[128,128], index: 2, kind: input, shape index: {}]   ;;  %s4287_s3 = inlined_call_operand.vmem [shape: f32[128,8], index: 3, kind: input, shape index: {}]   ;;  %s4288_s4 = inlined_call_operand.vmem [shape: bf16[128,32], index: 4, kind: input, shape index: {}]   ;;  %s4289_s5 = inlined_call_operand.vmem [shape: bf16[128,32], index: 5, kind: input, shape index: {}]   ;;  %s4290_s6 = inlined_call_operand.vmem [shape: bf16[128,32], index: 6, kind: input, shape index: {}]   ;;  %s4291_s7 = inlined_call_operand.vmem [shape: bf16[32,32], index: 7, kind: input, shape index: {}]   ;;  %s4292_s8 = inlined_call_operand.vmem [shape: bf16[32,32], index: 8, kind: input, shape index: {}]   ;;  %s4293_s9 = inlined_call_operand.vmem [shape: bf16[32,32], index: 9, kind: input, shape index: {}]   ;;  %s4294_s10 = inlined_call_operand.vmem [shape: f32[1,32], index: 10, kind: input, shape index: {}]   ;;  %s4295_s11 = inlined_call_operand.vmem [shape: bf16[32,32], index: 11, kind: input, shape index: {}]   ;;  %s4296_s12 = inlined_call_operand.vmem [shape: bf16[32,32], index: 12, kind: input, shape index: {}]   ;;  %s4297_s13 = inlined_call_operand.vmem [shape: f32[1,32], index: 13, kind: input, shape index: {}]   ;;  %s4298_s14 = inlined_call_operand.vmem [shape: f32[1,32], index: 14, kind: input, shape index: {}]   ;;  %s4299_s15 = inlined_call_operand.vmem [shape: f32[1,32], index: 15, kind: input, shape index: {}]   ;;  %s4300_s16 = inlined_call_operand.vmem [shape: bf16[32,32], index: 16, kind: input, shape index: {}]   ;;  %s4301_s17 = inlined_call_operand.vmem [shape: f32[1,32], index: 17, kind: input, shape index: {}]   ;;  %s4302_s18 = inlined_call_operand.vmem [shape: bf16[32,32], index: 18, kind: input, shape index: {}]   ;;  %s4303_s19 = inlined_call_operand.vmem [shape: bf16[32,8], index: 19, kind: input, shape index: {}]   ;;  %s4304_s20 = inlined_call_operand.vmem [shape: f32[1,8], index: 20, kind: input, shape index: {}]   ;;  %s4305_s21 = inlined_call_operand.vmem [shape: bf16[8,32], index: 21, kind: input, shape index: {}]   ;;  %s4306_s22 = inlined_call_operand.vmem [shape: f32[1,32], index: 22, kind: input, shape index: {}]   ;;  %s4307_s23 = inlined_call_operand.vmem [shape: bf16[32,32], index: 23, kind: input, shape index: {}]   ;;  %s4308_s24 = inlined_call_operand.vmem [shape: f32[1,32], index: 24, kind: input, shape index: {}]   ;;  %s4309_s25 = inlined_call_operand.vmem [shape: bf16[32,8], index: 25, kind: input, shape index: {}]   ;;  %s4310_s26 = inlined_call_operand.vmem [shape: f32[1,8], index: 26, kind: input, shape index: {}]   ;;  %s4311_s27 = inlined_call_operand.vmem [shape: f32[5], index: 27, kind: input, shape index: {}]   ;;  %s4312_s28 = inlined_call_operand.vmem [shape: f32[128,8], index: 28, kind: output, shape index: {}]  }
   0x1   :  { %4322 = sst [smem:[#allocation5_spill]] %s4284_s0 }
   0x2   :  { %4323 = sst [smem:[#allocation6_spill]] %s4285_s1 }
   0x3   :  { %4324 = sst [smem:[#allocation7_spill]] %s4286_s2 }
   0x4   :  { %4325 = sst [smem:[#allocation8_spill]] %s4287_s3 }
   0x5   :  { %4326 = sst [smem:[#allocation9_spill]] %s4288_s4 }
   0x6   :  { %4327 = sst [smem:[#allocation10_spill]] %s4289_s5 }
   0x7   :  { %4328 = sst [smem:[#allocation11_spill]] %s4290_s6 }
   0x8   :  { %4329 = sst [smem:[#allocation12_spill]] %s4291_s7 }
   0x9   :  { %4330 = sst [smem:[#allocation13_spill]] %s4292_s8 }
   0xa   :  { %4331 = sst [smem:[#allocation14_spill]] %s4293_s9 }
   0xb   :  { %4332 = sst [smem:[#allocation15_spill]] %s4294_s10 }
   0xc   :  { %4333 = sst [smem:[#allocation16_spill]] %s4295_s11 }
   0xd   :  { %4334 = sst [smem:[#allocation17_spill]] %s4296_s12 }
   0xe   :  { %4335 = sst [smem:[#allocation18_spill]] %s4311_s27 }
   0xf   :  { %33 = vsyncpa [#allocation3], 0  ;;  %s3369_s8 = smov 0  }
  0x10 LB: > { %s2809_s5 = sadd.s32 4294967295, %s3221_s8   ;;  %p2811_p0 = scmp.ge.s32.totalorder %s3221_s8, 1  ;;  %s3221_s8 = sphi %s3369_s8, %s39_s8  }
  0x11   : > { %p678_p1 = scmp.lt.s32.totalorder %s3221_s8, 3  ;;  %s4336_s27 = sld [smem:[#allocation18_spill]] }
  0x12   : > { %p3112_p3 = scmp.eq.s32.totalorder %s2809_s5, 0  ;;  %s3223_s6 = smov [#allocation2]  }
  0x13   : > { %p679_p2 = pnand %p2811_p0, %p678_p1 }
  0x15   : > { %p3108_p4 = pneg %p679_p2  ;;  %808 = sbr.rel (%p679_p2) target bundleno = 1404 (0x57c), region = 132 }
  0x17   : > { %s759_s3 = sshll.u32 %s4336_s27, 4  ;;  %p3109_p5 = pnand %p3112_p3, %p3108_p4  ;;  %s760_s3 = int_to_ptr.vmem [resolvable:$true] %s759_s3 }
  0x19   : > { %3111 = dma.vmem_to_smem (!%p3109_p5), %s760_s3, 16, %s3223_s6, [#allocation3]  }
  0x1a   : > { %3216 = dma.done.wait (%p3112_p3), [#allocation3], 16  }
  0x1b   : > { %3218 = vsyncadd (%p3112_p3), [#allocation3], 4294967280 }
  0x1c   : > { %815 = sfence }
  0x1d   : > { %s4337_s11 = sld [smem:[#allocation9_spill]]  ;;  %s2816_s2 = sshll.u32 %s2809_s5, 3  ;;  %v3491_v61 = vld [vmem:[%s4299_s15] ss:$0 sm:$0xff]  ;;  %vm1278_vm0 = vcmask 261120  }
  0x1e   : > { %s4338_s7 = sld [smem:[#allocation11_spill]]  ;;  %p900_p6 = scmp.lt.s32.totalorder %s2816_s2, 15 }
  0x1f   : > { %s4339_s5 = sld [smem:[#allocation5_spill]] }
  0x20   : > { %s4357_s2 = smov (!%p900_p6, %s2816_s2), 15  ;;  %s4340_s0 = sld [smem:[#allocation7_spill]] }
  0x21   : > { %s3416_s29 = sshll.u32 %s4357_s2, 3  ;;  %s4342_s9 = sld [smem:[#allocation6_spill]] }
  0x22   : > { %s930_s10 = sld [smem:[#allocation2]] }
  0x23   : > { %v3059_v0 = vld [vmem:[%s4337_s11 + $0x38] sm:$0xff]  ;;  %v3058_v2 = vld [vmem:[%s4337_s11 + $0x30] sm:$0xff]  ;;  %v3057_v4 = vld [vmem:[%s4337_s11 + $0x28] sm:$0xff]  ;;  %s4347_s1 = sld [smem:[#allocation15_spill]] }
  0x24   : > { %v3075_v1 = vld [vmem:[%s4338_s7 + $0x38] sm:$0xff]  ;;  %3096 = vmatpush.bf16.msra.mxu1 %v3059_v0  ;;  %v3074_v3 = vld [vmem:[%s4338_s7 + $0x30] sm:$0xff]  ;;  %1011 = vmatpush.bf16.msra.mxu0 %v3059_v0  ;;  %v3073_v5 = vld [vmem:[%s4338_s7 + $0x28] sm:$0xff]  ;;  %s4348_s2 = sld [smem:[#allocation17_spill]] }
  0x25   : > { %1221 = vmatpush.bf16.msra.mxu2 %v3075_v1  ;;  %v3056_v6 = vld [vmem:[%s4337_s11 + $0x20] sm:$0xff]  ;;  %v3055_v8 = vld [vmem:[%s4337_s11 + $0x18] sm:$0xff]  ;;  %v3054_v10 = vld [vmem:[%s4337_s11 + $0x10] sm:$0xff]  ;;  %s3428_s6 = scalar_lea.vmem %s4339_s5, %s3416_s29  ;;  %s4341_s5 = sld [smem:[#allocation10_spill]] }
  0x26   : > { %v3072_v7 = vld [vmem:[%s4338_s7 + $0x20] sm:$0xff]  ;;  %v3071_v9 = vld [vmem:[%s4338_s7 + $0x18] sm:$0xff]  ;;  %v3070_v11 = vld [vmem:[%s4338_s7 + $0x10] sm:$0xff]  ;;  %s3434_s27 = scalar_lea.vmem %s4340_s0, %s3416_s29  ;;  %s4345_s0 = sld [smem:[#allocation14_spill]] }
  0x27   : > { %v3053_v12 = vld [vmem:[%s4337_s11 + $0x8] sm:$0xff]  ;;  %v3052_v14 = vld [vmem:[%s4337_s11] sm:$0xff]  ;;  %v941_v29 = vld [vmem:[%s3428_s6 + $0x30] sm:$0xff]  ;;  %s909_s30 = scalar_lea.vmem %s4342_s9, %s3416_s29  ;;  %s4344_s9 = sld [smem:[#allocation12_spill]] }
  0x28   : > { %3097 = vmatpush.bf16.msra.mxu1 %v3058_v2  ;;  %1012 = vmatpush.bf16.msra.mxu0 %v3058_v2  ;;  %v3069_v13 = vld [vmem:[%s4338_s7 + $0x8] sm:$0xff]  ;;  %v3068_v15 = vld [vmem:[%s4338_s7] sm:$0xff]  ;;  %v942_v30 = vld [vmem:[%s3428_s6 + $0x38] sm:$0xff]  ;;  %s2826_s12 = sld [smem:[#allocation2 + $0x1]] }
  0x29   : > { %1222 = vmatpush.bf16.msra.mxu2 %v3074_v3  ;;  %v939_v16 = vld [vmem:[%s3428_s6 + $0x20] sm:$0xff]  ;;  %v940_v17 = vld [vmem:[%s3428_s6 + $0x28] sm:$0xff]  ;;  %v1147_v31 = vld [vmem:[%s3434_s27 + $0x10] sm:$0xff]  ;;  %v946_v36 = vpack.c.bf16 %v942_v30, %v941_v29 }
  0x2a   : > { %v1145_v18 = vld [vmem:[%s3434_s27] sm:$0xff]  ;;  %v1146_v19 = vld [vmem:[%s3434_s27 + $0x8] sm:$0xff]  ;;  %v945_v23 = vpack.c.bf16 %v940_v17, %v939_v16  ;;  %v1148_v32 = vld [vmem:[%s3434_s27 + $0x18] sm:$0xff] }
  0x2b   : > { %v3067_v20 = vld [vmem:[%s4341_s5 + $0x38] sm:$0xff]  ;;  %v935_v21 = vld [vmem:[%s3428_s6] sm:$0xff]  ;;  %v936_v22 = vld [vmem:[%s3428_s6 + $0x8] sm:$0xff]  ;;  %v1153_v24 = vpack.c.bf16 %v1146_v19, %v1145_v18  ;;  %v1154_v37 = vpack.c.bf16 %v1148_v32, %v1147_v31 }
  0x2c   : > { %3098 = vmatpush.bf16.msra.mxu1 %v3057_v4  ;;  %1013 = vmatpush.bf16.msra.mxu0 %v3057_v4  ;;  %v943_v25 = vpack.c.bf16 %v936_v22, %v935_v21  ;;  %v3066_v26 = vld [vmem:[%s4341_s5 + $0x30] sm:$0xff]  ;;  %v3065_v27 = vld [vmem:[%s4341_s5 + $0x28] sm:$0xff]  ;;  %v3064_v28 = vld [vmem:[%s4341_s5 + $0x20] sm:$0xff] }
  0x2d   : > { %1223 = vmatpush.bf16.msra.mxu2 %v3073_v5  ;;  %v3063_v33 = vld [vmem:[%s4341_s5 + $0x18] sm:$0xff]  ;;  %v937_v34 = vld [vmem:[%s3428_s6 + $0x10] sm:$0xff]  ;;  %v3061_v40 = vld [vmem:[%s4341_s5 + $0x8] sm:$0xff] }
  0x2e   : > { %v938_v35 = vld [vmem:[%s3428_s6 + $0x18] sm:$0xff]  ;;  %v3062_v39 = vld [vmem:[%s4341_s5 + $0x10] sm:$0xff]  ;;  %v3060_v41 = vld [vmem:[%s4341_s5] sm:$0xff]  ;;  %s4343_s6 = sld [smem:[#allocation13_spill]] }
  0x2f   : > { %v944_v38 = vpack.c.bf16 %v938_v35, %v937_v34  ;;  %v1040_v42 = vld [vmem:[%s909_s30] sm:$0xff]  ;;  %v1041_v43 = vld [vmem:[%s909_s30 + $0x8] sm:$0xff]  ;;  %v1042_v45 = vld [vmem:[%s909_s30 + $0x10] sm:$0xff] }
  0x30   : > { %3099 = vmatpush.bf16.msra.mxu1 %v3056_v6  ;;  %1014 = vmatpush.bf16.msra.mxu0 %v3056_v6  ;;  %v1048_v44 = vpack.c.bf16 %v1041_v43, %v1040_v42  ;;  %v1043_v46 = vld [vmem:[%s909_s30 + $0x18] sm:$0xff]  ;;  %v1149_v48 = vld [vmem:[%s3434_s27 + $0x20] sm:$0xff]  ;;  %v1150_v49 = vld [vmem:[%s3434_s27 + $0x28] sm:$0xff] }
  0x31   : > { %1224 = vmatpush.bf16.msra.mxu2 %v3072_v7  ;;  %v1049_v47 = vpack.c.bf16 %v1043_v46, %v1042_v45  ;;  %v1155_v50 = vpack.c.bf16 %v1150_v49, %v1149_v48  ;;  %v1044_v51 = vld [vmem:[%s909_s30 + $0x20] sm:$0xff]  ;;  %v1045_v52 = vld [vmem:[%s909_s30 + $0x28] sm:$0xff]  ;;  %v1046_v54 = vld [vmem:[%s909_s30 + $0x30] sm:$0xff] }
  0x32   : > { %v1050_v53 = vpack.c.bf16 %v1045_v52, %v1044_v51  ;;  %v1047_v55 = vld [vmem:[%s909_s30 + $0x38] sm:$0xff]  ;;  %v1151_v57 = vld [vmem:[%s3434_s27 + $0x30] sm:$0xff]  ;;  %v3076_v30 = vld [vmem:[%s4344_s9] sm:$0xff]  ;;  %s4346_s30 = sld [smem:[#allocation16_spill]] }
  0x33   : > { %v1051_v56 = vpack.c.bf16 %v1047_v55, %v1046_v54  ;;  %v1152_v58 = vld [vmem:[%s3434_s27 + $0x38] sm:$0xff]  ;;  %s2829_s27 = sld [smem:[#allocation2 + $0x4]] }
  0x34   : > { %3100 = vmatpush.bf16.msra.mxu1 %v3055_v8  ;;  %1015 = vmatpush.bf16.msra.mxu0 %v3055_v8  ;;  %v1156_v59 = vpack.c.bf16 %v1152_v58, %v1151_v57  ;;  %v3079_v0 = vld [vmem:[%s4343_s6 + $0x8] sm:$0xff]  ;;  %v3078_v3 = vld [vmem:[%s4343_s6] sm:$0xff] }
  0x35   : > { %1225 = vmatpush.bf16.msra.mxu2 %v3071_v9  ;;  %1297 = vmatpush.bf16.msra.mxu3 %v3079_v0  ;;  %v3077_v8 = vld [vmem:[%s4344_s9 + $0x8] sm:$0xff] }
  0x38   : > { %3101 = vmatpush.bf16.msra.mxu1 %v3054_v10  ;;  %1016 = vmatpush.bf16.msra.mxu0 %v3054_v10 }
  0x39   : > { %1226 = vmatpush.bf16.msra.mxu2 %v3070_v11  ;;  %1298 = vmatpush.bf16.msra.mxu3 %v3078_v3 }
  0x3c   : > { %3102 = vmatpush.bf16.msra.mxu1 %v3053_v12  ;;  %1017 = vmatpush.bf16.msra.mxu0 %v3053_v12 }
  0x3d   : > { %1227 = vmatpush.bf16.msra.mxu2 %v3069_v13  ;;  %1350 = vmatpush.bf16.msrb.mxu3 %v3077_v8 }
  0x40   : > { %3103 = vmatpush.bf16.msra.mxu1 %v3052_v14  ;;  %1018 = vmatpush.bf16.msra.mxu0 %v3052_v14 }
  0x41   : > { %1228 = vmatpush.bf16.msra.mxu2 %v3068_v15  ;;  %1351 = vmatpush.bf16.msrb.mxu3 %v3076_v30 }
  0x43   : > { %1029 = vmatmul.bf16.vlgmr.msra.gmra.mxu1 %v945_v23  ;;  %1019 = vmatmul.bf16.vlgmr.msra.gmra.mxu0 %v943_v25 }
  0x44   : > { %1116 = vmatpush.bf16.msrb.mxu1 %v3067_v20  ;;  %1229 = vmatmul.bf16.vlgmr.msra.gmra.mxu2 %v1153_v24 }
  0x48   : > { %1117 = vmatpush.bf16.msrb.mxu1 %v3066_v26 }
  0x4c   : > { %1118 = vmatpush.bf16.msrb.mxu1 %v3065_v27 }
  0x50   : > { %1119 = vmatpush.bf16.msrb.mxu1 %v3064_v28 }
  0x53   : > { %1034 = vmatmul.bf16.gmra.mxu1 %v946_v36  ;;  %1024 = vmatmul.bf16.gmra.mxu0 %v944_v38 }
  0x54   : > { %1120 = vmatpush.bf16.msrb.mxu1 %v3063_v33  ;;  %1234 = vmatmul.bf16.gmra.mxu2 %v1154_v37  ;;  %v3081_v33 = vld [vmem:[%s4345_s0 + $0x8] sm:$0xff] }
  0x55   : > { %1411 = vmatpush.bf16.msrb.mxu0 %v3081_v33  ;;  %v3650_v33 = vstv %s930_s10  ;;  %s4349_s10 = sld [smem:[#allocation8_spill]] }
  0x58   : > { %1121 = vmatpush.bf16.msrb.mxu1 %v3062_v39 }
  0x5c   : > { %1122 = vmatpush.bf16.msrb.mxu1 %v3061_v40 }
  0x60   : > { %1123 = vmatpush.bf16.msrb.mxu1 %v3060_v41  ;;  %v3080_v41 = vld [vmem:[%s4345_s0] sm:$0xff]  ;;  %s2827_s0 = sld [smem:[#allocation2 + $0x2]] }
  0x61   : > { %1412 = vmatpush.bf16.msrb.mxu0 %v3080_v41 }
  0x63   : > { %1124 = vmatmul.bf16.vlgmr.msrb.gmra.mxu1 %v1048_v44 }
  0x64   : > { %1239 = vmatmul.bf16.gmra.mxu2 %v1155_v50 }
  0x73   : > { %1129 = vmatmul.bf16.gmra.mxu1 %v1049_v47 }
  0x74   : > { %1244 = vmatmul.bf16.gmra.mxu2 %v1156_v59 }
  0x83   : > { %1134 = vmatmul.bf16.gmra.mxu1 %v1050_v53 }
  0x93   : > { %1139 = vmatmul.bf16.gmra.mxu1 %v1051_v56 }
  0xc0   : > { %v3486_v60 = vpop.f32.mrf.mxu1  ;;  %v3493_v62 = vpop.f32.mrf.mxu0 }
  0xc1   : > { %v1726_v63 = vmul.f32 %v3491_v61, %v3493_v62 }
  0xc3   : > { %v1734_v1 = vsel %vm1278_vm0, %v1726_v63, 0.0 }
  0xc4   : > { %1735 = vadd.xlane.f32.xlu1 %v1734_v1 }
  0xc7   : > { %v3501_v2 = vpop.f32.mrf.mxu2 }
  0xc8   : > { %v3506_v4 = vpop.f32.mrf.mxu1  ;;  %v3508_v5 = vpop.f32.mrf.mxu0  ;;  %v1839_v6 = vmul.f32 %v3491_v61, %v3501_v2 }
  0xc9   : > { %v1727_v7 = vmul.f32 %v3491_v61, %v3508_v5  ;;  %v1731_v43 = vmul.f32 %v3491_v61, %v3506_v4  ;;  %v1250_v57 = vpack.c.bf16 %v3508_v5, %v3493_v62  ;;  %v1252_v3 = vpack.c.bf16 %v3506_v4, %v3486_v60 }
  0xca   : > { %v1847_v9 = vsel %vm1278_vm0, %v1839_v6, 0.0 }
  0xcb   : > { %v1737_v10 = vsel %vm1278_vm0, %v1727_v7, 0.0  ;;  %1848 = vadd.xlane.f32.xlu0 %v1847_v9  ;;  %v1749_v45 = vsel %vm1278_vm0, %v1731_v43, 0.0  ;;  %v3083_v7 = vld [vmem:[%s4346_s30 + $0x8] sm:$0xff] }
  0xcc   : > { %1738 = vadd.xlane.f32.xlu1 %v1737_v10  ;;  %1541 = vmatpush.bf16.msra.mxu1 %v3083_v7 }
  0xcf   : > { %v3519_v11 = vpop.f32.mrf.mxu2 }
  0xd0   : > { %v1840_v12 = vmul.f32 %v3491_v61, %v3519_v11  ;;  %v3523_v13 = vpop.f32.mrf.mxu1  ;;  %v3525_v14 = vpop.f32.mrf.mxu0  ;;  %v1373_v42 = vpack.c.bf16 %v3519_v11, %v3501_v2 }
  0xd1   : > { %v1728_v17 = vmul.f32 %v3491_v61, %v3525_v14 }
  0xd2   : > { %v1850_v15 = vsel %vm1278_vm0, %v1840_v12, 0.0  ;;  %2958 = vmatmul.msk.bf16.vlgmr.msrb.gmra.mxu0 %vm1278_vm0, %v1373_v42 }
  0xd3   : > { %v1740_v22 = vsel %vm1278_vm0, %v1728_v17, 0.0 }
  0xd4   : > { %1851 = vadd.xlane.f32.xlu1 %v1850_v15  ;;  %v3082_v15 = vld [vmem:[%s4346_s30] sm:$0xff] }
  0xd5   : > { %1542 = vmatpush.bf16.msra.mxu1 %v3082_v15 }
  0xd7   : > { %v3528_v16 = vpop.f32.mrf.mxu2 }
  0xd8   : > { %v1841_v18 = vmul.f32 %v3491_v61, %v3528_v16  ;;  %v3534_v19 = vpop.f32.mrf.mxu1  ;;  %v3537_v21 = vpop.f32.mrf.mxu0 }
  0xd9   : > { %v1729_v23 = vmul.f32 %v3491_v61, %v3537_v21  ;;  %v1251_v1 = vpack.c.bf16 %v3537_v21, %v3525_v14  ;;  %v1253_v6 = vpack.c.bf16 %v3534_v19, %v3523_v13 }
  0xda   : > { %v1853_v20 = vsel %vm1278_vm0, %v1841_v18, 0.0 }
  0xdb   : > { %1854 = vadd.xlane.f32.xlu2 %v1853_v20  ;;  %v1743_v24 = vsel %vm1278_vm0, %v1729_v23, 0.0 }
  0xdc   : > { %1741 = vadd.xlane.f32.xlu1 %v1740_v22 }
  0xdf   : > { %v3591_v48 = vpop.f32.mrf.mxu2 }
  0xe0   : > { %v3543_v25 = vpop.f32.mrf.mxu1  ;;  %v1374_v49 = vpack.c.bf16 %v3591_v48, %v3528_v16 }
  0xe1   : > { %v1783_v26 = vmul.f32 %v3491_v61, %v3543_v25 }
  0xe2   : > { %2959 = vmatmul.msk.bf16.gmra.mxu0 %vm1278_vm0, %v1374_v49 }
  0xe3   : > { %1744 = vadd.xlane.f32.xlu2 %v1743_v24  ;;  %v1791_v29 = vsel %vm1278_vm0, %v1783_v26, 0.0 }
  0xe7   : > { %v3598_v51 = vpop.f32.mrf.mxu2 }
  0xe8   : > { %v3547_v27 = vpop.f32.mrf.mxu1  ;;  %v1843_v58 = vmul.f32 %v3491_v61, %v3598_v51 }
  0xe9   : > { %v1258_v28 = vpack.c.bf16 %v3547_v27, %v3543_v25  ;;  %v1784_v31 = vmul.f32 %v3491_v61, %v3547_v27 }
  0xea   : > { %v1859_v59 = vsel %vm1278_vm0, %v1843_v58, 0.0 }
  0xeb   : > { %1792 = vadd.xlane.f32.xlu2 %v1791_v29  ;;  %2934 = vmatmul.msk.bf16.vlgmr.msra.gmra.mxu3 %vm1278_vm0, %v1258_v28  ;;  %v1794_v34 = vsel %vm1278_vm0, %v1784_v31, 0.0  ;;  %v3647_v29 = vld [vmem:[%s4347_s1] ss:$0 sm:$0xff] }
  0xef   : > { %v3605_v54 = vpop.f32.mrf.mxu2 }
  0xf0   : > { %v3558_v32 = vpop.f32.mrf.mxu1  ;;  %v1375_v55 = vpack.c.bf16 %v3605_v54, %v3598_v51 }
  0xf1   : > { %v1785_v35 = vmul.f32 %v3491_v61, %v3558_v32 }
  0xf2   : > { %2960 = vmatmul.msk.bf16.gmra.mxu0 %vm1278_vm0, %v1375_v55 }
  0xf3   : > { %1795 = vadd.xlane.f32.xlu2 %v1794_v34  ;;  %v1797_v36 = vsel %vm1278_vm0, %v1785_v35, 0.0 }
  0xf4   : > { %1798 = vadd.xlane.f32.xlu0 %v1797_v36 }
  0xf7   : > { %v3610_v56 = vpop.f32.mrf.mxu2 }
  0xf8   : > { %v3567_v37 = vpop.f32.mrf.mxu1 }
  0xf9   : > { %v1259_v38 = vpack.c.bf16 %v3567_v37, %v3558_v32  ;;  %v1786_v39 = vmul.f32 %v3491_v61, %v3567_v37 }
  0xfb   : > { %2935 = vmatmul.msk.bf16.gmra.mxu3 %vm1278_vm0, %v1259_v38  ;;  %v1800_v40 = vsel %vm1278_vm0, %v1786_v39, 0.0 }
  0xfc   : > { %1801 = vadd.xlane.f32.xlu1 %v1800_v40 }
  0xff   : > { %v3618_v63 = vpop.f32.mrf.mxu2 }
 0x100   : > { %v3582_v44 = vpop.f32.mrf.mxu1  ;;  %v1376_v0 = vpack.c.bf16 %v3618_v63, %v3610_v56 }
 0x102   : > { %2961 = vmatmul.msk.bf16.gmra.mxu0 %vm1278_vm0, %v1376_v0 }
 0x104   : > { %1750 = vadd.xlane.f32.xlu1 %v1749_v45 }
 0x108   : > { %v3586_v46 = vpop.f32.mrf.mxu1 }
 0x109   : > { %v1260_v47 = vpack.c.bf16 %v3586_v46, %v3582_v44 }
 0x10b   : > { %2936 = vmatmul.msk.bf16.gmra.mxu3 %vm1278_vm0, %v1260_v47 }
 0x10c   : > { %1860 = vadd.xlane.f32.xlu1 %v1859_v59 }
 0x110   : > { %v3595_v50 = vpop.f32.mrf.mxu1 }
 0x118   : > { %v3600_v52 = vpop.f32.mrf.mxu1 }
 0x119   : > { %v1261_v53 = vpack.c.bf16 %v3600_v52, %v3595_v50 }
 0x11b   : > { %2937 = vmatmul.msk.bf16.gmra.mxu3 %vm1278_vm0, %v1261_v53 }
 0x12b   : > { %2946 = vmatmul.msk.bf16.vlgmr.msrb.gmra.mxu3 %vm1278_vm0, %v1250_v57 }
 0x13b   : > { %2947 = vmatmul.msk.bf16.gmra.mxu3 %vm1278_vm0, %v1251_v1 }
 0x14b   : > { %2948 = vmatmul.msk.bf16.gmra.mxu3 %vm1278_vm0, %v1252_v3 }
 0x14f   : > { %v1414_v22 = vpop.f32.mrf.mxu0 }
 0x157   : > { %v1416_v24 = vpop.f32.mrf.mxu0 }
 0x15b   : > { %2949 = vmatmul.msk.bf16.gmra.mxu3 %vm1278_vm0, %v1253_v6 }
 0x15f   : > { %v1419_v34 = vpop.f32.mrf.mxu0 }
 0x167   : > { %v1421_v58 = vpop.f32.mrf.mxu0 }
 0x16e   : > { %v1300_v8 = vpop.f32.mrf.mxu3 }
 0x176   : > { %v1302_v9 = vpop.f32.mrf.mxu3 }
 0x17e   : > { %v1305_v10 = vpop.f32.mrf.mxu3 }
 0x186   : > { %v1307_v12 = vpop.f32.mrf.mxu3 }
 0x18e   : > { %v1310_v17 = vpop.f32.mrf.mxu3 }
 0x196   : > { %v3638_v18 = vpop.f32.mrf.mxu3 }
 0x19e   : > { %v3640_v20 = vpop.f32.mrf.mxu3 }
 0x1a6   : > { %v3642_v23 = vpop.f32.mrf.mxu3 }
 0x1ae   : > { %v1353_v26 = vpop.f32.mrf.mxu3 }
 0x1af   : > { %v1354_v28 = vadd.f32 %v1353_v26, %v1300_v8 }
 0x1b1   : > { %v1434_v30 = vadd.f32 %v1414_v22, %v1354_v28 }
 0x1b3   : > { %v1446_v31 = vadd.f32 %v3647_v29, %v1434_v30 }
 0x1b5   : > { %v1463_v36 = vmul.f32 %v3650_v33, %v1446_v31  ;;  %vm1454_vm1 = vcmp.ge.f32.partialorder %v1446_v31, 0.0  ;;  %v1487_v53 = vmul.f32 0.5, %v1446_v31 }
 0x1b6   : > { %v1355_v35 = vpop.f32.mrf.mxu3 }
 0x1b7   : > { %v1356_v38 = vadd.f32 %v1355_v35, %v1302_v9  ;;  %v3653_v40 = vsel %vm1454_vm1, %v1446_v31, %v1463_v36 }
 0x1b8   : > { %v1479_v43 = vmul.f32 0.5, %v3653_v40 }
 0x1b9   : > { %v1435_v39 = vadd.f32 %v1416_v24, %v1356_v38 }
 0x1ba   : > { %v1495_v0 = vadd.f32 %v1487_v53, %v1479_v43 }
 0x1bb   : > { %v1447_v41 = vadd.f32 %v3647_v29, %v1435_v39 }
 0x1bd   : > { %vm1455_vm2 = vcmp.ge.f32.partialorder %v1447_v41, 0.0  ;;  %v1464_v42 = vmul.f32 %v3650_v33, %v1447_v41  ;;  %v1488_v57 = vmul.f32 0.5, %v1447_v41 }
 0x1be   : > { %v1358_v45 = vpop.f32.mrf.mxu3 }
 0x1bf   : > { %v3658_v47 = vsel %vm1455_vm2, %v1447_v41, %v1464_v42  ;;  %v1359_v49 = vadd.f32 %v1358_v45, %v1305_v10  ;;  %v1424_v10 = vpop.f32.mrf.mxu0 }
 0x1c0   : > { %v1480_v55 = vmul.f32 0.5, %v3658_v47 }
 0x1c1   : > { %v1436_v59 = vadd.f32 %v1419_v34, %v1359_v49 }
 0x1c2   : > { %v1496_v1 = vadd.f32 %v1488_v57, %v1480_v55  ;;  %v3084_v57 = vld [vmem:[%s4348_s2] sm:$0xff] }
 0x1c3   : > { %v1448_v3 = vadd.f32 %v3647_v29, %v1436_v59 }
 0x1c4   : > { %v1503_v6 = vpack.c.bf16 %v1496_v1, %v1495_v0 }
 0x1c5   : > { %v1465_v8 = vmul.f32 %v3650_v33, %v1448_v3  ;;  %vm1456_vm3 = vcmp.ge.f32.partialorder %v1448_v3, 0.0  ;;  %v1489_v36 = vmul.f32 0.5, %v1448_v3 }
 0x1c6   : > { %v1360_v7 = vpop.f32.mrf.mxu3  ;;  %2970 = vmatmul.msk.bf16.vlgmr.msra.gmra.mxu1 %vm1278_vm0, %v1503_v6 }
 0x1c7   : > { %v1361_v9 = vadd.f32 %v1360_v7, %v1307_v12  ;;  %v3665_v24 = vsel %vm1456_vm3, %v1448_v3, %v1465_v8  ;;  %v1426_v43 = vpop.f32.mrf.mxu0 }
 0x1c8   : > { %v1481_v30 = vmul.f32 0.5, %v3665_v24 }
 0x1c9   : > { %v1437_v15 = vadd.f32 %v1421_v58, %v1361_v9 }
 0x1ca   : > { %v1497_v39 = vadd.f32 %v1489_v36, %v1481_v30 }
 0x1cb   : > { %v1449_v22 = vadd.f32 %v3647_v29, %v1437_v15 }
 0x1cd   : > { %v1466_v26 = vmul.f32 %v3650_v33, %v1449_v22  ;;  %vm1457_vm4 = vcmp.ge.f32.partialorder %v1449_v22, 0.0  ;;  %v1490_v12 = vmul.f32 0.5, %v1449_v22 }
 0x1ce   : > { %v1363_v28 = vpop.f32.mrf.mxu3 }
 0x1cf   : > { %v1364_v31 = vadd.f32 %v1363_v28, %v1310_v17  ;;  %v3669_v34 = vsel %vm1457_vm4, %v1449_v22, %v1466_v26  ;;  %v3085_v17 = vld [vmem:[%s4348_s2 + $0x8] sm:$0xff]  ;;  %v1429_v3 = vpop.f32.mrf.mxu0 }
 0x1d0   : > { %v1482_v35 = vmul.f32 0.5, %v3669_v34  ;;  %1630 = vmatpush.bf16.msrb.mxu2 %v3085_v17 }
 0x1d1   : > { %v1438_v38 = vadd.f32 %v1424_v10, %v1364_v31 }
 0x1d2   : > { %v1498_v41 = vadd.f32 %v1490_v12, %v1482_v35 }
 0x1d3   : > { %v1450_v42 = vadd.f32 %v3647_v29, %v1438_v38 }
 0x1d4   : > { %v1504_v45 = vpack.c.bf16 %v1498_v41, %v1497_v39  ;;  %1631 = vmatpush.bf16.msrb.mxu2 %v3084_v57 }
 0x1d5   : > { %v1467_v53 = vmul.f32 %v3650_v33, %v1450_v42  ;;  %vm1458_vm5 = vcmp.ge.f32.partialorder %v1450_v42, 0.0  ;;  %v1491_v15 = vmul.f32 0.5, %v1450_v42 }
 0x1d6   : > { %v1365_v49 = vpop.f32.mrf.mxu3  ;;  %2971 = vmatmul.msk.bf16.gmra.mxu1 %vm1278_vm0, %v1504_v45 }
 0x1d7   : > { %v1366_v55 = vadd.f32 %v1365_v49, %v3638_v18  ;;  %v1475_v0 = vsel %vm1458_vm5, %v1450_v42, %v1467_v53  ;;  %v1431_v38 = vpop.f32.mrf.mxu0 }
 0x1d8   : > { %v1483_v7 = vmul.f32 0.5, %v1475_v0 }
 0x1d9   : > { %v1439_v58 = vadd.f32 %v1426_v43, %v1366_v55 }
 0x1da   : > { %v1499_v26 = vadd.f32 %v1491_v15, %v1483_v7 }
 0x1db   : > { %v1451_v59 = vadd.f32 %v3647_v29, %v1439_v58 }
 0x1dd   : > { %v1468_v1 = vmul.f32 %v3650_v33, %v1451_v59  ;;  %vm1459_vm6 = vcmp.ge.f32.partialorder %v1451_v59, 0.0  ;;  %v1492_v10 = vmul.f32 0.5, %v1451_v59 }
 0x1de   : > { %v1368_v6 = vpop.f32.mrf.mxu3 }
 0x1df   : > { %v1369_v8 = vadd.f32 %v1368_v6, %v3640_v20  ;;  %v1476_v18 = vsel %vm1459_vm6, %v1451_v59, %v1468_v1 }
 0x1e0   : > { %v1484_v9 = vmul.f32 0.5, %v1476_v18 }
 0x1e1   : > { %v1440_v22 = vadd.f32 %v1429_v3, %v1369_v8 }
 0x1e2   : > { %v1500_v28 = vadd.f32 %v1492_v10, %v1484_v9 }
 0x1e3   : > { %v1452_v30 = vadd.f32 %v3647_v29, %v1440_v22 }
 0x1e4   : > { %v1505_v31 = vpack.c.bf16 %v1500_v28, %v1499_v26 }
 0x1e5   : > { %v1469_v36 = vmul.f32 %v3650_v33, %v1452_v30  ;;  %vm1460_vm7 = vcmp.ge.f32.partialorder %v1452_v30, 0.0  ;;  %v1493_v17 = vmul.f32 0.5, %v1452_v30 }
 0x1e6   : > { %v1370_v35 = vpop.f32.mrf.mxu3  ;;  %2972 = vmatmul.msk.bf16.gmra.mxu1 %vm1278_vm0, %v1505_v31 }
 0x1e7   : > { %v1371_v12 = vadd.f32 %v1370_v35, %v3642_v23  ;;  %v1477_v41 = vsel %vm1460_vm7, %v1452_v30, %v1469_v36 }
 0x1e8   : > { %v1485_v43 = vmul.f32 0.5, %v1477_v41 }
 0x1e9   : > { %v1441_v20 = vadd.f32 %v1431_v38, %v1371_v12 }
 0x1ea   : > { %v1501_v55 = vadd.f32 %v1493_v17, %v1485_v43 }
 0x1eb   : > { %v1453_v39 = vadd.f32 %v3647_v29, %v1441_v20 }
 0x1ed   : > { %v1470_v42 = vmul.f32 %v3650_v33, %v1453_v39  ;;  %vm1461_vm8 = vcmp.ge.f32.partialorder %v1453_v39, 0.0  ;;  %v1494_v53 = vmul.f32 0.5, %v1453_v39 }
 0x1ef   : > { %v1478_v45 = vsel %vm1461_vm8, %v1453_v39, %v1470_v42 }
 0x1f0   : > { %v1486_v49 = vmul.f32 0.5, %v1478_v45 }
 0x1f2   : > { %v1502_v57 = vadd.f32 %v1494_v53, %v1486_v49 }
 0x1f4   : > { %v1506_v58 = vpack.c.bf16 %v1502_v57, %v1501_v55 }
 0x1f6   : > { %2973 = vmatmul.msk.bf16.gmra.mxu1 %vm1278_vm0, %v1506_v58 }
 0x243   : > { %v1544_v23 = vpop.f32.mrf.mxu1 }
 0x244   : > { %v1545_v59 = vadd.f32 %v1544_v23, %v3653_v40 }
 0x246   : > { %v1572_v29 = vmul.f32 %v1545_v59, %v3650_v33  ;;  %vm1564_vm9 = vcmp.ge.f32.partialorder %v1545_v59, 0.0 }
 0x248   : > { %v1580_v7 = vsel %vm1564_vm9, %v1545_v59, %v1572_v29  ;;  %v3723_v59 = vstv %s2826_s12  ;;  %s2828_s12 = sld [smem:[#allocation2 + $0x3]] }
 0x24b   : > { %v1546_v1 = vpop.f32.mrf.mxu1 }
 0x24c   : > { %v1547_v3 = vadd.f32 %v1546_v1, %v3658_v47  ;;  %v3728_v1 = vld [vmem:[%s4298_s14] ss:$0 sm:$0xff] }
 0x24e   : > { %vm1565_vm10 = vcmp.ge.f32.partialorder %v1547_v3, 0.0  ;;  %v1573_v6 = vmul.f32 %v1547_v3, %v3650_v33 }
 0x250   : > { %v1581_v8 = vsel %vm1565_vm10, %v1547_v3, %v1573_v6  ;;  %vm2477_vm10 = vcmask 1043456  }
 0x251   : > { %v1588_v9 = vpack.c.bf16 %v1581_v8, %v1580_v7 }
 0x253   : > { %v1549_v15 = vpop.f32.mrf.mxu1  ;;  %2982 = vmatmul.msk.bf16.vlgmr.msrb.gmra.mxu2 %vm1278_vm0, %v1588_v9 }
 0x254   : > { %v1550_v10 = vadd.f32 %v1549_v15, %v3665_v24 }
 0x256   : > { %v1574_v40 = vmul.f32 %v1550_v10, %v3650_v33  ;;  %vm1566_vm11 = vcmp.ge.f32.partialorder %v1550_v10, 0.0 }
 0x258   : > { %v1582_v28 = vsel %vm1566_vm11, %v1550_v10, %v1574_v40  ;;  %vm2464_vm11 = vcmask 64512  }
 0x25b   : > { %v1551_v22 = vpop.f32.mrf.mxu1 }
 0x25c   : > { %v1552_v26 = vadd.f32 %v1551_v22, %v3669_v34 }
 0x25e   : > { %vm1567_vm12 = vcmp.ge.f32.partialorder %v1552_v26, 0.0  ;;  %v1575_v47 = vmul.f32 %v1552_v26, %v3650_v33 }
 0x260   : > { %v1583_v30 = vsel %vm1567_vm12, %v1552_v26, %v1575_v47 }
 0x261   : > { %v1589_v31 = vpack.c.bf16 %v1583_v30, %v1582_v28 }
 0x263   : > { %v1554_v35 = vpop.f32.mrf.mxu1  ;;  %2983 = vmatmul.msk.bf16.gmra.mxu2 %vm1278_vm0, %v1589_v31 }
 0x264   : > { %v1555_v36 = vadd.f32 %v1554_v35, %v1475_v0 }
 0x266   : > { %v1576_v38 = vmul.f32 %v1555_v36, %v3650_v33  ;;  %vm1568_vm13 = vcmp.ge.f32.partialorder %v1555_v36, 0.0 }
 0x268   : > { %v1584_v34 = vsel %vm1568_vm13, %v1555_v36, %v1576_v38 }
 0x26b   : > { %v1556_v12 = vpop.f32.mrf.mxu1 }
 0x26c   : > { %v1557_v24 = vadd.f32 %v1556_v12, %v1476_v18 }
 0x26e   : > { %vm1569_vm14 = vcmp.ge.f32.partialorder %v1557_v24, 0.0  ;;  %v1577_v20 = vmul.f32 %v1557_v24, %v3650_v33 }
 0x270   : > { %v3704_v39 = vsel %vm1569_vm14, %v1557_v24, %v1577_v20 }
 0x271   : > { %v1590_v42 = vpack.c.bf16 %v3704_v39, %v1584_v34 }
 0x273   : > { %v1559_v43 = vpop.f32.mrf.mxu1  ;;  %2984 = vmatmul.msk.bf16.gmra.mxu2 %vm1278_vm0, %v1590_v42 }
 0x274   : > { %v1560_v49 = vadd.f32 %v1559_v43, %v1477_v41  ;;  %v3720_v41 = vld [vmem:[%s4297_s13] ss:$0 sm:$0xff] }
 0x276   : > { %v1578_v0 = vmul.f32 %v1560_v49, %v3650_v33  ;;  %vm1570_vm15 = vcmp.ge.f32.partialorder %v1560_v49, 0.0 }
 0x278   : > { %v3710_v55 = vsel %vm1570_vm15, %v1560_v49, %v1578_v0  ;;  %v1787_v0 = vmul.f32 %v3491_v61, %v3582_v44 }
 0x27b   : > { %v1561_v17 = vpop.f32.mrf.mxu1 }
 0x27c   : > { %v1562_v53 = vadd.f32 %v1561_v17, %v1478_v45 }
 0x27e   : > { %vm1571_vm1 = vcmp.ge.f32.partialorder %v1562_v53, 0.0  ;;  %v1579_v18 = vmul.f32 %v1562_v53, %v3650_v33 }
 0x280   : > { %v3712_v57 = vsel %vm1571_vm1, %v1562_v53, %v1579_v18 }
 0x281   : > { %v1591_v58 = vpack.c.bf16 %v3712_v57, %v3710_v55 }
 0x283   : > { %2985 = vmatmul.msk.bf16.gmra.mxu2 %vm1278_vm0, %v1591_v58 }
 0x2d6   : > { %v1633_v45 = vpop.f32.mrf.mxu2 }
 0x2d7   : > { %v1634_v23 = vadd.f32 %v3720_v41, %v1633_v45 }
 0x2d9   : > { %v1653_v33 = vadd.f32 %v1634_v23, %v1580_v7 }
 0x2db   : > { %v1670_v29 = vmul.f32 %v3723_v59, %v1653_v33  ;;  %vm1661_vm2 = vcmp.ge.f32.partialorder %v1653_v33, 0.0 }
 0x2dd   : > { %v1678_v3 = vsel %vm1661_vm2, %v1653_v33, %v1670_v29  ;;  %v1803_v33 = vsel %vm1278_vm0, %v1787_v0, 0.0 }
 0x2de   : > { %v1635_v6 = vpop.f32.mrf.mxu2  ;;  %v1690_v9 = vmul.f32 %v3728_v1, %v1678_v3  ;;  %v1730_v3 = vmul.f32 %v3491_v61, %v3486_v60 }
 0x2df   : > { %v1636_v15 = vadd.f32 %v3720_v41, %v1635_v6 }
 0x2e0   : > { %v1698_v10 = vsel %vm1278_vm0, %v1690_v9, 0.0  ;;  %v1844_v9 = vmul.f32 %v3491_v61, %v3605_v54 }
 0x2e1   : > { %v1654_v22 = vadd.f32 %v1636_v15, %v1581_v8  ;;  %1699 = vadd.xlane.f32.xlu0 %v1698_v10  ;;  %v1842_v8 = vmul.f32 %v3491_v61, %v3591_v48 }
 0x2e3   : > { %v1671_v7 = vmul.f32 %v3723_v59, %v1654_v22  ;;  %vm1662_vm3 = vcmp.ge.f32.partialorder %v1654_v22, 0.0  ;;  %v1856_v43 = vsel %vm1278_vm0, %v1842_v8, 0.0 }
 0x2e5   : > { %v1679_v40 = vsel %vm1662_vm3, %v1654_v22, %v1671_v7 }
 0x2e6   : > { %v1638_v26 = vpop.f32.mrf.mxu2  ;;  %v1691_v47 = vmul.f32 %v3728_v1, %v1679_v40 }
 0x2e7   : > { %v1639_v31 = vadd.f32 %v3720_v41, %v1638_v26  ;;  %v1862_v26 = vsel %vm1278_vm0, %v1844_v9, 0.0 }
 0x2e8   : > { %v1701_v35 = vsel %vm1278_vm0, %v1691_v47, 0.0 }
 0x2e9   : > { %v1655_v36 = vadd.f32 %v1639_v31, %v1582_v28  ;;  %1702 = vadd.xlane.f32.xlu0 %v1701_v35  ;;  %v1789_v31 = vmul.f32 %v3491_v61, %v3595_v50  ;;  %v1788_v35 = vmul.f32 %v3491_v61, %v3586_v46 }
 0x2eb   : > { %v1672_v12 = vmul.f32 %v3723_v59, %v1655_v36  ;;  %vm1663_vm4 = vcmp.ge.f32.partialorder %v1655_v36, 0.0 }
 0x2ed   : > { %v1680_v38 = vsel %vm1663_vm4, %v1655_v36, %v1672_v12 }
 0x2ee   : > { %v1640_v24 = vpop.f32.mrf.mxu2  ;;  %v1692_v20 = vmul.f32 %v3728_v1, %v1680_v38  ;;  %v1809_v38 = vsel %vm1278_vm0, %v1789_v31, 0.0 }
 0x2ef   : > { %v1641_v42 = vadd.f32 %v3720_v41, %v1640_v24  ;;  %v1806_v24 = vsel %vm1278_vm0, %v1788_v35, 0.0  ;;  %v3799_v35 = vstv %s2829_s27  ;;  %s3814_s27 = scalar_lea.vmem %s4349_s10, %s3416_s29 }
 0x2f0   : > { %v1704_v49 = vsel %vm1278_vm0, %v1692_v20, 0.0 }
 0x2f1   : > { %v1656_v17 = vadd.f32 %v1641_v42, %v1583_v30  ;;  %1857 = vadd.xlane.f32.xlu0 %v1856_v43  ;;  %1705 = vadd.xlane.f32.xlu2 %v1704_v49  ;;  %v1733_v43 = vmul.f32 %v3491_v61, %v3534_v19 }
 0x2f3   : > { %v1673_v28 = vmul.f32 %v3723_v59, %v1656_v17  ;;  %vm1664_vm5 = vcmp.ge.f32.partialorder %v1656_v17, 0.0 }
 0x2f5   : > { %v1681_v53 = vsel %vm1664_vm5, %v1656_v17, %v1673_v28  ;;  %v1732_v17 = vmul.f32 %v3491_v61, %v3523_v13 }
 0x2f6   : > { %v1643_v18 = vpop.f32.mrf.mxu2  ;;  %v1693_v58 = vmul.f32 %v3728_v1, %v1681_v53  ;;  %v1755_v53 = vsel %vm1278_vm0, %v1733_v43, 0.0 }
 0x2f7   : > { %v1644_v45 = vadd.f32 %v3720_v41, %v1643_v18 }
 0x2f8   : > { %v1707_v23 = vsel %vm1278_vm0, %v1693_v58, 0.0 }
 0x2f9   : > { %v1657_v29 = vadd.f32 %v1644_v45, %v1584_v34  ;;  %1708 = vadd.xlane.f32.xlu0 %v1707_v23  ;;  %1804 = vadd.xlane.f32.xlu2 %v1803_v33  ;;  %v1746_v34 = vsel %vm1278_vm0, %v1730_v3, 0.0 }
 0x2fb   : > { %v1674_v30 = vmul.f32 %v3723_v59, %v1657_v29  ;;  %vm1665_vm6 = vcmp.ge.f32.partialorder %v1657_v29, 0.0 }
 0x2fd   : > { %v1682_v6 = vsel %vm1665_vm6, %v1657_v29, %v1674_v30  ;;  %v1790_v29 = vmul.f32 %v3491_v61, %v3600_v52 }
 0x2fe   : > { %v1645_v15 = vpop.f32.mrf.mxu2  ;;  %v1694_v10 = vmul.f32 %v3728_v1, %v1682_v6  ;;  %v1845_v6 = vmul.f32 %v3491_v61, %v3610_v56 }
 0x2ff   : > { %v1646_v22 = vadd.f32 %v3720_v41, %v1645_v15  ;;  %v1812_v3 = vsel %vm1278_vm0, %v1790_v29, 0.0 }
 0x300   : > { %v1710_v7 = vsel %vm1278_vm0, %v1694_v10, 0.0  ;;  %v1865_v15 = vsel %vm1278_vm0, %v1845_v6, 0.0 }
 0x301   : > { %v1658_v40 = vadd.f32 %v1646_v22, %v3704_v39  ;;  %1711 = vadd.xlane.f32.xlu1 %v1710_v7  ;;  %1747 = vadd.xlane.f32.xlu0 %v1746_v34  ;;  %v1855_v22 = vpop.xlane.xlu2 %1854  ;;  %v1849_v7 = vpop.xlane.xlu0 %1848 }
 0x302   : > { %1863 = vadd.xlane.f32.xlu2 %v1862_v26 }
 0x303   : > { %v1675_v47 = vmul.f32 %v3723_v59, %v1658_v40  ;;  %vm1666_vm7 = vcmp.ge.f32.partialorder %v1658_v40, 0.0 }
 0x305   : > { %v1683_v36 = vsel %vm1666_vm7, %v1658_v40, %v1675_v47 }
 0x306   : > { %v1648_v12 = vpop.f32.mrf.mxu2  ;;  %v1695_v8 = vmul.f32 %v3728_v1, %v1683_v36 }
 0x307   : > { %v1649_v39 = vadd.f32 %v3720_v41, %v1648_v12 }
 0x308   : > { %v1713_v20 = vsel %vm1278_vm0, %v1695_v8, 0.0 }
 0x309   : > { %v1659_v42 = vadd.f32 %v1649_v39, %v3710_v55  ;;  %1810 = vadd.xlane.f32.xlu1 %v1809_v38  ;;  %1807 = vadd.xlane.f32.xlu0 %v1806_v24  ;;  %v1752_v55 = vsel %vm1278_vm0, %v1732_v17, 0.0  ;;  %v3797_v40 = vpop.xlane.xlu2 %1744  ;;  %v1799_v26 = vpop.xlane.xlu0 %1798 }
 0x30a   : > { %1714 = vadd.xlane.f32.xlu2 %v1713_v20  ;;  %v2459_v20 = vld [vmem:[%s4305_s21] sm:$0xf] }
 0x30b   : > { %v1676_v49 = vmul.f32 %v3723_v59, %v1659_v42  ;;  %vm1667_vm8 = vcmp.ge.f32.partialorder %v1659_v42, 0.0  ;;  %v2479_v17 = vsel %vm2477_vm10, %v2459_v20, 0 }
 0x30c   : > { %2488 = vmatpush.bf16.msra.mxu2 %v2479_v17 }
 0x30d   : > { %v1684_v58 = vsel %vm1667_vm8, %v1659_v42, %v1676_v49 }
 0x30e   : > { %v1650_v28 = vpop.f32.mrf.mxu2  ;;  %v1696_v23 = vmul.f32 %v3728_v1, %v1684_v58 }
 0x30f   : > { %v1651_v0 = vadd.f32 %v3720_v41, %v1650_v28 }
 0x311   : > { %v1660_v18 = vadd.f32 %v1651_v0, %v3712_v57  ;;  %1756 = vadd.xlane.f32.xlu0 %v1755_v53  ;;  %v1716_v57 = vsel %vm1278_vm0, %v1696_v23, 0.0  ;;  %v1793_v31 = vpop.xlane.xlu2 %1792 }
 0x312   : > { %1753 = vadd.xlane.f32.xlu2 %v1752_v55 }
 0x313   : > { %v1677_v45 = vmul.f32 %v3723_v59, %v1660_v18  ;;  %vm1668_vm9 = vcmp.ge.f32.partialorder %v1660_v18, 0.0  ;;  %v1846_v59 = vmul.f32 %v3491_v61, %v3618_v63 }
 0x315   : > { %v1685_v33 = vsel %vm1668_vm9, %v1660_v18, %v1677_v45  ;;  %v1868_v9 = vsel %vm1278_vm0, %v1846_v59, 0.0 }
 0x316   : > { %v1697_v41 = vmul.f32 %v3728_v1, %v1685_v33  ;;  %v1736_v1 = vpop.xlane.xlu1 %1735 }
 0x318   : > { %v1719_v30 = vsel %vm1278_vm0, %v1697_v41, 0.0 }
 0x319   : > { %1720 = vadd.xlane.f32.xlu1 %v1719_v30  ;;  %1717 = vadd.xlane.f32.xlu0 %v1716_v57  ;;  %v1796_v53 = vpop.xlane.xlu2 %1795  ;;  %v3087_v57 = vld [vmem:[%s4300_s16 + $0x8] sm:$0xff] }
 0x31a   : > { %1813 = vadd.xlane.f32.xlu2 %v1812_v3  ;;  %2217 = vmatpush.bf16.msra.mxu3 %v3087_v57 }
 0x31e   : > { %v1739_v10 = vpop.xlane.xlu1 %1738 }
 0x321   : > { %1869 = vadd.xlane.f32.xlu1 %v1868_v9  ;;  %1866 = vadd.xlane.f32.xlu0 %v1865_v15 }
 0x326   : > { %v1852_v34 = vpop.xlane.xlu1 %1851 }
 0x32e   : > { %v1742_v47 = vpop.xlane.xlu1 %1741 }
 0x336   : > { %v3807_v42 = vpop.xlane.xlu1 %1801 }
 0x354   : > { %v1700_v61 = vpop.xlane.xlu0 %1699 }
 0x355   : > { %v1758_v36 = vadd.f32 %v1736_v1, %v1700_v61  ;;  %v1815_v12 = vadd.f32 %v1793_v31, %v1700_v61  ;;  %v1871_v8 = vadd.f32 %v1849_v7, %v1700_v61  ;;  %v2447_v7 = vld [vmem:[%s3814_s27] sm:$0xff]  ;;  %v3823_v31 = vpop.xlane.xlu1 %1750 }
 0x357   : > { %v1767_v39 = vadd.f32 %v3799_v35, %v1758_v36  ;;  %v1823_v38 = vadd.f32 %v1815_v12, %v3799_v35  ;;  %v1879_v24 = vadd.f32 %v1871_v8, %v3799_v35 }
 0x359   : > { %v1775_v43 = vmax.f32 %v1767_v39, 0.0  ;;  %v1831_v49 = vmax.f32 %v1823_v38, 0.0  ;;  %v1887_v28 = vmax.f32 %v1879_v24, 0.0 }
 0x35b   : > { %v1895_v0 = vmax.f32 %v1775_v43, %v1831_v49 }
 0x35c   : > { %v1703_v18 = vpop.xlane.xlu0 %1702 }
 0x35d   : > { %v1903_v55 = vmax.f32 %v1895_v0, %v1887_v28  ;;  %v1759_v58 = vadd.f32 %v1739_v10, %v1703_v18  ;;  %v1816_v45 = vadd.f32 %v1796_v53, %v1703_v18  ;;  %v1872_v23 = vadd.f32 %v1852_v34, %v1703_v18  ;;  %v2448_v34 = vld [vmem:[%s3814_s27 + $0x8] sm:$0xff] }
 0x35e   : > { %v2455_v61 = vpack.c.bf16 %v2448_v34, %v2447_v7 }
 0x35f   : > { %v1911_v33 = vsub.f32 %v1775_v43, %v1903_v55  ;;  %v1935_v29 = vsub.f32 %v1831_v49, %v1903_v55  ;;  %v1959_v41 = vsub.f32 %v1887_v28, %v1903_v55  ;;  %v1768_v30 = vadd.f32 %v3799_v35, %v1759_v58 }
 0x360   : > { %v1824_v3 = vadd.f32 %v1816_v45, %v3799_v35  ;;  %v1880_v59 = vadd.f32 %v1872_v23, %v3799_v35  ;;  %3022 = vmatmul.msk.bf16.vlgmr.msra.gmra.mxu2 %vm2464_vm11, %v2455_v61 }
 0x361   : > { %v1919_v6 = vmul.f32 1.442695, %v1911_v33  ;;  %v1943_v9 = vmul.f32 1.442695, %v1935_v29  ;;  %v1967_v15 = vmul.f32 1.442695, %v1959_v41  ;;  %v1861_v33 = vpop.xlane.xlu1 %1860 }
 0x362   : > { %v1776_v1 = vmax.f32 %v1768_v30, 0.0  ;;  %v1832_v10 = vmax.f32 %v1824_v3, 0.0  ;;  %v1888_v36 = vmax.f32 %v1880_v59, 0.0 }
 0x363   : > { %3132 = vpow2.f32 %v1919_v6 }
 0x364   : > { %3134 = vpow2.f32 %v1943_v9  ;;  %v1896_v12 = vmax.f32 %v1776_v1, %v1832_v10  ;;  %v1858_v8 = vpop.xlane.xlu0 %1857  ;;  %v1706_v39 = vpop.xlane.xlu2 %1705 }
 0x365   : > { %v1760_v38 = vadd.f32 %v1742_v47, %v1706_v39  ;;  %v1817_v24 = vadd.f32 %v1799_v26, %v1706_v39  ;;  %v1873_v20 = vadd.f32 %v1855_v22, %v1706_v39  ;;  %3136 = vpow2.f32 %v1967_v15 }
 0x366   : > { %v1904_v43 = vmax.f32 %v1896_v12, %v1888_v36 }
 0x367   : > { %v1769_v49 = vadd.f32 %v3799_v35, %v1760_v38  ;;  %v1825_v17 = vadd.f32 %v1817_v24, %v3799_v35  ;;  %v1881_v28 = vadd.f32 %v1873_v20, %v3799_v35  ;;  %v2449_v38 = vld [vmem:[%s3814_s27 + $0x10] sm:$0xff]  ;;  %v2450_v24 = vld [vmem:[%s3814_s27 + $0x18] sm:$0xff] }
 0x368   : > { %v1912_v0 = vsub.f32 %v1776_v1, %v1904_v43  ;;  %v1936_v53 = vsub.f32 %v1832_v10, %v1904_v43  ;;  %v1960_v18 = vsub.f32 %v1888_v36, %v1904_v43 }
 0x369   : > { %v3829_v55 = vpop.eup %3132  ;;  %v1777_v58 = vmax.f32 %v1769_v49, 0.0  ;;  %v1833_v45 = vmax.f32 %v1825_v17, 0.0  ;;  %v1889_v41 = vmax.f32 %v1881_v28, 0.0  ;;  %v2456_v49 = vpack.c.bf16 %v2450_v24, %v2449_v38 }
 0x36a   : > { %v3831_v47 = vpop.eup %3134  ;;  %v1921_v22 = vmul.f32 1.442695, %v1912_v0  ;;  %v1945_v26 = vmul.f32 1.442695, %v1936_v53  ;;  %v1969_v23 = vmul.f32 1.442695, %v1960_v18 }
 0x36b   : > { %v1983_v29 = vadd.f32 %v3831_v47, %v3829_v55  ;;  %v1897_v30 = vmax.f32 %v1777_v58, %v1833_v45  ;;  %v3835_v57 = vpop.eup %3136 }
 0x36c   : > { %3138 = vpow2.f32 %v1921_v22  ;;  %v1709_v3 = vpop.xlane.xlu0 %1708  ;;  %v1805_v59 = vpop.xlane.xlu2 %1804 }
 0x36d   : > { %v3838_v6 = vadd.f32 %v3835_v57, %v1983_v29  ;;  %3140 = vpow2.f32 %v1945_v26  ;;  %v1905_v9 = vmax.f32 %v1897_v30, %v1889_v41  ;;  %v1761_v15 = vadd.f32 %v3797_v40, %v1709_v3 }
 0x36e   : > { %3142 = vpow2.f32 %v1969_v23  ;;  %v1818_v1 = vadd.f32 %v3807_v42, %v1709_v3  ;;  %v1874_v10 = vadd.f32 %v1858_v8, %v1709_v3 }
 0x36f   : > { %3144 = vrcp.f32 %v3838_v6  ;;  %v1913_v7 = vsub.f32 %v1777_v58, %v1905_v9  ;;  %v1937_v34 = vsub.f32 %v1833_v45, %v1905_v9  ;;  %v1961_v61 = vsub.f32 %v1889_v41, %v1905_v9  ;;  %v3086_v41 = vld [vmem:[%s4300_s16] sm:$0xff] }
 0x370   : > { %v1770_v36 = vadd.f32 %v3799_v35, %v1761_v15  ;;  %v1826_v12 = vadd.f32 %v1818_v1, %v3799_v35  ;;  %v1882_v39 = vadd.f32 %v1874_v10, %v3799_v35  ;;  %3023 = vmatmul.msk.bf16.gmra.mxu2 %vm2464_vm11, %v2456_v49  ;;  %v2008_v3 = vand.u32 2147483647, %v3838_v6  ;;  %2218 = vmatpush.bf16.msra.mxu3 %v3086_v41 }
 0x371   : > { %v1923_v40 = vmul.f32 1.442695, %v1913_v7  ;;  %v1947_v43 = vmul.f32 1.442695, %v1937_v34  ;;  %v1971_v8 = vmul.f32 1.442695, %v1961_v61  ;;  %vm2004_vm12 = vweird.f32 %v3838_v6 }
 0x372   : > { %v3848_v20 = vpop.eup %3138  ;;  %v1778_v17 = vmax.f32 %v1770_v36, 0.0  ;;  %v1834_v28 = vmax.f32 %v1826_v12, 0.0  ;;  %v1890_v22 = vmax.f32 %v1882_v39, 0.0  ;;  %v2010_v7 = vand.u32 2147483648, %v3838_v6 }
 0x373   : > { %v3850_v42 = vpop.eup %3140  ;;  %3146 = vpow2.f32 %v1923_v40  ;;  %vm3875_vm14 = vcmp.eq.f32.partialorder %v2008_v3, 8.507059e+37 }
 0x374   : > { %v3852_v0 = vpop.eup %3142  ;;  %v1984_v53 = vadd.f32 %v3850_v42, %v3848_v20  ;;  %v1712_v18 = vpop.xlane.xlu1 %1711  ;;  %3148 = vpow2.f32 %v1947_v43  ;;  %v1898_v26 = vmax.f32 %v1778_v17, %v1834_v28 }
 0x375   : > { %v1748_v58 = vpop.xlane.xlu0 %1747  ;;  %v3145_v45 = vpop.eup %3144  ;;  %v1819_v23 = vadd.f32 %v1805_v59, %v1712_v18  ;;  %v1875_v15 = vadd.f32 %v1861_v33, %v1712_v18  ;;  %3150 = vpow2.f32 %v1971_v8 }
 0x376   : > { %v3856_v29 = vpop.xlane.xlu2 %1863  ;;  %v2000_v30 = vmul.f32 %v3145_v45, %v3838_v6  ;;  %v3865_v9 = vadd.f32 %v3852_v0, %v1984_v53  ;;  %v1906_v1 = vmax.f32 %v1898_v26, %v1890_v22  ;;  %v1762_v10 = vadd.f32 %v1748_v58, %v1712_v18 }
 0x377   : > { %v3871_v12 = vadd.f32 %v1819_v23, %v3799_v35  ;;  %vm2005_vm13 = vweird.f32 %v3145_v45  ;;  %v3880_v24 = vadd.f32 %v1875_v15, %v3799_v35  ;;  %v2011_v53 = vor.u32 1.1754944e-38, %v2010_v7 }
 0x378   : > { %v2001_v59 = vsub.f32 1.0, %v2000_v30  ;;  %3152 = vrcp.f32 %v3865_v9  ;;  %v1914_v34 = vsub.f32 %v1778_v17, %v1906_v1  ;;  %v1938_v61 = vsub.f32 %v1834_v28, %v1906_v1  ;;  %vm2006_vm15 = vmor %vm2004_vm12, %vm2005_vm13 }
 0x379   : > { %v1962_v36 = vsub.f32 %v1890_v22, %v1906_v1  ;;  %v3873_v39 = vpop.eup %3146  ;;  %v2022_v43 = vand.u32 2147483647, %v3865_v9  ;;  %v1771_v17 = vadd.f32 %v3799_v35, %v1762_v10  ;;  %vm2018_vm1 = vweird.f32 %v3865_v9 }
 0x37a   : > { %v2002_v33 = vmul.f32 %v3145_v45, %v2001_v59  ;;  %v3882_v40 = vpop.eup %3148  ;;  %v1925_v49 = vmul.f32 1.442695, %v1914_v34  ;;  %v1949_v8 = vmul.f32 1.442695, %v1938_v61  ;;  %v2024_v23 = vand.u32 2147483648, %v3865_v9 }
 0x37b   : > { %v1985_v18 = vadd.f32 %v3882_v40, %v3873_v39  ;;  %v1973_v58 = vmul.f32 1.442695, %v1962_v36  ;;  %v3888_v26 = vpop.eup %3150  ;;  %v1835_v41 = vmax.f32 %v3871_v12, 0.0  ;;  %v1779_v30 = vmax.f32 %v1771_v17, 0.0 }
 0x37c   : > { %v2003_v28 = vadd.f32 %v3145_v45, %v2002_v33  ;;  %3154 = vpow2.f32 %v1925_v49  ;;  %vm3902_vm2 = vcmp.eq.f32.partialorder %v2022_v43, 8.507059e+37  ;;  %v2451_v43 = vld [vmem:[%s3814_s27 + $0x20] sm:$0xff]  ;;  %v2025_v17 = vor.u32 1.1754944e-38, %v2024_v23 }
 0x37d   : > { %v1808_v22 = vpop.xlane.xlu0 %1807  ;;  %v3896_v10 = vadd.f32 %v3888_v26, %v1985_v18  ;;  %3156 = vpow2.f32 %v1949_v8  ;;  %v1899_v33 = vmax.f32 %v1779_v30, %v1835_v41  ;;  %v2452_v8 = vld [vmem:[%s3814_s27 + $0x28] sm:$0xff] }
 0x37e   : > { %v1715_v3 = vpop.xlane.xlu2 %1714  ;;  %v3153_v15 = vpop.eup %3152  ;;  %v2007_v1 = vsel %vm2006_vm15, %v3145_v45, %v2003_v28  ;;  %3158 = vpow2.f32 %v1973_v58  ;;  %v1891_v45 = vmax.f32 %v3880_v24, 0.0 }
 0x37f   : > { %v1763_v6 = vadd.f32 %v3823_v31, %v1715_v3  ;;  %v2012_v59 = vsel %vm3875_vm14, %v2011_v53, %v2007_v1  ;;  %v2014_v7 = vmul.f32 %v3153_v15, %v3865_v9  ;;  %3160 = vrcp.f32 %v3896_v10  ;;  %v1811_v1 = vpop.xlane.xlu1 %1810 }
 0x380   : > { %v2111_v61 = vmul.f32 %v3829_v55, %v2012_v59  ;;  %v2127_v36 = vmul.f32 %v3831_v47, %v2012_v59  ;;  %v2151_v12 = vmul.f32 %v3835_v57, %v2012_v59  ;;  %v1820_v49 = vadd.f32 %v1808_v22, %v1715_v3 }
 0x381   : > { %v2015_v31 = vsub.f32 1.0, %v2014_v7  ;;  %v1772_v38 = vadd.f32 %v3799_v35, %v1763_v6  ;;  %v1876_v28 = vadd.f32 %v3856_v29, %v1715_v3  ;;  %vm2019_vm3 = vweird.f32 %v3153_v15 }
 0x382   : > { %v2119_v24 = vmul.f32 %v2111_v61, %v3493_v62  ;;  %v2135_v55 = vmul.f32 %v2127_v36, %v3543_v25  ;;  %v3917_v53 = vpop.eup %3154  ;;  %v1907_v57 = vmax.f32 %v1899_v33, %v1891_v45  ;;  %v1828_v18 = vadd.f32 %v1820_v49, %v3799_v35  ;;  %vm2020_vm4 = vmor %vm2018_vm1, %vm2019_vm3 }
 0x383   : > { %v2016_v47 = vmul.f32 %v3153_v15, %v2015_v31  ;;  %v3920_v58 = vpop.eup %3156  ;;  %v1780_v22 = vmax.f32 %v1772_v38, 0.0  ;;  %v1884_v6 = vadd.f32 %v1876_v28, %v3799_v35  ;;  %v2159_v29 = vmul.f32 %v2151_v12, %v3501_v2 }
 0x384   : > { %v2457_v3 = vpack.c.bf16 %v2452_v8, %v2451_v43  ;;  %v3924_v62 = vpop.eup %3158  ;;  %v1986_v59 = vadd.f32 %v3920_v58, %v3917_v53  ;;  %v1915_v7 = vsub.f32 %v1779_v30, %v1907_v57  ;;  %v1939_v61 = vsub.f32 %v1835_v41, %v1907_v57 }
 0x385   : > { %v1757_v23 = vpop.xlane.xlu0 %1756  ;;  %v2017_v25 = vadd.f32 %v3153_v15, %v2016_v47  ;;  %v3928_v31 = vpop.eup %3160  ;;  %v1963_v33 = vsub.f32 %v1891_v45, %v1907_v57  ;;  %v1836_v38 = vmax.f32 %v1828_v18, 0.0  ;;  %v1892_v49 = vmax.f32 %v1884_v6, 0.0 }
 0x386   : > { %v1754_v36 = vpop.xlane.xlu2 %1753  ;;  %v2143_v2 = vadd.f32 %v2135_v55, %v2119_v24  ;;  %3024 = vmatmul.msk.bf16.gmra.mxu2 %vm2464_vm11, %v2457_v3  ;;  %v3935_v43 = vadd.f32 %v3924_v62, %v1986_v59  ;;  %v1927_v8 = vmul.f32 1.442695, %v1915_v7  ;;  %v1951_v30 = vmul.f32 1.442695, %v1939_v61 }
 0x387   : > { %v2021_v12 = vsel %vm2020_vm4, %v3153_v15, %v2017_v25  ;;  %v1975_v28 = vmul.f32 1.442695, %v1963_v33  ;;  %v1900_v47 = vmax.f32 %v1780_v22, %v1836_v38  ;;  %v2028_v9 = vmul.f32 %v3928_v31, %v3896_v10 }
 0x388   : > { %v2026_v41 = vsel %vm3902_vm2, %v2025_v17, %v2021_v12  ;;  %3162 = vrcp.f32 %v3935_v43  ;;  %v3945_v57 = vadd.f32 %v2159_v29, %v2143_v2  ;;  %vm2033_vm5 = vweird.f32 %v3928_v31 }
 0x389   : > { %v2112_v45 = vmul.f32 %v3848_v20, %v2026_v41  ;;  %v2128_v24 = vmul.f32 %v3850_v42, %v2026_v41  ;;  %v2152_v55 = vmul.f32 %v3852_v0, %v2026_v41  ;;  %3164 = vpow2.f32 %v1927_v8 }
 0x38a   : > { %v1908_v15 = vmax.f32 %v1900_v47, %v1892_v49  ;;  %v2029_v18 = vsub.f32 1.0, %v2028_v9  ;;  %3166 = vpow2.f32 %v1951_v30  ;;  %v2036_v47 = vand.u32 2147483647, %v3896_v10 }
 0x38b   : > { %v2120_v34 = vmul.f32 %v2112_v45, %v3508_v5  ;;  %v2136_v17 = vmul.f32 %v2128_v24, %v3547_v27  ;;  %v2160_v6 = vmul.f32 %v2152_v55, %v3519_v11  ;;  %3168 = vpow2.f32 %v1975_v28 }
 0x38c   : > { %v1916_v20 = vsub.f32 %v1780_v22, %v1908_v15  ;;  %v1940_v3 = vsub.f32 %v1836_v38, %v1908_v15  ;;  %v1964_v42 = vsub.f32 %v1892_v49, %v1908_v15  ;;  %v1721_v25 = vpop.xlane.xlu1 %1720  ;;  %v2030_v38 = vmul.f32 %v3928_v31, %v2029_v18 }
 0x38d   : > { %v1718_v0 = vpop.xlane.xlu0 %1717  ;;  %v1765_v59 = vadd.f32 %v1757_v23, %v1721_v25  ;;  %v2144_v29 = vadd.f32 %v2136_v17, %v2120_v34  ;;  %vm2032_vm6 = vweird.f32 %v3896_v10  ;;  %v2038_v34 = vand.u32 2147483648, %v3896_v10 }
 0x38e   : > { %v1764_v7 = vadd.f32 %v1754_v36, %v1718_v0  ;;  %v1821_v61 = vadd.f32 %v1811_v1, %v1718_v0  ;;  %v1814_v33 = vpop.xlane.xlu2 %1813  ;;  %v1929_v2 = vmul.f32 1.442695, %v1916_v20  ;;  %v1953_v12 = vmul.f32 1.442695, %v1940_v3  ;;  %v3950_v5 = vpop.eup %3162  ;;  %vm2034_vm7 = vmor %vm2032_vm6, %vm2033_vm5 }
 0x38f   : > { %v1977_v8 = vmul.f32 1.442695, %v1964_v42  ;;  %v1822_v30 = vadd.f32 %v1814_v33, %v1721_v25  ;;  %v3953_v27 = vadd.f32 %v3799_v35, %v1765_v59  ;;  %v3961_v23 = vadd.f32 %v2160_v6, %v2144_v29  ;;  %v3963_v1 = vpop.eup %3164 }
 0x390   : > { %v3956_v11 = vadd.f32 %v3799_v35, %v1764_v7  ;;  %v3959_v22 = vadd.f32 %v1821_v61, %v3799_v35  ;;  %3170 = vpow2.f32 %v1929_v2  ;;  %v3970_v49 = vpop.eup %3166  ;;  %v2031_v18 = vadd.f32 %v3928_v31, %v2030_v38  ;;  %v2454_v38 = vld [vmem:[%s3814_s27 + $0x38] sm:$0xff] }
 0x391   : > { %v3966_v36 = vadd.f32 %v1822_v30, %v3799_v35  ;;  %3172 = vpow2.f32 %v1953_v12  ;;  %v3975_v9 = vpop.eup %3168  ;;  %v1987_v45 = vadd.f32 %v3970_v49, %v3963_v1  ;;  %v1782_v24 = vmax.f32 %v3953_v27, 0.0 }
 0x392   : > { %v1781_v41 = vmax.f32 %v3956_v11, 0.0  ;;  %v1837_v28 = vmax.f32 %v3959_v22, 0.0  ;;  %v2175_v15 = vpack.c.bf16 %v3961_v23, %v3945_v57  ;;  %3174 = vpow2.f32 %v1977_v8 }
 0x393   : > { %v1838_v55 = vmax.f32 %v3966_v36, 0.0  ;;  %v3987_v17 = vadd.f32 %v3975_v9, %v1987_v45  ;;  %v2042_v42 = vmul.f32 %v3950_v5, %v3935_v43  ;;  %v2035_v61 = vsel %vm2034_vm7, %v3928_v31, %v2031_v18  ;;  %v2453_v36 = vld [vmem:[%s3814_s27 + $0x30] sm:$0xff] }
 0x394   : > { %2994 = vmatmul.msk.bf16.vlgmr.msra.gmra.mxu3 %vm1278_vm0, %v2175_v15  ;;  %v1870_v6 = vpop.xlane.xlu1 %1869  ;;  %v1901_v3 = vmax.f32 %v1781_v41, %v1837_v28  ;;  %v2039_v10 = vor.u32 1.1754944e-38, %v2038_v34  ;;  %vm2037_vm8 = vcmp.eq.f32.partialorder %v2036_v47, 8.507059e+37  ;;  %v2050_v12 = vand.u32 2147483647, %v3935_v43 }
 0x395   : > { %v1867_v20 = vpop.xlane.xlu0 %1866  ;;  %v1878_v59 = vadd.f32 %v1870_v6, %v1721_v25  ;;  %v1902_v29 = vmax.f32 %v1782_v24, %v1838_v55  ;;  %v2043_v2 = vsub.f32 1.0, %v2042_v42  ;;  %vm2047_vm9 = vweird.f32 %v3950_v5 }
 0x396   : > { %v1877_v7 = vadd.f32 %v1867_v20, %v1718_v0  ;;  %v3995_v33 = vpop.eup %3170  ;;  %v2040_v25 = vsel %vm2037_vm8, %v2039_v10, %v2035_v61  ;;  %v2052_v0 = vand.u32 2147483648, %v3935_v43  ;;  %3176 = vrcp.f32 %v3987_v17 }
 0x397   : > { %v3998_v8 = vpop.eup %3172  ;;  %v1886_v30 = vadd.f32 %v1878_v59, %v3799_v35  ;;  %v2044_v11 = vmul.f32 %v3950_v5, %v2043_v2  ;;  %v2113_v22 = vmul.f32 %v3873_v39, %v2040_v25  ;;  %v2129_v15 = vmul.f32 %v3882_v40, %v2040_v25 }
 0x398   : > { %v1885_v27 = vadd.f32 %v1877_v7, %v3799_v35  ;;  %v1988_v31 = vadd.f32 %v3998_v8, %v3995_v33  ;;  %v4010_v47 = vpop.eup %3174  ;;  %vm2046_vm10 = vweird.f32 %v3935_v43  ;;  %vm4019_vm12 = vcmp.eq.f32.partialorder %v2050_v12, 8.507059e+37 }
 0x399   : > { %v1894_v45 = vmax.f32 %v1886_v30, 0.0  ;;  %v2045_v34 = vadd.f32 %v3950_v5, %v2044_v11  ;;  %vm2048_vm13 = vmor %vm2046_vm10, %vm2047_vm9  ;;  %v2053_v42 = vor.u32 1.1754944e-38, %v2052_v0  ;;  %v2458_v59 = vpack.c.bf16 %v2454_v38, %v2453_v36 }
 0x39a   : > { %v1893_v35 = vmax.f32 %v1885_v27, 0.0  ;;  %v4015_v18 = vadd.f32 %v4010_v47, %v1988_v31  ;;  %v2121_v7 = vmul.f32 %v2113_v22, %v3525_v14  ;;  %v2137_v61 = vmul.f32 %v2129_v15, %v3558_v32 }
 0x39b   : > { %v1910_v39 = vmax.f32 %v1902_v29, %v1894_v45  ;;  %v2049_v40 = vsel %vm2048_vm13, %v3950_v5, %v2045_v34  ;;  %3025 = vmatmul.msk.bf16.gmra.mxu2 %vm2464_vm11, %v2458_v59  ;;  %v2153_v27 = vmul.f32 %v3888_v26, %v2040_v25  ;;  %v2064_v6 = vand.u32 2147483647, %v3987_v17 }
 0x39c   : > { %v1909_v20 = vmax.f32 %v1901_v3, %v1893_v35  ;;  %3178 = vrcp.f32 %v4015_v18  ;;  %v2054_v30 = vsel %vm4019_vm12, %v2053_v42, %v2049_v40  ;;  %v3177_v0 = vpop.eup %3176  ;;  %vm2060_vm15 = vweird.f32 %v3987_v17 }
 0x39d   : > { %v1918_v43 = vsub.f32 %v1782_v24, %v1910_v39  ;;  %v1942_v10 = vsub.f32 %v1838_v55, %v1910_v39  ;;  %v1966_v2 = vsub.f32 %v1894_v45, %v1910_v39  ;;  %v2114_v14 = vmul.f32 %v3917_v53, %v2054_v30 }
 0x39e   : > { %v1917_v12 = vsub.f32 %v1781_v41, %v1909_v20  ;;  %v1941_v3 = vsub.f32 %v1837_v28, %v1909_v20  ;;  %v1965_v29 = vsub.f32 %v1893_v35, %v1909_v20  ;;  %v2130_v24 = vmul.f32 %v3920_v58, %v2054_v30 }
 0x39f   : > { %v1933_v31 = vmul.f32 1.442695, %v1918_v43  ;;  %v1957_v5 = vmul.f32 1.442695, %v1942_v10  ;;  %v1981_v11 = vmul.f32 1.442695, %v1966_v2  ;;  %v2145_v55 = vadd.f32 %v2137_v61, %v2121_v7 }
 0x3a0   : > { %v1931_v32 = vmul.f32 1.442695, %v1917_v12  ;;  %v1955_v41 = vmul.f32 1.442695, %v1941_v3  ;;  %v2122_v28 = vmul.f32 %v2114_v14, %v3537_v21  ;;  %v2154_v22 = vmul.f32 %v3924_v62, %v2054_v30 }
 0x3a1   : > { %3180 = vpow2.f32 %v1933_v31  ;;  %v2138_v26 = vmul.f32 %v2130_v24, %v3567_v37  ;;  %v2056_v25 = vmul.f32 %v3177_v0, %v3987_v17  ;;  %v1979_v38 = vmul.f32 1.442695, %v1965_v29  ;;  %v3093_v31 = vld [vmem:[%s4307_s23 + $0x8] sm:$0xff] }
 0x3a2   : > { %v3179_v36 = vpop.eup %3178  ;;  %3182 = vpow2.f32 %v1957_v5  ;;  %v2161_v53 = vmul.f32 %v2153_v27, %v3528_v16  ;;  %v2162_v45 = vmul.f32 %v2154_v22, %v3591_v48  ;;  %vm2061_vm14 = vweird.f32 %v3177_v0  ;;  %2577 = vmatpush.bf16.msrb.mxu3 %v3093_v31 }
 0x3a3   : > { %3184 = vpow2.f32 %v1981_v11  ;;  %v2146_v58 = vadd.f32 %v2138_v26, %v2122_v28  ;;  %v2057_v35 = vsub.f32 1.0, %v2056_v25  ;;  %v2070_v15 = vmul.f32 %v3179_v36, %v4015_v18  ;;  %vm2062_vm2 = vmor %vm2060_vm15, %vm2061_vm14 }
 0x3a4   : > { %3186 = vpow2.f32 %v1931_v32  ;;  %v4042_v21 = vadd.f32 %v2161_v53, %v2145_v55  ;;  %v2066_v62 = vand.u32 2147483648, %v3987_v17  ;;  %v2078_v48 = vand.u32 2147483647, %v4015_v18 }
 0x3a5   : > { %3188 = vpow2.f32 %v1955_v41  ;;  %v4045_v37 = vadd.f32 %v2162_v45, %v2146_v58  ;;  %v2058_v34 = vmul.f32 %v3177_v0, %v2057_v35  ;;  %v2071_v39 = vsub.f32 1.0, %v2070_v15 }
 0x3a6   : > { %3190 = vpow2.f32 %v1979_v38  ;;  %v2080_v20 = vand.u32 2147483648, %v4015_v18  ;;  %vm2075_vm1 = vweird.f32 %v3179_v36  ;;  %v2067_v17 = vor.u32 1.1754944e-38, %v2066_v62 }
 0x3a7   : > { %v4048_v16 = vpop.eup %3180  ;;  %v2176_v59 = vpack.c.bf16 %v4045_v37, %v4042_v21  ;;  %v2059_v40 = vadd.f32 %v3177_v0, %v2058_v34  ;;  %v2072_v7 = vmul.f32 %v3179_v36, %v2071_v39  ;;  %vm2065_vm3 = vcmp.eq.f32.partialorder %v2064_v6, 8.507059e+37 }
 0x3a8   : > { %v4053_v42 = vpop.eup %3182  ;;  %vm2074_vm4 = vweird.f32 %v4015_v18  ;;  %vm2079_vm6 = vcmp.eq.f32.partialorder %v2078_v48, 8.507059e+37  ;;  %v2081_v27 = vor.u32 1.1754944e-38, %v2080_v20 }
 0x3a9   : > { %v4057_v61 = vpop.eup %3184  ;;  %v1990_v43 = vadd.f32 %v4053_v42, %v4048_v16  ;;  %2995 = vmatmul.msk.bf16.gmra.mxu3 %vm1278_vm0, %v2176_v59  ;;  %v2063_v2 = vsel %vm2062_vm2, %v3177_v0, %v2059_v40  ;;  %v2073_v12 = vadd.f32 %v3179_v36, %v2072_v7  ;;  %vm2076_vm5 = vmor %vm2074_vm4, %vm2075_vm1  ;;  %v3089_v0 = vld [vmem:[%s4302_s18 + $0x8] sm:$0xff] }
 0x3aa   : > { %v4062_v10 = vpop.eup %3186  ;;  %v2068_v30 = vsel %vm2065_vm3, %v2067_v17, %v2063_v2  ;;  %2335 = vmatpush.bf16.msra.mxu0 %v3089_v0 }
 0x3ab   : > { %v4066_v3 = vpop.eup %3188  ;;  %v1998_v29 = vadd.f32 %v4057_v61, %v1990_v43  ;;  %v2077_v18 = vsel %vm2076_vm5, %v3179_v36, %v2073_v12  ;;  %v2115_v11 = vmul.f32 %v3963_v1, %v2068_v30  ;;  %v2131_v14 = vmul.f32 %v3970_v49, %v2068_v30 }
 0x3ac   : > { %v1989_v5 = vadd.f32 %v4066_v3, %v4062_v10  ;;  %v3191_v32 = vpop.eup %3190  ;;  %v2082_v24 = vsel %vm2079_vm6, %v2081_v27, %v2077_v18  ;;  %v2155_v55 = vmul.f32 %v3975_v9, %v2068_v30 }
 0x3ad   : > { %3192 = vrcp.f32 %v1998_v29  ;;  %v2116_v28 = vmul.f32 %v3995_v33, %v2082_v24  ;;  %v2123_v22 = vmul.f32 %v2115_v11, %v3486_v60  ;;  %v2132_v26 = vmul.f32 %v3998_v8, %v2082_v24 }
 0x3ae   : > { %v1997_v41 = vadd.f32 %v3191_v32, %v1989_v5  ;;  %v2139_v36 = vmul.f32 %v2131_v14, %v3582_v44  ;;  %v2156_v1 = vmul.f32 %v4010_v47, %v2082_v24  ;;  %v2163_v53 = vmul.f32 %v2155_v55, %v3598_v51 }
 0x3af   : > { %v2124_v49 = vmul.f32 %v2116_v28, %v3506_v4  ;;  %v2140_v25 = vmul.f32 %v2132_v26, %v3586_v46  ;;  %v2108_v15 = vand.u32 2147483648, %v1998_v29  ;;  %v2106_v62 = vand.u32 2147483647, %v1998_v29 }
 0x3b0   : > { %3194 = vrcp.f32 %v1997_v41  ;;  %v2147_v38 = vadd.f32 %v2139_v36, %v2123_v22  ;;  %v2164_v45 = vmul.f32 %v2156_v1, %v3605_v54  ;;  %v2094_v51 = vand.u32 2147483648, %v1997_v41 }
 0x3b1   : > { %v2148_v9 = vadd.f32 %v2140_v25, %v2124_v49  ;;  %vm2102_vm8 = vweird.f32 %v1998_v29  ;;  %v2092_v39 = vand.u32 2147483647, %v1997_v41  ;;  %v2109_v48 = vor.u32 1.1754944e-38, %v2108_v15 }
 0x3b2   : > { %v4089_v58 = vadd.f32 %v2163_v53, %v2147_v38  ;;  %vm2107_vm12 = vcmp.eq.f32.partialorder %v2106_v62, 8.507059e+37  ;;  %vm2088_vm13 = vweird.f32 %v1997_v41  ;;  %v2095_v7 = vor.u32 1.1754944e-38, %v2094_v51 }
 0x3b3   : > { %v3193_v33 = vpop.eup %3192  ;;  %v4091_v60 = vadd.f32 %v2164_v45, %v2148_v9  ;;  %vm2093_vm15 = vcmp.eq.f32.partialorder %v2092_v39, 8.507059e+37 }
 0x3b4   : > { %v2098_v8 = vmul.f32 %v3193_v33, %v1998_v29  ;;  %vm2103_vm7 = vweird.f32 %v3193_v33 }
 0x3b5   : > { %v2177_v47 = vpack.c.bf16 %v4091_v60, %v4089_v58  ;;  %vm2104_vm10 = vmor %vm2102_vm8, %vm2103_vm7 }
 0x3b6   : > { %v3195_v44 = vpop.eup %3194  ;;  %v2099_v35 = vsub.f32 1.0, %v2098_v8 }
 0x3b7   : > { %v2084_v4 = vmul.f32 %v3195_v44, %v1997_v41  ;;  %vm2089_vm9 = vweird.f32 %v3195_v44 }
 0x3b8   : > { %v2100_v46 = vmul.f32 %v3193_v33, %v2099_v35  ;;  %vm2090_vm14 = vmor %vm2088_vm13, %vm2089_vm9 }
 0x3b9   : > { %v2085_v34 = vsub.f32 1.0, %v2084_v4  ;;  %2996 = vmatmul.msk.bf16.gmra.mxu3 %vm1278_vm0, %v2177_v47 }
 0x3ba   : > { %v2101_v54 = vadd.f32 %v3193_v33, %v2100_v46  ;;  %v4143_v46 = vld [vmem:[%s4301_s17] ss:$0 sm:$0xff] }
 0x3bb   : > { %v2086_v6 = vmul.f32 %v3195_v44, %v2085_v34 }
 0x3bc   : > { %v2105_v20 = vsel %vm2104_vm10, %v3193_v33, %v2101_v54 }
 0x3bd   : > { %v2087_v59 = vadd.f32 %v3195_v44, %v2086_v6  ;;  %v2110_v40 = vsel %vm2107_vm12, %v2109_v48, %v2105_v20  ;;  %v4149_v20 = vstv %s2827_s0 }
 0x3be   : > { %v2118_v43 = vmul.f32 %v4048_v16, %v2110_v40  ;;  %v2134_v17 = vmul.f32 %v4053_v42, %v2110_v40  ;;  %v2158_v12 = vmul.f32 %v4057_v61, %v2110_v40 }
 0x3bf   : > { %v2091_v2 = vsel %vm2090_vm14, %v3195_v44, %v2087_v59 }
 0x3c0   : > { %v2096_v29 = vsel %vm2093_vm15, %v2095_v7, %v2091_v2  ;;  %v2126_v30 = vmul.f32 %v2118_v43, %v3534_v19  ;;  %v2142_v27 = vmul.f32 %v2134_v17, %v3600_v52  ;;  %v2166_v42 = vmul.f32 %v2158_v12, %v3618_v63 }
 0x3c1   : > { %v2117_v31 = vmul.f32 %v4062_v10, %v2096_v29  ;;  %v2133_v0 = vmul.f32 %v4066_v3, %v2096_v29  ;;  %v2157_v5 = vmul.f32 %v3191_v32, %v2096_v29  ;;  %v4126_v3 = vstv %s2828_s12  ;;  %s4263_s12 = scalar_lea.vmem %s4312_s28, %s3416_s29 }
 0x3c2   : > { %v2150_v18 = vadd.f32 %v2142_v27, %v2126_v30 }
 0x3c3   : > { %v2125_v11 = vmul.f32 %v2117_v31, %v3523_v13  ;;  %v2141_v16 = vmul.f32 %v2133_v0, %v3595_v50  ;;  %v2165_v61 = vmul.f32 %v2157_v5, %v3610_v56  ;;  %v3092_v13 = vld [vmem:[%s4307_s23] sm:$0xff] }
 0x3c4   : > { %v4107_v24 = vadd.f32 %v2166_v42, %v2150_v18  ;;  %2578 = vmatpush.bf16.msrb.mxu3 %v3092_v13  ;;  %v3088_v50 = vld [vmem:[%s4302_s18] sm:$0xff] }
 0x3c5   : > { %v2149_v14 = vadd.f32 %v2141_v16, %v2125_v11  ;;  %2336 = vmatpush.bf16.msra.mxu0 %v3088_v50  ;;  %v4123_v56 = vld [vmem:[%s4306_s22] ss:$0 sm:$0xff] }
 0x3c7   : > { %v4109_v19 = vadd.f32 %v2165_v61, %v2149_v14 }
 0x3c9   : > { %v2178_v52 = vpack.c.bf16 %v4107_v24, %v4109_v19 }
 0x3cb   : > { %2997 = vmatmul.msk.bf16.gmra.mxu3 %vm1278_vm0, %v2178_v52 }
 0x3e3   : > { %v2490_v63 = vpop.f32.mrf.mxu2 }
 0x3e4   : > { %v2491_v10 = vadd.f32 %v4123_v56, %v2490_v63 }
 0x3e6   : > { %v2519_v32 = vmul.f32 %v4126_v3, %v2491_v10  ;;  %vm2510_vm1 = vcmp.ge.f32.partialorder %v2491_v10, 0.0 }
 0x3e8   : > { %v2527_v28 = vsel %vm2510_vm1, %v2491_v10, %v2519_v32 }
 0x3eb   : > { %v2492_v55 = vpop.f32.mrf.mxu2 }
 0x3ec   : > { %v2493_v41 = vadd.f32 %v4123_v56, %v2492_v55 }
 0x3ee   : > { %vm2511_vm2 = vcmp.ge.f32.partialorder %v2493_v41, 0.0  ;;  %v2520_v22 = vmul.f32 %v4126_v3, %v2493_v41 }
 0x3f0   : > { %v2528_v26 = vsel %vm2511_vm2, %v2493_v41, %v2520_v22 }
 0x3f1   : > { %v2535_v36 = vpack.c.bf16 %v2528_v26, %v2527_v28 }
 0x3f3   : > { %v2495_v1 = vpop.f32.mrf.mxu2  ;;  %3034 = vmatmul.msk.bf16.vlgmr.msrb.gmra.mxu3 %vm1278_vm0, %v2535_v36 }
 0x3f4   : > { %v2496_v49 = vadd.f32 %v4123_v56, %v2495_v1 }
 0x3f6   : > { %v2521_v25 = vmul.f32 %v4126_v3, %v2496_v49  ;;  %vm2512_vm3 = vcmp.ge.f32.partialorder %v2496_v49, 0.0 }
 0x3f8   : > { %v2529_v53 = vsel %vm2512_vm3, %v2496_v49, %v2521_v25 }
 0x3fb   : > { %v2497_v38 = vpop.f32.mrf.mxu2 }
 0x3fc   : > { %v2498_v9 = vadd.f32 %v4123_v56, %v2497_v38 }
 0x3fe   : > { %vm2513_vm4 = vcmp.ge.f32.partialorder %v2498_v9, 0.0  ;;  %v2522_v45 = vmul.f32 %v4126_v3, %v2498_v9 }
 0x400   : > { %v2530_v33 = vsel %vm2513_vm4, %v2498_v9, %v2522_v45 }
 0x401   : > { %v2536_v8 = vpack.c.bf16 %v2530_v33, %v2529_v53 }
 0x403   : > { %3035 = vmatmul.msk.bf16.gmra.mxu3 %vm1278_vm0, %v2536_v8  ;;  %v3091_v8 = vld [vmem:[%s4303_s19 + $0x8] sm:$0xff] }
 0x404   : > { %2424 = vmatpush.bf16.msrb.mxu1 %v3091_v8 }
 0x409   : > { %v2500_v44 = vpop.f32.mrf.mxu2 }
 0x40a   : > { %v2501_v47 = vadd.f32 %v4123_v56, %v2500_v44  ;;  %v3095_v44 = vld [vmem:[%s4309_s25 + $0x8] sm:$0xff] }
 0x40b   : > { %2666 = vmatpush.bf16.msrb.mxu0 %v3095_v44 }
 0x40c   : > { %v2523_v35 = vmul.f32 %v4126_v3, %v2501_v47  ;;  %vm2514_vm5 = vcmp.ge.f32.partialorder %v2501_v47, 0.0 }
 0x40e   : > { %v2531_v62 = vsel %vm2514_vm5, %v2501_v47, %v2523_v35 }
 0x411   : > { %v2502_v4 = vpop.f32.mrf.mxu2 }
 0x412   : > { %v2503_v15 = vadd.f32 %v4123_v56, %v2502_v4 }
 0x414   : > { %vm2515_vm6 = vcmp.ge.f32.partialorder %v2503_v15, 0.0  ;;  %v2524_v34 = vmul.f32 %v4126_v3, %v2503_v15 }
 0x416   : > { %v2532_v54 = vsel %vm2515_vm6, %v2503_v15, %v2524_v34 }
 0x417   : > { %v2220_v51 = vpop.f32.mrf.mxu3  ;;  %v2537_v39 = vpack.c.bf16 %v2532_v54, %v2531_v62 }
 0x418   : > { %v2221_v6 = vadd.f32 %v4143_v46, %v2220_v51 }
 0x419   : > { %3036 = vmatmul.msk.bf16.gmra.mxu3 %vm1278_vm0, %v2537_v39 }
 0x41a   : > { %v2240_v48 = vadd.f32 %v2221_v6, %v3945_v57 }
 0x41c   : > { %v2257_v59 = vmul.f32 %v4149_v20, %v2240_v48  ;;  %vm2248_vm7 = vcmp.ge.f32.partialorder %v2240_v48, 0.0  ;;  %v2281_v27 = vmul.f32 0.5, %v2240_v48 }
 0x41e   : > { %v2505_v43 = vpop.f32.mrf.mxu2  ;;  %v4153_v17 = vsel %vm2248_vm7, %v2240_v48, %v2257_v59 }
 0x41f   : > { %v2222_v40 = vpop.f32.mrf.mxu3  ;;  %v2506_v12 = vadd.f32 %v4123_v56, %v2505_v43  ;;  %v2273_v29 = vmul.f32 0.5, %v4153_v17 }
 0x420   : > { %v2223_v7 = vadd.f32 %v4143_v46, %v2222_v40 }
 0x421   : > { %v2525_v5 = vmul.f32 %v4126_v3, %v2506_v12  ;;  %vm2516_vm9 = vcmp.ge.f32.partialorder %v2506_v12, 0.0  ;;  %v2289_v11 = vadd.f32 %v2281_v27, %v2273_v29 }
 0x422   : > { %v2241_v2 = vadd.f32 %v2223_v7, %v3961_v23 }
 0x423   : > { %v2533_v14 = vsel %vm2516_vm9, %v2506_v12, %v2525_v5 }
 0x424   : > { %vm2249_vm8 = vcmp.ge.f32.partialorder %v2241_v2, 0.0  ;;  %v2258_v57 = vmul.f32 %v4149_v20, %v2241_v2  ;;  %v2282_v0 = vmul.f32 0.5, %v2241_v2 }
 0x426   : > { %v4159_v30 = vsel %vm2249_vm8, %v2241_v2, %v2258_v57  ;;  %v2507_v18 = vpop.f32.mrf.mxu2 }
 0x427   : > { %v2274_v31 = vmul.f32 0.5, %v4159_v30  ;;  %v2508_v23 = vadd.f32 %v4123_v56, %v2507_v18 }
 0x429   : > { %v2290_v16 = vadd.f32 %v2282_v0, %v2274_v31  ;;  %vm2517_vm10 = vcmp.ge.f32.partialorder %v2508_v23, 0.0  ;;  %v2526_v61 = vmul.f32 %v4126_v3, %v2508_v23 }
 0x42b   : > { %v2297_v42 = vpack.c.bf16 %v2290_v16, %v2289_v11  ;;  %v2534_v13 = vsel %vm2517_vm10, %v2508_v23, %v2526_v61 }
 0x42c   : > { %v2225_v52 = vpop.f32.mrf.mxu3  ;;  %v2538_v63 = vpack.c.bf16 %v2534_v13, %v2533_v14 }
 0x42d   : > { %3006 = vmatmul.msk.bf16.vlgmr.msra.gmra.mxu0 %vm1278_vm0, %v2297_v42  ;;  %v2226_v50 = vadd.f32 %v4143_v46, %v2225_v52  ;;  %v3129_v42 = vld [vmem:[%s4308_s24] ss:$0 sm:$0xff] }
 0x42e   : > { %3037 = vmatmul.msk.bf16.gmra.mxu3 %vm1278_vm0, %v2538_v63 }
 0x42f   : > { %v2242_v10 = vadd.f32 %v2226_v50, %v4042_v21 }
 0x431   : > { %v2259_v32 = vmul.f32 %v4149_v20, %v2242_v10  ;;  %vm2250_vm12 = vcmp.ge.f32.partialorder %v2242_v10, 0.0  ;;  %v2283_v49 = vmul.f32 0.5, %v2242_v10 }
 0x433   : > { %v4172_v28 = vsel %vm2250_vm12, %v2242_v10, %v2259_v32 }
 0x434   : > { %v2227_v56 = vpop.f32.mrf.mxu3  ;;  %v2275_v26 = vmul.f32 0.5, %v4172_v28 }
 0x435   : > { %v2228_v55 = vadd.f32 %v4143_v46, %v2227_v56 }
 0x436   : > { %v2291_v9 = vadd.f32 %v2283_v49, %v2275_v26 }
 0x437   : > { %v2243_v41 = vadd.f32 %v2228_v55, %v4045_v37 }
 0x439   : > { %vm2251_vm13 = vcmp.ge.f32.partialorder %v2243_v41, 0.0  ;;  %v2260_v22 = vmul.f32 %v4149_v20, %v2243_v41  ;;  %v2284_v25 = vmul.f32 0.5, %v2243_v41 }
 0x43b   : > { %v4176_v36 = vsel %vm2251_vm13, %v2243_v41, %v2260_v22 }
 0x43c   : > { %v2230_v21 = vpop.f32.mrf.mxu3  ;;  %v2276_v1 = vmul.f32 0.5, %v4176_v36 }
 0x43d   : > { %v2231_v38 = vadd.f32 %v4143_v46, %v2230_v21 }
 0x43e   : > { %v2292_v53 = vadd.f32 %v2284_v25, %v2276_v1 }
 0x43f   : > { %v2244_v37 = vadd.f32 %v2231_v38, %v4089_v58 }
 0x440   : > { %v2298_v45 = vpack.c.bf16 %v2292_v53, %v2291_v9 }
 0x441   : > { %v2261_v33 = vmul.f32 %v4149_v20, %v2244_v37  ;;  %vm2252_vm14 = vcmp.ge.f32.partialorder %v2244_v37, 0.0  ;;  %v2285_v54 = vmul.f32 0.5, %v2244_v37 }
 0x442   : > { %3007 = vmatmul.msk.bf16.gmra.mxu0 %vm1278_vm0, %v2298_v45 }
 0x443   : > { %v4191_v4 = vsel %vm2252_vm14, %v2244_v37, %v2261_v33 }
 0x444   : > { %v2232_v47 = vpop.f32.mrf.mxu3  ;;  %v2277_v62 = vmul.f32 0.5, %v4191_v4 }
 0x445   : > { %v2233_v35 = vadd.f32 %v4143_v46, %v2232_v47 }
 0x446   : > { %v2293_v59 = vadd.f32 %v2285_v54, %v2277_v62 }
 0x447   : > { %v2245_v58 = vadd.f32 %v2233_v35, %v4091_v60 }
 0x449   : > { %vm2253_vm15 = vcmp.ge.f32.partialorder %v2245_v58, 0.0  ;;  %v2262_v15 = vmul.f32 %v4149_v20, %v2245_v58  ;;  %v2286_v6 = vmul.f32 0.5, %v2245_v58 }
 0x44b   : > { %v4195_v34 = vsel %vm2253_vm15, %v2245_v58, %v2262_v15 }
 0x44c   : > { %v2278_v51 = vmul.f32 0.5, %v4195_v34 }
 0x44e   : > { %v2235_v39 = vpop.f32.mrf.mxu3  ;;  %v2294_v40 = vadd.f32 %v2286_v6, %v2278_v51 }
 0x44f   : > { %v2236_v48 = vadd.f32 %v4143_v46, %v2235_v39 }
 0x450   : > { %v2299_v7 = vpack.c.bf16 %v2294_v40, %v2293_v59 }
 0x451   : > { %v2246_v60 = vadd.f32 %v2236_v48, %v4109_v19 }
 0x452   : > { %3008 = vmatmul.msk.bf16.gmra.mxu0 %vm1278_vm0, %v2299_v7 }
 0x453   : > { %v2263_v43 = vmul.f32 %v4149_v20, %v2246_v60  ;;  %vm2254_vm1 = vcmp.ge.f32.partialorder %v2246_v60, 0.0  ;;  %v2287_v5 = vmul.f32 0.5, %v2246_v60 }
 0x455   : > { %v4204_v29 = vsel %vm2254_vm1, %v2246_v60, %v2263_v43 }
 0x456   : > { %v2237_v2 = vpop.f32.mrf.mxu3  ;;  %v2279_v31 = vmul.f32 0.5, %v4204_v29 }
 0x457   : > { %v2238_v12 = vadd.f32 %v4143_v46, %v2237_v2  ;;  %v3094_v46 = vld [vmem:[%s4309_s25] sm:$0xff] }
 0x458   : > { %v2295_v11 = vadd.f32 %v2287_v5, %v2279_v31  ;;  %2667 = vmatpush.bf16.msrb.mxu0 %v3094_v46 }
 0x459   : > { %v2247_v57 = vadd.f32 %v2238_v12, %v4107_v24  ;;  %v3090_v24 = vld [vmem:[%s4303_s19] sm:$0xff] }
 0x45a   : > { %2425 = vmatpush.bf16.msrb.mxu1 %v3090_v24 }
 0x45b   : > { %vm2255_vm2 = vcmp.ge.f32.partialorder %v2247_v57, 0.0  ;;  %v2264_v27 = vmul.f32 %v4149_v20, %v2247_v57  ;;  %v2288_v18 = vmul.f32 0.5, %v2247_v57 }
 0x45d   : > { %v4208_v0 = vsel %vm2255_vm2, %v2247_v57, %v2264_v27 }
 0x45e   : > { %v2280_v19 = vmul.f32 0.5, %v4208_v0 }
 0x460   : > { %v2296_v16 = vadd.f32 %v2288_v18, %v2280_v19 }
 0x462   : > { %v2300_v23 = vpack.c.bf16 %v2296_v16, %v2295_v11 }
 0x464   : > { %3009 = vmatmul.msk.bf16.gmra.mxu0 %vm1278_vm0, %v2300_v23 }
 0x476   : > { %v2580_v14 = vpop.f32.mrf.mxu3 }
 0x477   : > { %v2581_v61 = vadd.f32 %v3129_v42, %v2580_v14 }
 0x479   : > { %v2608_v52 = vmul.f32 %v2581_v61, %v4126_v3  ;;  %vm2600_vm3 = vcmp.ge.f32.partialorder %v2581_v61, 0.0 }
 0x47b   : > { %v2616_v63 = vsel %vm2600_vm3, %v2581_v61, %v2608_v52 }
 0x47e   : > { %v2582_v13 = vpop.f32.mrf.mxu3 }
 0x47f   : > { %v2583_v50 = vadd.f32 %v3129_v42, %v2582_v13 }
 0x481   : > { %vm2601_vm4 = vcmp.ge.f32.partialorder %v2583_v50, 0.0  ;;  %v2609_v10 = vmul.f32 %v2583_v50, %v4126_v3 }
 0x483   : > { %v2617_v32 = vsel %vm2601_vm4, %v2583_v50, %v2609_v10 }
 0x484   : > { %v2624_v56 = vpack.c.bf16 %v2617_v32, %v2616_v63 }
 0x486   : > { %3046 = vmatmul.msk.bf16.vlgmr.msrb.gmra.mxu0 %vm1278_vm0, %v2624_v56  ;;  %v2585_v55 = vpop.f32.mrf.mxu3 }
 0x487   : > { %v2586_v41 = vadd.f32 %v3129_v42, %v2585_v55 }
 0x489   : > { %v2610_v22 = vmul.f32 %v2586_v41, %v4126_v3  ;;  %vm2602_vm5 = vcmp.ge.f32.partialorder %v2586_v41, 0.0 }
 0x48b   : > { %v2618_v49 = vsel %vm2602_vm5, %v2586_v41, %v2610_v22 }
 0x48e   : > { %v2587_v26 = vpop.f32.mrf.mxu3 }
 0x48f   : > { %v2588_v21 = vadd.f32 %v3129_v42, %v2587_v26  ;;  %v3131_v26 = vld [vmem:[%s4304_s20] ss:$0 sm:$0xff] }
 0x491   : > { %vm2603_vm6 = vcmp.ge.f32.partialorder %v2588_v21, 0.0  ;;  %v2611_v1 = vmul.f32 %v2588_v21, %v4126_v3 }
 0x493   : > { %v2619_v25 = vsel %vm2603_vm6, %v2588_v21, %v2611_v1 }
 0x494   : > { %v2625_v38 = vpack.c.bf16 %v2619_v25, %v2618_v49 }
 0x496   : > { %3047 = vmatmul.msk.bf16.gmra.mxu0 %vm1278_vm0, %v2625_v38 }
 0x49c   : > { %v2590_v9 = vpop.f32.mrf.mxu3 }
 0x49d   : > { %v2591_v53 = vadd.f32 %v3129_v42, %v2590_v9 }
 0x49f   : > { %v2612_v37 = vmul.f32 %v2591_v53, %v4126_v3  ;;  %vm2604_vm7 = vcmp.ge.f32.partialorder %v2591_v53, 0.0 }
 0x4a1   : > { %v2620_v8 = vsel %vm2604_vm7, %v2591_v53, %v2612_v37 }
 0x4a4   : > { %v2592_v45 = vpop.f32.mrf.mxu3 }
 0x4a5   : > { %v2593_v33 = vadd.f32 %v3129_v42, %v2592_v45 }
 0x4a7   : > { %vm2605_vm8 = vcmp.ge.f32.partialorder %v2593_v33, 0.0  ;;  %v2613_v44 = vmul.f32 %v2593_v33, %v4126_v3 }
 0x4a9   : > { %v2621_v35 = vsel %vm2605_vm8, %v2593_v33, %v2613_v44 }
 0x4aa   : > { %v2338_v47 = vpop.f32.mrf.mxu0  ;;  %v2626_v58 = vpack.c.bf16 %v2621_v35, %v2620_v8 }
 0x4ab   : > { %v2339_v15 = vadd.f32 %v2338_v47, %v4153_v17 }
 0x4ac   : > { %3048 = vmatmul.msk.bf16.gmra.mxu0 %vm1278_vm0, %v2626_v58 }
 0x4ad   : > { %v2366_v51 = vmul.f32 %v2339_v15, %v4149_v20  ;;  %vm2358_vm9 = vcmp.ge.f32.partialorder %v2339_v15, 0.0 }
 0x4af   : > { %v2374_v59 = vsel %vm2358_vm9, %v2339_v15, %v2366_v51 }
 0x4b1   : > { %v2595_v6 = vpop.f32.mrf.mxu3 }
 0x4b2   : > { %v2340_v62 = vpop.f32.mrf.mxu0  ;;  %v2596_v48 = vadd.f32 %v3129_v42, %v2595_v6 }
 0x4b3   : > { %v2341_v54 = vadd.f32 %v2340_v62, %v4159_v30 }
 0x4b4   : > { %v2614_v7 = vmul.f32 %v2596_v48, %v4126_v3  ;;  %vm2606_vm12 = vcmp.ge.f32.partialorder %v2596_v48, 0.0 }
 0x4b5   : > { %vm2359_vm10 = vcmp.ge.f32.partialorder %v2341_v54, 0.0  ;;  %v2367_v39 = vmul.f32 %v2341_v54, %v4149_v20 }
 0x4b6   : > { %v2622_v2 = vsel %vm2606_vm12, %v2596_v48, %v2614_v7 }
 0x4b7   : > { %v2375_v40 = vsel %vm2359_vm10, %v2341_v54, %v2367_v39 }
 0x4b8   : > { %v2382_v60 = vpack.c.bf16 %v2375_v40, %v2374_v59 }
 0x4b9   : > { %v2597_v17 = vpop.f32.mrf.mxu3 }
 0x4ba   : > { %3018 = vmatmul.msk.bf16.vlgmr.msrb.gmra.mxu1 %vm1278_vm0, %v2382_v60  ;;  %v2598_v43 = vadd.f32 %v3129_v42, %v2597_v17 }
 0x4bc   : > { %vm2607_vm13 = vcmp.ge.f32.partialorder %v2598_v43, 0.0  ;;  %v2615_v30 = vmul.f32 %v2598_v43, %v4126_v3 }
 0x4be   : > { %v2623_v57 = vsel %vm2607_vm13, %v2598_v43, %v2615_v30 }
 0x4bf   : > { %v2343_v12 = vpop.f32.mrf.mxu0  ;;  %v2627_v27 = vpack.c.bf16 %v2623_v57, %v2622_v2 }
 0x4c0   : > { %v2344_v31 = vadd.f32 %v2343_v12, %v4172_v28 }
 0x4c1   : > { %3049 = vmatmul.msk.bf16.gmra.mxu0 %vm1278_vm0, %v2627_v27 }
 0x4c2   : > { %v2368_v5 = vmul.f32 %v2344_v31, %v4149_v20  ;;  %vm2360_vm14 = vcmp.ge.f32.partialorder %v2344_v31, 0.0 }
 0x4c4   : > { %v2376_v16 = vsel %vm2360_vm14, %v2344_v31, %v2368_v5 }
 0x4c7   : > { %v2345_v19 = vpop.f32.mrf.mxu0 }
 0x4c8   : > { %v2346_v18 = vadd.f32 %v2345_v19, %v4176_v36 }
 0x4ca   : > { %vm2361_vm15 = vcmp.ge.f32.partialorder %v2346_v18, 0.0  ;;  %v2369_v11 = vmul.f32 %v2346_v18, %v4149_v20 }
 0x4cc   : > { %v2377_v23 = vsel %vm2361_vm15, %v2346_v18, %v2369_v11 }
 0x4cd   : > { %v2383_v24 = vpack.c.bf16 %v2377_v23, %v2376_v16 }
 0x4cf   : > { %v2348_v3 = vpop.f32.mrf.mxu0  ;;  %3019 = vmatmul.msk.bf16.gmra.mxu1 %vm1278_vm0, %v2383_v24 }
 0x4d0   : > { %v2349_v46 = vadd.f32 %v2348_v3, %v4191_v4 }
 0x4d2   : > { %v2370_v28 = vmul.f32 %v2349_v46, %v4149_v20  ;;  %vm2362_vm1 = vcmp.ge.f32.partialorder %v2349_v46, 0.0 }
 0x4d4   : > { %v2378_v61 = vsel %vm2362_vm1, %v2349_v46, %v2370_v28 }
 0x4d7   : > { %v2350_v42 = vpop.f32.mrf.mxu0 }
 0x4d8   : > { %v2351_v14 = vadd.f32 %v2350_v42, %v4195_v34 }
 0x4da   : > { %vm2363_vm2 = vcmp.ge.f32.partialorder %v2351_v14, 0.0  ;;  %v2371_v36 = vmul.f32 %v2351_v14, %v4149_v20 }
 0x4dc   : > { %v2379_v52 = vsel %vm2363_vm2, %v2351_v14, %v2371_v36 }
 0x4dd   : > { %v2384_v13 = vpack.c.bf16 %v2379_v52, %v2378_v61 }
 0x4df   : > { %3020 = vmatmul.msk.bf16.gmra.mxu1 %vm1278_vm0, %v2384_v13 }
 0x4e1   : > { %v2353_v50 = vpop.f32.mrf.mxu0 }
 0x4e2   : > { %v2354_v63 = vadd.f32 %v2353_v50, %v4204_v29  ;;  %v3130_v29 = vld [vmem:[%s4310_s26] ss:$0 sm:$0xff] }
 0x4e4   : > { %v2372_v4 = vmul.f32 %v2354_v63, %v4149_v20  ;;  %vm2364_vm3 = vcmp.ge.f32.partialorder %v2354_v63, 0.0 }
 0x4e6   : > { %v2380_v56 = vsel %vm2364_vm3, %v2354_v63, %v2372_v4 }
 0x4e9   : > { %v2355_v10 = vpop.f32.mrf.mxu0 }
 0x4ea   : > { %v2356_v32 = vadd.f32 %v2355_v10, %v4208_v0 }
 0x4ec   : > { %vm2365_vm4 = vcmp.ge.f32.partialorder %v2356_v32, 0.0  ;;  %v2373_v34 = vmul.f32 %v2356_v32, %v4149_v20 }
 0x4ee   : > { %v2381_v55 = vsel %vm2365_vm4, %v2356_v32, %v2373_v34 }
 0x4ef   : > { %v2385_v41 = vpack.c.bf16 %v2381_v55, %v2380_v56 }
 0x4f1   : > { %3021 = vmatmul.msk.bf16.gmra.mxu1 %vm1278_vm0, %v2385_v41 }
 0x503   : > { %v2669_v22 = vpop.f32.mrf.mxu0 }
 0x504   : > { %v2670_v0 = vadd.f32 %v3130_v29, %v2669_v22 }
 0x50b   : > { %v2671_v1 = vpop.f32.mrf.mxu0 }
 0x50c   : > { %v2672_v38 = vadd.f32 %v3130_v29, %v2671_v1 }
 0x513   : > { %v2674_v53 = vpop.f32.mrf.mxu0 }
 0x514   : > { %v2675_v8 = vadd.f32 %v3130_v29, %v2674_v53 }
 0x51b   : > { %v2676_v45 = vpop.f32.mrf.mxu0 }
 0x51c   : > { %v2677_v58 = vadd.f32 %v3130_v29, %v2676_v45 }
 0x529   : > { %v2679_v15 = vpop.f32.mrf.mxu0 }
 0x52a   : > { %v2680_v6 = vadd.f32 %v3130_v29, %v2679_v15 }
 0x531   : > { %v2681_v48 = vpop.f32.mrf.mxu0 }
 0x532   : > { %v2682_v60 = vadd.f32 %v3130_v29, %v2681_v48 }
 0x537   : > { %v2427_v21 = vpop.f32.mrf.mxu1 }
 0x538   : > { %v2428_v49 = vadd.f32 %v3131_v26, %v2427_v21 }
 0x53a   : > { %v2689_v20 = vadd.f32 %v2670_v0, %v2428_v49 }
 0x53c   : > { %2697 = vst.msk [vmem:[%s4263_s12] sm:$0xff] %vm2464_vm11, %v2689_v20 }
 0x53e   : > { %v2684_v43 = vpop.f32.mrf.mxu0 }
 0x53f   : > { %v2429_v25 = vpop.f32.mrf.mxu1  ;;  %v2685_v30 = vadd.f32 %v3130_v29, %v2684_v43 }
 0x540   : > { %v2430_v9 = vadd.f32 %v3131_v26, %v2429_v25 }
 0x542   : > { %v2690_v37 = vadd.f32 %v2672_v38, %v2430_v9 }
 0x544   : > { %2698 = vst.msk [vmem:[%s4263_s12 + $0x8] sm:$0xff] %vm2464_vm11, %v2690_v37 }
 0x546   : > { %v2686_v27 = vpop.f32.mrf.mxu0 }
 0x547   : > { %v2687_v19 = vadd.f32 %v3130_v29, %v2686_v27 }
 0x54c   : > { %v2432_v33 = vpop.f32.mrf.mxu1 }
 0x54d   : > { %v2433_v44 = vadd.f32 %v3131_v26, %v2432_v33 }
 0x54f   : > { %v2691_v47 = vadd.f32 %v2675_v8, %v2433_v44 }
 0x551   : > { %2699 = vst.msk [vmem:[%s4263_s12 + $0x10] sm:$0xff] %vm2464_vm11, %v2691_v47 }
 0x554   : > { %v2434_v35 = vpop.f32.mrf.mxu1 }
 0x555   : > { %v2435_v62 = vadd.f32 %v3131_v26, %v2434_v35 }
 0x557   : > { %v2692_v51 = vadd.f32 %v2677_v58, %v2435_v62 }
 0x559   : > { %2700 = vst.msk [vmem:[%s4263_s12 + $0x18] sm:$0xff] %vm2464_vm11, %v2692_v51 }
 0x55c   : > { %v2437_v54 = vpop.f32.mrf.mxu1 }
 0x55d   : > { %v2438_v39 = vadd.f32 %v3131_v26, %v2437_v54 }
 0x55f   : > { %v2693_v59 = vadd.f32 %v2680_v6, %v2438_v39 }
 0x561   : > { %2701 = vst.msk [vmem:[%s4263_s12 + $0x20] sm:$0xff] %vm2464_vm11, %v2693_v59 }
 0x564   : > { %v2439_v40 = vpop.f32.mrf.mxu1 }
 0x565   : > { %v2440_v7 = vadd.f32 %v3131_v26, %v2439_v40 }
 0x567   : > { %v2694_v17 = vadd.f32 %v2682_v60, %v2440_v7 }
 0x569   : > { %2702 = vst.msk [vmem:[%s4263_s12 + $0x28] sm:$0xff] %vm2464_vm11, %v2694_v17 }
 0x56e   : > { %v2442_v2 = vpop.f32.mrf.mxu1 }
 0x56f   : > { %v2443_v12 = vadd.f32 %v3131_v26, %v2442_v2 }
 0x571   : > { %v2695_v57 = vadd.f32 %v2685_v30, %v2443_v12 }
 0x573   : > { %2703 = vst.msk [vmem:[%s4263_s12 + $0x30] sm:$0xff] %vm2464_vm11, %v2695_v57 }
 0x576   : > { %v2444_v31 = vpop.f32.mrf.mxu1 }
 0x577   : > { %v2445_v5 = vadd.f32 %v3131_v26, %v2444_v31 }
 0x579   : > { %v2696_v18 = vadd.f32 %v2687_v19, %v2445_v5 }
 0x57b   : > { %2704 = vst.msk [vmem:[%s4263_s12 + $0x38] sm:$0xff] %vm2464_vm11, %v2696_v18 }
 0x57c PF: > { %s39_s8 = sadd.s32 1, %s3221_s8  }
 0x57d   : > { %p36_p7 = scmp.ge.s32.totalorder %s39_s8, 4  }
 0x57f   :  { %38 = sbr.rel (!%p36_p7) target bundleno = 16 (0x10), region = 176 }
 0x584   :  { %2727 = vsyncpa [#allocation3], 1 }
 0x585   :  { %2729 = vsyncpa [#allocation3 + $0x1], 1 }

</bundles_post_ra>
